<compile_context>
chip_gen: v7x
topology: tpu7x:2x2x1
jax: 0.10.0
libtpu: 0.0.40
codegen_flags: <defaults>
</compile_context>

<pallas_src>
import math
from functools import partial

import jax
import jax.numpy as jnp
from jax.experimental import pallas as pl
from jax.experimental.pallas import tpu as pltpu

BN_EPS = 1e-3
LANE = 128
_VMEM_LIMIT = 32 * 1024 * 1024        # safe on v5e/v6e/v7x
_VMEM = pl.BlockSpec(memory_space=pltpu.MemorySpace.VMEM)
ACT_DTYPE = jnp.bfloat16              # inter-layer activation storage dtype (HBM)


# ----------------------------- activations (in-kernel) -----------------------
def _identity(x):
    return x


def _relu(x):
    return jnp.maximum(x, 0.0)


def _hardswish(x):
    return x * jnp.clip(x + 3.0, 0.0, 6.0) * (1.0 / 6.0)


def _hardsigmoid(x):
    return jnp.clip(x + 3.0, 0.0, 6.0) * (1.0 / 6.0)


# ----------------------------- helpers ---------------------------------------
def _round_up(c, m=LANE):
    return ((c + m - 1) // m) * m


def _pad_rc(w, rp, cp):
    return jnp.pad(w, ((0, rp - w.shape[0]), (0, cp - w.shape[1])))


# ----------------------------- fused matmul kernel ----------------------------
def _make_mm_kernel(act, use_res):
    def kernel(*refs):
        if use_res:
            a_ref, w_ref, b_ref, r_ref, o_ref = refs
        else:
            a_ref, w_ref, b_ref, o_ref = refs
        y = jnp.dot(a_ref[0], w_ref[...], preferred_element_type=jnp.float32)
        y = act(y + b_ref[...])                       # bias (folded BN beta) + NL
        if use_res:
            y = y + r_ref[0].astype(jnp.float32)      # residual (bf16 in HBM)
        o_ref[0] = y.astype(o_ref.dtype)
    return kernel


def matmul_act(a, w, bias, act, residual=None, out_dtype=ACT_DTYPE, tm=512, tn=512):
    """o = act(a @ w + bias) [+ residual]  (folded-BN scale already in w).

    a: (B, M, K) bf16;  w: (K, N) bf16;  bias: (N,) f32;  residual: (B, M, N) bf16.
    """
    B, M, Kd = a.shape
    Np = w.shape[1]
    tm = min(tm, M)
    tn = min(tn, Np)
    grid = (B, pl.cdiv(M, tm), pl.cdiv(Np, tn))

    in_specs = [pl.BlockSpec((1, tm, Kd), lambda b, i, j: (b, i, 0)),
                pl.BlockSpec((Kd, tn), lambda b, i, j: (0, j)),
                pl.BlockSpec((1, tn), lambda b, i, j: (0, j))]
    args = [a.astype(jnp.bfloat16), w.astype(jnp.bfloat16),
            bias.reshape(1, Np).astype(jnp.float32)]
    bytes_accessed = a.size * 2 + w.size * 2 + B * M * Np * jnp.dtype(out_dtype).itemsize
    if residual is not None:
        in_specs.append(pl.BlockSpec((1, tm, tn), lambda b, i, j: (b, i, j)))
        args.append(residual.astype(jnp.bfloat16))
        bytes_accessed += residual.size * 2

    return pl.pallas_call(
        _make_mm_kernel(act, residual is not None),
        grid=grid,
        in_specs=in_specs,
        out_specs=pl.BlockSpec((1, tm, tn), lambda b, i, j: (b, i, j)),
        out_shape=jax.ShapeDtypeStruct((B, M, Np), out_dtype),
        compiler_params=pltpu.CompilerParams(
            dimension_semantics=("parallel", "parallel", "parallel"),
            vmem_limit_bytes=_VMEM_LIMIT),
        cost_estimate=pl.CostEstimate(flops=int(2 * B * M * Kd * Np),
                                      transcendentals=0,
                                      bytes_accessed=int(bytes_accessed)),
    )(*args)


# ----------------------------- depthwise conv (+ fused SE) kernel -------------
def _dw_kernel(K, s, Ho, Wo, Cp, act, use_se, *refs):
    if use_se:
        x_ref, w_ref, b_ref, w1_ref, b1_ref, w2_ref, b2_ref, o_ref = refs
    else:
        x_ref, w_ref, b_ref, o_ref = refs
    # x_ref: (1, Hq, s, Wq, s*Cp) bf16;  w_ref: (K*K, 1, Cp) f32 (BN scale folded)
    w = w_ref[...]
    acc = None
    for ki in range(K):                               # static unroll over taps
        i0, pi = ki // s, ki % s
        for kj in range(K):
            j0, pj = kj // s, kj % s
            # Stride handled via the (free) host reshape: H phase is a tiny dim,
            # W phase lives in the lane dim -> 128-aligned lane slice; only the
            # small j0 (<= (K-1)//s) offset touches the sublane dim.
            tap = x_ref[0, i0:i0 + Ho, pi, j0:j0 + Wo, pj * Cp:(pj + 1) * Cp]
            term = tap.astype(jnp.float32) * w[ki * K + kj]
            acc = term if acc is None else acc + term
    y = act(acc + b_ref[...])                         # (Ho, Wo, Cp) f32
    if use_se:
        # Fused SqueezeExcitation: avgpool -> fc1 -> relu -> fc2 -> hsigmoid -> scale.
        pooled = jnp.mean(jnp.mean(y, axis=0), axis=0, keepdims=True)      # (1, Cp)
        t = jnp.dot(pooled.astype(jnp.bfloat16), w1_ref[...],
                    preferred_element_type=jnp.float32) + b1_ref[...]
        t = jnp.maximum(t, 0.0)
        t = jnp.dot(t.astype(jnp.bfloat16), w2_ref[...],
                    preferred_element_type=jnp.float32) + b2_ref[...]
        y = y * _hardsigmoid(t)                       # padded lanes: 0.5 * 0 = 0
    o_ref[0] = y.astype(o_ref.dtype)


def depthwise_conv_bn_act(x, w_taps, bias, kernel, stride, act, se=None):
    """Depthwise conv (groups=C) + folded BN + activation [+ fused SE].

    x: (N, H, W, Cp) bf16;  w_taps: (K*K, Cp) f32 (BN scale folded);  bias: (Cp,) f32.
    se: optional {"w1": (Cp,Sqp) bf16, "b1": (Sqp,), "w2": (Sqp,Cp) bf16, "b2": (Cp,)}.
    Returns y: (N, Ho, Wo, Cp) bf16 (already SE-scaled when se is given).
    """
    N, H, W, Cp = x.shape
    K, s = kernel, stride
    pad = (K - 1) // 2
    Ho = (H + 2 * pad - K) // s + 1
    Wo = (W + 2 * pad - K) // s + 1
    Hq = Ho + (K - 1) // s
    Wq = Wo + (K - 1) // s
    # Zero-pad spatially, then a *pure row-major reshape* (no transpose, no extra
    # HBM pass): (N, s*Hq, s*Wq, Cp) -> (N, Hq, s, Wq, s*Cp).
    xp = jnp.pad(x, ((0, 0),
                     (pad, s * Hq - H - pad),
                     (pad, s * Wq - W - pad),
                     (0, 0)))
    xq = xp.reshape(N, Hq, s, Wq, s * Cp)

    in_specs = [pl.BlockSpec((1, Hq, s, Wq, s * Cp), lambda n: (n, 0, 0, 0, 0)),
                pl.BlockSpec((K * K, 1, Cp), lambda n: (0, 0, 0)),
                pl.BlockSpec((1, Cp), lambda n: (0, 0))]
    args = [xq, w_taps.reshape(K * K, 1, Cp).astype(jnp.float32),
            bias.reshape(1, Cp).astype(jnp.float32)]
    use_se = se is not None
    if use_se:
        Sqp = se["w1"].shape[1]
        in_specs += [pl.BlockSpec((Cp, Sqp), lambda n: (0, 0)),
                     pl.BlockSpec((1, Sqp), lambda n: (0, 0)),
                     pl.BlockSpec((Sqp, Cp), lambda n: (0, 0)),
                     pl.BlockSpec((1, Cp), lambda n: (0, 0))]
        args += [se["w1"].astype(jnp.bfloat16),
                 se["b1"].reshape(1, Sqp).astype(jnp.float32),
                 se["w2"].astype(jnp.bfloat16),
                 se["b2"].reshape(1, Cp).astype(jnp.float32)]

    # TODO(synk): for large resolutions (224-res first stages) the whole-image block
    # should additionally be tiled over output rows with a manual halo DMA
    # (overlapping windows are not expressible with BlockSpec alone).
    return pl.pallas_call(
        partial(_dw_kernel, K, s, Ho, Wo, Cp, act, use_se),
        grid=(N,),
        in_specs=in_specs,
        out_specs=pl.BlockSpec((1, Ho, Wo, Cp), lambda n: (n, 0, 0, 0)),
        out_shape=jax.ShapeDtypeStruct((N, Ho, Wo, Cp), ACT_DTYPE),
        compiler_params=pltpu.CompilerParams(
            dimension_semantics=("parallel",),
            vmem_limit_bytes=_VMEM_LIMIT),
        cost_estimate=pl.CostEstimate(
            flops=int(2 * N * Ho * Wo * Cp * K * K),
            transcendentals=0,
            bytes_accessed=int(2 * (xq.size + N * Ho * Wo * Cp) + 4 * w_taps.size)),
    )(*args)


# ----------------------------- global average pool (tiny) ---------------------
def _gap_kernel(x_ref, o_ref):
    o_ref[0] = jnp.mean(x_ref[...].astype(jnp.float32), axis=1).astype(o_ref.dtype)


def global_avg_pool(x):
    """x: (N, M, Cp) bf16 -> (1, N, Cp) bf16 (ready for the (B, M, K) matmul format)."""
    N, M, Cp = x.shape
    return pl.pallas_call(
        _gap_kernel,
        out_shape=jax.ShapeDtypeStruct((1, N, Cp), ACT_DTYPE),
        in_specs=[_VMEM],
        out_specs=_VMEM,
    )(x)


# ----------------------------- configuration ---------------------------------
def _make_divisible(ch, divisor=8, min_ch=None):
    if min_ch is None:
        min_ch = divisor
    new_ch = max(min_ch, int(ch + divisor / 2) // divisor * divisor)
    if new_ch < 0.9 * ch:
        new_ch += divisor
    return new_ch


class InvertedResidualConfig:
    def __init__(self, input_c, kernel, expanded_c, out_c, use_se, activation,
                 stride, width_multi=1.0):
        self.input_c = _make_divisible(input_c * width_multi, 8)
        self.kernel = kernel
        self.expanded_c = _make_divisible(expanded_c * width_multi, 8)
        self.out_c = _make_divisible(out_c * width_multi, 8)
        self.use_se = use_se
        self.use_hs = activation == "HS"
        self.stride = stride


# ----------------------------- parameter init --------------------------------
def _kaiming(key, shape, fan_out):
    return math.sqrt(2.0 / fan_out) * jax.random.normal(key, shape, jnp.float32)


def init_params(key, settings, last_channel, num_classes):
    keys = iter(jax.random.split(key, 256))
    params = {}
    # Folded BatchNorm (inference): gamma=1, beta=0, mean=0, var=1 =>
    #   scale = 1/sqrt(var+eps), folded directly into the weight columns;
    #   bias  = beta - mean*scale = 0, kept as an explicit (tiny) epilogue input.
    bn_s = 1.0 / math.sqrt(1.0 + BN_EPS)

    first_c = settings[0].input_c
    first_cp = _round_up(first_c)
    stem_kp = _round_up(27)            # pad K*K*Cin = 27 -> 128 (lane-dense A operand)
    w = _kaiming(next(keys), (3, 3, 3, first_c), fan_out=first_c * 9).reshape(27, first_c)
    params["stem"] = {"w": _pad_rc(w * bn_s, stem_kp, first_cp).astype(jnp.bfloat16),
                      "bias": jnp.zeros((first_cp,), jnp.float32),
                      "kp": stem_kp}

    blocks = []
    for cnf in settings:
        bp = {}
        cin_p = _round_up(cnf.input_c)
        cexp_p = _round_up(cnf.expanded_c)
        cout_p = _round_up(cnf.out_c)
        if cnf.expanded_c != cnf.input_c:
            w = _kaiming(next(keys), (cnf.input_c, cnf.expanded_c),
                         fan_out=cnf.expanded_c)
            bp["exp"] = {"w": _pad_rc(w * bn_s, cin_p, cexp_p).astype(jnp.bfloat16),
                         "bias": jnp.zeros((cexp_p,), jnp.float32)}
        K = cnf.kernel
        w = _kaiming(next(keys), (K * K, cnf.expanded_c),
                     fan_out=cnf.expanded_c * K * K)
        bp["dw"] = {"w": _pad_rc(w * bn_s, K * K, cexp_p).astype(jnp.float32),
                    "bias": jnp.zeros((cexp_p,), jnp.float32)}
        if cnf.use_se:
            sq = _make_divisible(cnf.expanded_c // 4, 8)
            sq_p = _round_up(sq)
            w1 = _kaiming(next(keys), (cnf.expanded_c, sq), fan_out=sq)
            w2 = _kaiming(next(keys), (sq, cnf.expanded_c), fan_out=cnf.expanded_c)
            bp["se"] = {"w1": _pad_rc(w1, cexp_p, sq_p).astype(jnp.bfloat16),
                        "b1": jnp.zeros((sq_p,), jnp.float32),
                        "w2": _pad_rc(w2, sq_p, cexp_p).astype(jnp.bfloat16),
                        "b2": jnp.zeros((cexp_p,), jnp.float32)}
        w = _kaiming(next(keys), (cnf.expanded_c, cnf.out_c), fan_out=cnf.out_c)
        bp["proj"] = {"w": _pad_rc(w * bn_s, cexp_p, cout_p).astype(jnp.bfloat16),
                      "bias": jnp.zeros((cout_p,), jnp.float32)}
        blocks.append(bp)
    params["blocks"] = blocks

    last_in = settings[-1].out_c
    last_in_p = _round_up(last_in)
    last_out = 6 * last_in
    last_out_p = _round_up(last_out)
    w = _kaiming(next(keys), (last_in, last_out), fan_out=last_out)
    params["last"] = {"w": _pad_rc(w * bn_s, last_in_p, last_out_p).astype(jnp.bfloat16),
                      "bias": jnp.zeros((last_out_p,), jnp.float32)}

    lc_p = _round_up(last_channel)
    nc_p = _round_up(num_classes)
    w1 = 0.01 * jax.random.normal(next(keys), (last_out, last_channel), jnp.float32)
    w2 = 0.01 * jax.random.normal(next(keys), (last_channel, num_classes), jnp.float32)
    params["cls"] = {"w1": _pad_rc(w1, last_out_p, lc_p).astype(jnp.bfloat16),
                     "b1": jnp.zeros((lc_p,), jnp.float32),
                     "w2": _pad_rc(w2, lc_p, nc_p).astype(jnp.bfloat16),
                     "b2": jnp.zeros((nc_p,), jnp.float32)}
    return params


# ----------------------------- forward pass -----------------------------------
def _im2col(x, K, stride, pad, k_pad):
    """x:(N,H,W,C) bf16 -> (N, Ho*Wo, k_pad) bf16 columns (matches HWIO weight order)."""
    N, H, W, C = x.shape
    xp = jnp.pad(x, ((0, 0), (pad, pad), (pad, pad), (0, 0)))
    Ho = (H + 2 * pad - K) // stride + 1
    Wo = (W + 2 * pad - K) // stride + 1
    cols = jnp.concatenate(
        [jax.lax.slice(xp,
                       (0, ki, kj, 0),
                       (N, ki + (Ho - 1) * stride + 1, kj + (Wo - 1) * stride + 1, C),
                       (1, stride, stride, 1))
         for ki in range(K) for kj in range(K)],
        axis=-1)
    cols = cols.reshape(N, Ho * Wo, K * K * C)
    if k_pad > K * K * C:
        cols = jnp.pad(cols, ((0, 0), (0, 0), (0, k_pad - K * K * C)))
    return cols, (N, Ho, Wo)


def _inverted_residual(h, H, W, cnf, bp):
    act = _hardswish if cnf.use_hs else _relu
    N = h.shape[0]
    cexp_p = _round_up(cnf.expanded_c)
    x_in = h                                            # (N, H*W, cin_p) bf16

    if "exp" in bp:                                     # 1x1 expand + BN + NL
        h = matmul_act(h, bp["exp"]["w"], bp["exp"]["bias"], act)

    h = h.reshape(N, H, W, cexp_p)
    h = depthwise_conv_bn_act(h, bp["dw"]["w"], bp["dw"]["bias"],
                              cnf.kernel, cnf.stride, act, se=bp.get("se"))
    _, Ho, Wo, _ = h.shape
    h = h.reshape(N, Ho * Wo, cexp_p)

    residual = None
    if cnf.stride == 1 and cnf.input_c == cnf.out_c:
        residual = x_in                                 # same spatial & channels

    h = matmul_act(h, bp["proj"]["w"], bp["proj"]["bias"], _identity,
                   residual=residual)
    return h, Ho, Wo


def mobilenet_v3_forward(params, settings, x_nchw, num_classes):
    x = jnp.transpose(x_nchw, (0, 2, 3, 1)).astype(ACT_DTYPE)     # NCHW -> NHWC bf16
    # stem: 3x3 s2 conv + folded BN + hardswish (im2col glue + fused matmul)
    cols, (N, H, W) = _im2col(x, 3, 2, 1, params["stem"]["kp"])
    h = matmul_act(cols, params["stem"]["w"], params["stem"]["bias"], _hardswish)
    for cnf, bp in zip(settings, params["blocks"]):
        h, H, W = _inverted_residual(h, H, W, cnf, bp)
    # last 1x1 conv + BN + hardswish
    h = matmul_act(h, params["last"]["w"], params["last"]["bias"], _hardswish)
    pooled = global_avg_pool(h)                                   # (1, N, Cp) bf16
    z = matmul_act(pooled, params["cls"]["w1"], params["cls"]["b1"], _hardswish)
    # TODO(synk): nn.Dropout(p=0.2) is identity in eval mode; no stochastic mask applied.
    logits = matmul_act(z, params["cls"]["w2"], params["cls"]["b2"], _identity,
                        out_dtype=jnp.float32)
    return logits[0, :, :num_classes]


# ----------------------------- main -------------------------------------------
if __name__ == "__main__":
    # Small synthetic MobileNetV3 config (subset of mobilenet_v3_small layers).
    settings = [
        InvertedResidualConfig(16, 3, 16, 16, True, "RE", 2),
        InvertedResidualConfig(16, 3, 72, 24, False, "RE", 2),
        InvertedResidualConfig(24, 5, 96, 40, True, "HS", 1),
        InvertedResidualConfig(40, 5, 120, 40, True, "HS", 1),  # residual connection
    ]
    last_channel = 64
    num_classes = 10

    key = jax.random.PRNGKey(0)
    pkey, xkey = jax.random.split(key)
    params = init_params(pkey, settings, last_channel, num_classes)

    # PyTorch-style NCHW input: batch=2, 3 channels, 32x32 spatial.
    x = jax.random.normal(xkey, (2, 3, 32, 32), jnp.float32)

    fwd = jax.jit(lambda inp: mobilenet_v3_forward(params, settings, inp, num_classes))
    out = fwd(x)
    jax.block_until_ready(out)
    assert out.shape == (2, num_classes), out.shape
    assert bool(jnp.all(jnp.isfinite(out)))
    print("KERNEL_OK")
</pallas_src>

<mosaic_0001>
module attributes {stable_mosaic.version = 11 : i64} {
  func.func @kernel(%arg0: i32, %arg1: i32, %arg2: i32, %arg3: memref<1x256x128xbf16, #tpu.memory_space<vmem>>, %arg4: memref<128x128xbf16, #tpu.memory_space<vmem>>, %arg5: memref<1x128xf32, #tpu.memory_space<vmem>>, %arg6: memref<1x256x128xbf16, #tpu.memory_space<vmem>>) attributes {dimension_semantics = [#tpu.dimension_semantics<parallel>, #tpu.dimension_semantics<parallel>, #tpu.dimension_semantics<parallel>], iteration_bounds = array<i64: 2, 1, 1>, scalar_prefetch = 0 : i64, scratch_operands = 0 : i64, tpu.core_type = #tpu.core_type<tc>, window_params = [{transform_indices = @transform_0, window_bounds = array<i64: 1, 256, 128>}, {transform_indices = @transform_1, window_bounds = array<i64: 128, 128>}, {transform_indices = @transform_2, window_bounds = array<i64: 1, 128>}, {transform_indices = @transform_3, window_bounds = array<i64: 1, 256, 128>}]} {
    %c0 = arith.constant 0 : index
    %c0_0 = arith.constant 0 : index
    %c0_1 = arith.constant 0 : index
    %0 = vector.load %arg3[%c0, %c0_0, %c0_1] : memref<1x256x128xbf16, #tpu.memory_space<vmem>>, vector<1x256x128xbf16>
    %1 = vector.shape_cast %0 : vector<1x256x128xbf16> to vector<256x128xbf16>
    %c0_2 = arith.constant 0 : index
    %c0_3 = arith.constant 0 : index
    %2 = vector.load %arg4[%c0_2, %c0_3] : memref<128x128xbf16, #tpu.memory_space<vmem>>, vector<128x128xbf16>
    %cst = arith.constant dense<0.000000e+00> : vector<256x128xf32>
    %3 = tpu.matmul %1, %2, %cst {dimension_numbers = #tpu.dot_dimension_numbers<[1], [0], [0], [1], [0, 0, 1, 1], [], []>} : vector<256x128xbf16>, vector<128x128xbf16>, vector<256x128xf32> -> vector<256x128xf32>
    %c0_4 = arith.constant 0 : index
    %c0_5 = arith.constant 0 : index
    %4 = vector.load %arg5[%c0_4, %c0_5] : memref<1x128xf32, #tpu.memory_space<vmem>>, vector<1x128xf32>
    %5 = vector.broadcast %4 : vector<1x128xf32> to vector<256x128xf32>
    %6 = arith.addf %3, %5 : vector<256x128xf32>
    %cst_6 = arith.constant 3.000000e+00 : f32
    %7 = vector.broadcast %cst_6 : f32 to vector<256x128xf32>
    %8 = arith.addf %6, %7 : vector<256x128xf32>
    %cst_7 = arith.constant 0.000000e+00 : f32
    %cst_8 = arith.constant 6.000000e+00 : f32
    %9 = vector.broadcast %cst_7 : f32 to vector<256x128xf32>
    %10 = arith.maximumf %9, %8 : vector<256x128xf32>
    %11 = vector.broadcast %cst_8 : f32 to vector<256x128xf32>
    %12 = arith.minimumf %11, %10 : vector<256x128xf32>
    %13 = arith.mulf %6, %12 : vector<256x128xf32>
    %cst_9 = arith.constant 0.166666672 : f32
    %14 = vector.broadcast %cst_9 : f32 to vector<256x128xf32>
    %15 = arith.mulf %13, %14 : vector<256x128xf32>
    %16 = arith.truncf %15 : vector<256x128xf32> to vector<256x128xbf16>
    %c0_10 = arith.constant 0 : index
    %c0_11 = arith.constant 0 : index
    %c0_12 = arith.constant 0 : index
    %17 = vector.load %arg6[%c0_10, %c0_11, %c0_12] : memref<1x256x128xbf16, #tpu.memory_space<vmem>>, vector<1x256x128xbf16>
    %18 = vector.shape_cast %17 : vector<1x256x128xbf16> to vector<256x128xbf16>
    %19 = vector.shape_cast %16 : vector<256x128xbf16> to vector<1x256x128xbf16>
    tpu.vector_store %arg6[%c0_10, %c0_11, %c0_12], %19 {strides = array<i32>} : memref<1x256x128xbf16, #tpu.memory_space<vmem>>, vector<1x256x128xbf16>,
    return
  }
  func.func @transform_0(%arg0: i32, %arg1: i32, %arg2: i32) -> (i32, i32, i32) {
    %c0_i32 = arith.constant 0 : i32
    %c0_i32_0 = arith.constant 0 : i32
    return %arg0, %arg1, %c0_i32 : i32, i32, i32
  }
  func.func @transform_1(%arg0: i32, %arg1: i32, %arg2: i32) -> (i32, i32) {
    %c0_i32 = arith.constant 0 : i32
    %c0_i32_0 = arith.constant 0 : i32
    return %c0_i32, %arg2 : i32, i32
  }
  func.func @transform_2(%arg0: i32, %arg1: i32, %arg2: i32) -> (i32, i32) {
    %c0_i32 = arith.constant 0 : i32
    %c0_i32_0 = arith.constant 0 : i32
    return %c0_i32, %arg2 : i32, i32
  }
  func.func @transform_3(%arg0: i32, %arg1: i32, %arg2: i32) -> (i32, i32, i32) {
    %c0_i32 = arith.constant 0 : i32
    return %arg0, %arg1, %arg2 : i32, i32, i32
  }
}

module attributes {stable_mosaic.version = 11 : i64} {
  func.func @_dw_kernel(%arg0: i32, %arg1: memref<1x9x2x9x256xbf16, #tpu.memory_space<vmem>>, %arg2: memref<9x1x128xf32, #tpu.memory_space<vmem>>, %arg3: memref<1x128xf32, #tpu.memory_space<vmem>>, %arg4: memref<128x128xbf16, #tpu.memory_space<vmem>>, %arg5: memref<1x128xf32, #tpu.memory_space<vmem>>, %arg6: memref<128x128xbf16, #tpu.memory_space<vmem>>, %arg7: memref<1x128xf32, #tpu.memory_space<vmem>>, %arg8: memref<1x8x8x128xbf16, #tpu.memory_space<vmem>>) attributes {dimension_semantics = [#tpu.dimension_semantics<parallel>], iteration_bounds = array<i64: 2>, scalar_prefetch = 0 : i64, scratch_operands = 0 : i64, tpu.core_type = #tpu.core_type<tc>, window_params = [{transform_indices = @transform_0, window_bounds = array<i64: 1, 9, 2, 9, 256>}, {pipeline_mode = #tpu.pipeline_mode<synchronous>, transform_indices = @transform_1, window_bounds = array<i64: 9, 1, 128>}, {pipeline_mode = #tpu.pipeline_mode<synchronous>, transform_indices = @transform_2, window_bounds = array<i64: 1, 128>}, {pipeline_mode = #tpu.pipeline_mode<synchronous>, transform_indices = @transform_3, window_bounds = array<i64: 128, 128>}, {pipeline_mode = #tpu.pipeline_mode<synchronous>, transform_indices = @transform_4, window_bounds = array<i64: 1, 128>}, {pipeline_mode = #tpu.pipeline_mode<synchronous>, transform_indices = @transform_5, window_bounds = array<i64: 128, 128>}, {pipeline_mode = #tpu.pipeline_mode<synchronous>, transform_indices = @transform_6, window_bounds = array<i64: 1, 128>}, {transform_indices = @transform_7, window_bounds = array<i64: 1, 8, 8, 128>}]} {
    %c0 = arith.constant 0 : index
    %c0_0 = arith.constant 0 : index
    %c0_1 = arith.constant 0 : index
    %0 = vector.load %arg2[%c0, %c0_0, %c0_1] : memref<9x1x128xf32, #tpu.memory_space<vmem>>, vector<9x1x128xf32>
    %c0_2 = arith.constant 0 : index
    %c0_3 = arith.constant 0 : index
    %c0_4 = arith.constant 0 : index
    %c0_5 = arith.constant 0 : index
    %c0_6 = arith.constant 0 : index
    %1 = vector.load %arg1[%c0_2, %c0_3, %c0_4, %c0_5, %c0_6] : memref<1x9x2x9x256xbf16, #tpu.memory_space<vmem>>, vector<1x8x1x8x128xbf16>
    %2 = vector.shape_cast %1 : vector<1x8x1x8x128xbf16> to vector<8x8x128xbf16>
    %3 = arith.extf %2 : vector<8x8x128xbf16> to vector<8x8x128xf32>
    %4 = vector.extract_strided_slice %0 {offsets = [0, 0, 0], sizes = [1, 1, 128], strides = [1, 1, 1]} : vector<9x1x128xf32> to vector<1x1x128xf32>
    %5 = vector.shape_cast %4 : vector<1x1x128xf32> to vector<1x128xf32>
    %6 = vector.shape_cast %5 : vector<1x128xf32> to vector<1x1x128xf32>
    %7 = vector.broadcast %6 : vector<1x1x128xf32> to vector<8x8x128xf32>
    %8 = arith.mulf %3, %7 : vector<8x8x128xf32>
    %c0_7 = arith.constant 0 : index
    %c0_8 = arith.constant 0 : index
    %c0_9 = arith.constant 0 : index
    %c0_10 = arith.constant 0 : index
    %c128 = arith.constant 128 : index
    %9 = vector.load %arg1[%c0_7, %c0_8, %c0_9, %c0_10, %c128] : memref<1x9x2x9x256xbf16, #tpu.memory_space<vmem>>, vector<1x8x1x8x128xbf16>
    %10 = vector.shape_cast %9 : vector<1x8x1x8x128xbf16> to vector<8x8x128xbf16>
    %11 = arith.extf %10 : vector<8x8x128xbf16> to vector<8x8x128xf32>
    %12 = vector.extract_strided_slice %0 {offsets = [1, 0, 0], sizes = [1, 1, 128], strides = [1, 1, 1]} : vector<9x1x128xf32> to vector<1x1x128xf32>
    %13 = vector.shape_cast %12 : vector<1x1x128xf32> to vector<1x128xf32>
    %14 = vector.shape_cast %13 : vector<1x128xf32> to vector<1x1x128xf32>
    %15 = vector.broadcast %14 : vector<1x1x128xf32> to vector<8x8x128xf32>
    %16 = arith.mulf %11, %15 : vector<8x8x128xf32>
    %17 = arith.addf %8, %16 : vector<8x8x128xf32>
    %c0_11 = arith.constant 0 : index
    %c0_12 = arith.constant 0 : index
    %c0_13 = arith.constant 0 : index
    %c1 = arith.constant 1 : index
    %c0_14 = arith.constant 0 : index
    %18 = vector.load %arg1[%c0_11, %c0_12, %c0_13, %c1, %c0_14] : memref<1x9x2x9x256xbf16, #tpu.memory_space<vmem>>, vector<1x8x1x8x128xbf16>
    %19 = vector.shape_cast %18 : vector<1x8x1x8x128xbf16> to vector<8x8x128xbf16>
    %20 = arith.extf %19 : vector<8x8x128xbf16> to vector<8x8x128xf32>
    %21 = vector.extract_strided_slice %0 {offsets = [2, 0, 0], sizes = [1, 1, 128], strides = [1, 1, 1]} : vector<9x1x128xf32> to vector<1x1x128xf32>
    %22 = vector.shape_cast %21 : vector<1x1x128xf32> to vector<1x128xf32>
    %23 = vector.shape_cast %22 : vector<1x128xf32> to vector<1x1x128xf32>
    %24 = vector.broadcast %23 : vector<1x1x128xf32> to vector<8x8x128xf32>
    %25 = arith.mulf %20, %24 : vector<8x8x128xf32>
    %26 = arith.addf %17, %25 : vector<8x8x128xf32>
    %c0_15 = arith.constant 0 : index
    %c0_16 = arith.constant 0 : index
    %c1_17 = arith.constant 1 : index
    %c0_18 = arith.constant 0 : index
    %c0_19 = arith.constant 0 : index
    %27 = vector.load %arg1[%c0_15, %c0_16, %c1_17, %c0_18, %c0_19] : memref<1x9x2x9x256xbf16, #tpu.memory_space<vmem>>, vector<1x8x1x8x128xbf16>
    %28 = vector.shape_cast %27 : vector<1x8x1x8x128xbf16> to vector<8x8x128xbf16>
    %29 = arith.extf %28 : vector<8x8x128xbf16> to vector<8x8x128xf32>
    %30 = vector.extract_strided_slice %0 {offsets = [3, 0, 0], sizes = [1, 1, 128], strides = [1, 1, 1]} : vector<9x1x128xf32> to vector<1x1x128xf32>
    %31 = vector.shape_cast %30 : vector<1x1x128xf32> to vector<1x128xf32>
    %32 = vector.shape_cast %31 : vector<1x128xf32> to vector<1x1x128xf32>
    %33 = vector.broadcast %32 : vector<1x1x128xf32> to vector<8x8x128xf32>
    %34 = arith.mulf %29, %33 : vector<8x8x128xf32>
    %35 = arith.addf %26, %34 : vector<8x8x128xf32>
    %c0_20 = arith.constant 0 : index
    %c0_21 = arith.constant 0 : index
    %c1_22 = arith.constant 1 : index
    %c0_23 = arith.constant 0 : index
    %c128_24 = arith.constant 128 : index
    %36 = vector.load %arg1[%c0_20, %c0_21, %c1_22, %c0_23, %c128_24] : memref<1x9x2x9x256xbf16, #tpu.memory_space<vmem>>, vector<1x8x1x8x128xbf16>
    %37 = vector.shape_cast %36 : vector<1x8x1x8x128xbf16> to vector<8x8x128xbf16>
    %38 = arith.extf %37 : vector<8x8x128xbf16> to vector<8x8x128xf32>
    %39 = vector.extract_strided_slice %0 {offsets = [4, 0, 0], sizes = [1, 1, 128], strides = [1, 1, 1]} : vector<9x1x128xf32> to vector<1x1x128xf32>
    %40 = vector.shape_cast %39 : vector<1x1x128xf32> to vector<1x128xf32>
    %41 = vector.shape_cast %40 : vector<1x128xf32> to vector<1x1x128xf32>
    %42 = vector.broadcast %41 : vector<1x1x128xf32> to vector<8x8x128xf32>
    %43 = arith.mulf %38, %42 : vector<8x8x128xf32>
    %44 = arith.addf %35, %43 : vector<8x8x128xf32>
    %c0_25 = arith.constant 0 : index
    %c0_26 = arith.constant 0 : index
    %c1_27 = arith.constant 1 : index
    %c1_28 = arith.constant 1 : index
    %c0_29 = arith.constant 0 : index
    %45 = vector.load %arg1[%c0_25, %c0_26, %c1_27, %c1_28, %c0_29] : memref<1x9x2x9x256xbf16, #tpu.memory_space<vmem>>, vector<1x8x1x8x128xbf16>
    %46 = vector.shape_cast %45 : vector<1x8x1x8x128xbf16> to vector<8x8x128xbf16>
    %47 = arith.extf %46 : vector<8x8x128xbf16> to vector<8x8x128xf32>
    %48 = vector.extract_strided_slice %0 {offsets = [5, 0, 0], sizes = [1, 1, 128], strides = [1, 1, 1]} : vector<9x1x128xf32> to vector<1x1x128xf32>
    %49 = vector.shape_cast %48 : vector<1x1x128xf32> to vector<1x128xf32>
    %50 = vector.shape_cast %49 : vector<1x128xf32> to vector<1x1x128xf32>
    %51 = vector.broadcast %50 : vector<1x1x128xf32> to vector<8x8x128xf32>
    %52 = arith.mulf %47, %51 : vector<8x8x128xf32>
    %53 = arith.addf %44, %52 : vector<8x8x128xf32>
    %c0_30 = arith.constant 0 : index
    %c1_31 = arith.constant 1 : index
    %c0_32 = arith.constant 0 : index
    %c0_33 = arith.constant 0 : index
    %c0_34 = arith.constant 0 : index
    %54 = vector.load %arg1[%c0_30, %c1_31, %c0_32, %c0_33, %c0_34] : memref<1x9x2x9x256xbf16, #tpu.memory_space<vmem>>, vector<1x8x1x8x128xbf16>
    %55 = vector.shape_cast %54 : vector<1x8x1x8x128xbf16> to vector<8x8x128xbf16>
    %56 = arith.extf %55 : vector<8x8x128xbf16> to vector<8x8x128xf32>
    %57 = vector.extract_strided_slice %0 {offsets = [6, 0, 0], sizes = [1, 1, 128], strides = [1, 1, 1]} : vector<9x1x128xf32> to vector<1x1x128xf32>
    %58 = vector.shape_cast %57 : vector<1x1x128xf32> to vector<1x128xf32>
    %59 = vector.shape_cast %58 : vector<1x128xf32> to vector<1x1x128xf32>
    %60 = vector.broadcast %59 : vector<1x1x128xf32> to vector<8x8x128xf32>
    %61 = arith.mulf %56, %60 : vector<8x8x128xf32>
    %62 = arith.addf %53, %61 : vector<8x8x128xf32>
    %c0_35 = arith.constant 0 : index
    %c1_36 = arith.constant 1 : index
    %c0_37 = arith.constant 0 : index
    %c0_38 = arith.constant 0 : index
    %c128_39 = arith.constant 128 : index
    %63 = vector.load %arg1[%c0_35, %c1_36, %c0_37, %c0_38, %c128_39] : memref<1x9x2x9x256xbf16, #tpu.memory_space<vmem>>, vector<1x8x1x8x128xbf16>
    %64 = vector.shape_cast %63 : vector<1x8x1x8x128xbf16> to vector<8x8x128xbf16>
    %65 = arith.extf %64 : vector<8x8x128xbf16> to vector<8x8x128xf32>
    %66 = vector.extract_strided_slice %0 {offsets = [7, 0, 0], sizes = [1, 1, 128], strides = [1, 1, 1]} : vector<9x1x128xf32> to vector<1x1x128xf32>
    %67 = vector.shape_cast %66 : vector<1x1x128xf32> to vector<1x128xf32>
    %68 = vector.shape_cast %67 : vector<1x128xf32> to vector<1x1x128xf32>
    %69 = vector.broadcast %68 : vector<1x1x128xf32> to vector<8x8x128xf32>
    %70 = arith.mulf %65, %69 : vector<8x8x128xf32>
    %71 = arith.addf %62, %70 : vector<8x8x128xf32>
    %c0_40 = arith.constant 0 : index
    %c1_41 = arith.constant 1 : index
    %c0_42 = arith.constant 0 : index
    %c1_43 = arith.constant 1 : index
    %c0_44 = arith.constant 0 : index
    %72 = vector.load %arg1[%c0_40, %c1_41, %c0_42, %c1_43, %c0_44] : memref<1x9x2x9x256xbf16, #tpu.memory_space<vmem>>, vector<1x8x1x8x128xbf16>
    %73 = vector.shape_cast %72 : vector<1x8x1x8x128xbf16> to vector<8x8x128xbf16>
    %74 = arith.extf %73 : vector<8x8x128xbf16> to vector<8x8x128xf32>
    %75 = vector.extract_strided_slice %0 {offsets = [8, 0, 0], sizes = [1, 1, 128], strides = [1, 1, 1]} : vector<9x1x128xf32> to vector<1x1x128xf32>
    %76 = vector.shape_cast %75 : vector<1x1x128xf32> to vector<1x128xf32>
    %77 = vector.shape_cast %76 : vector<1x128xf32> to vector<1x1x128xf32>
    %78 = vector.broadcast %77 : vector<1x1x128xf32> to vector<8x8x128xf32>
    %79 = arith.mulf %74, %78 : vector<8x8x128xf32>
    %80 = arith.addf %71, %79 : vector<8x8x128xf32>
    %c0_45 = arith.constant 0 : index
    %c0_46 = arith.constant 0 : index
    %81 = vector.load %arg3[%c0_45, %c0_46] : memref<1x128xf32, #tpu.memory_space<vmem>>, vector<1x128xf32>
    %82 = vector.shape_cast %81 : vector<1x128xf32> to vector<1x1x128xf32>
    %83 = vector.broadcast %82 : vector<1x1x128xf32> to vector<8x8x128xf32>
    %84 = arith.addf %80, %83 : vector<8x8x128xf32>
    %cst = arith.constant 0.000000e+00 : f32
    %85 = vector.broadcast %cst : f32 to vector<8x8x128xf32>
    %86 = arith.maximumf %84, %85 : vector<8x8x128xf32>
    %cst_47 = arith.constant dense<0.000000e+00> : vector<8x128xf32>
    %87 = vector.multi_reduction <add>, %86, %cst_47 [0] : vector<8x8x128xf32> to vector<8x128xf32>
    %cst_48 = arith.constant 8.000000e+00 : f32
    %88 = vector.broadcast %cst_48 : f32 to vector<8x128xf32>
    %89 = arith.divf %87, %88 : vector<8x128xf32>
    %cst_49 = arith.constant dense<0.000000e+00> : vector<128xf32>
    %90 = vector.multi_reduction <add>, %89, %cst_49 [0] : vector<8x128xf32> to vector<128xf32>
    %91 = vector.shape_cast %90 : vector<128xf32> to vector<1x128xf32>
    %cst_50 = arith.constant 8.000000e+00 : f32
    %92 = vector.broadcast %cst_50 : f32 to vector<1x128xf32>
    %93 = arith.divf %91, %92 : vector<1x128xf32>
    %94 = arith.truncf %93 : vector<1x128xf32> to vector<1x128xbf16>
    %c0_51 = arith.constant 0 : index
    %c0_52 = arith.constant 0 : index
    %95 = vector.load %arg4[%c0_51, %c0_52] : memref<128x128xbf16, #tpu.memory_space<vmem>>, vector<128x128xbf16>
    %cst_53 = arith.constant dense<0.000000e+00> : vector<1x128xf32>
    %96 = tpu.matmul %94, %95, %cst_53 {dimension_numbers = #tpu.dot_dimension_numbers<[1], [0], [0], [1], [0, 0, 1, 1], [], []>} : vector<1x128xbf16>, vector<128x128xbf16>, vector<1x128xf32> -> vector<1x128xf32>
    %c0_54 = arith.constant 0 : index
    %c0_55 = arith.constant 0 : index
    %97 = vector.load %arg5[%c0_54, %c0_55] : memref<1x128xf32, #tpu.memory_space<vmem>>, vector<1x128xf32>
    %98 = arith.addf %96, %97 : vector<1x128xf32>
    %cst_56 = arith.constant 0.000000e+00 : f32
    %99 = vector.broadcast %cst_56 : f32 to vector<1x128xf32>
    %100 = arith.maximumf %98, %99 : vector<1x128xf32>
    %101 = arith.truncf %100 : vector<1x128xf32> to vector<1x128xbf16>
    %c0_57 = arith.constant 0 : index
    %c0_58 = arith.constant 0 : index
    %102 = vector.load %arg6[%c0_57, %c0_58] : memref<128x128xbf16, #tpu.memory_space<vmem>>, vector<128x128xbf16>
    %cst_59 = arith.constant dense<0.000000e+00> : vector<1x128xf32>
    %103 = tpu.matmul %101, %102, %cst_59 {dimension_numbers = #tpu.dot_dimension_numbers<[1], [0], [0], [1], [0, 0, 1, 1], [], []>} : vector<1x128xbf16>, vector<128x128xbf16>, vector<1x128xf32> -> vector<1x128xf32>
    %c0_60 = arith.constant 0 : index
    %c0_61 = arith.constant 0 : index
    %104 = vector.load %arg7[%c0_60, %c0_61] : memref<1x128xf32, #tpu.memory_space<vmem>>, vector<1x128xf32>
    %105 = arith.addf %103, %104 : vector<1x128xf32>
    %cst_62 = arith.constant 3.000000e+00 : f32
    %106 = vector.broadcast %cst_62 : f32 to vector<1x128xf32>
    %107 = arith.addf %105, %106 : vector<1x128xf32>
    %cst_63 = arith.constant 0.000000e+00 : f32
    %cst_64 = arith.constant 6.000000e+00 : f32
    %108 = vector.broadcast %cst_63 : f32 to vector<1x128xf32>
    %109 = arith.maximumf %108, %107 : vector<1x128xf32>
    %110 = vector.broadcast %cst_64 : f32 to vector<1x128xf32>
    %111 = arith.minimumf %110, %109 : vector<1x128xf32>
    %cst_65 = arith.constant 0.166666672 : f32
    %112 = vector.broadcast %cst_65 : f32 to vector<1x128xf32>
    %113 = arith.mulf %111, %112 : vector<1x128xf32>
    %114 = vector.shape_cast %113 : vector<1x128xf32> to vector<1x1x128xf32>
    %115 = vector.broadcast %114 : vector<1x1x128xf32> to vector<8x8x128xf32>
    %116 = arith.mulf %86, %115 : vector<8x8x128xf32>
    %117 = arith.truncf %116 : vector<8x8x128xf32> to vector<8x8x128xbf16>
    %c0_66 = arith.constant 0 : index
    %c0_67 = arith.constant 0 : index
    %c0_68 = arith.constant 0 : index
    %c0_69 = arith.constant 0 : index
    %118 = vector.load %arg8[%c0_66, %c0_67, %c0_68, %c0_69] : memref<1x8x8x128xbf16, #tpu.memory_space<vmem>>, vector<1x8x8x128xbf16>
    %119 = vector.shape_cast %118 : vector<1x8x8x128xbf16> to vector<8x8x128xbf16>
    %120 = vector.shape_cast %117 : vector<8x8x128xbf16> to vector<1x8x8x128xbf16>
    tpu.vector_store %arg8[%c0_66, %c0_67, %c0_68, %c0_69], %120 {strides = array<i32>} : memref<1x8x8x128xbf16, #tpu.memory_space<vmem>>, vector<1x8x8x128xbf16>,
    return
  }
  func.func @transform_0(%arg0: i32) -> (i32, i32, i32, i32, i32) {
    %c0_i32 = arith.constant 0 : i32
    %c0_i32_0 = arith.constant 0 : i32
    %c0_i32_1 = arith.constant 0 : i32
    %c0_i32_2 = arith.constant 0 : i32
    %c0_i32_3 = arith.constant 0 : i32
    return %arg0, %c0_i32, %c0_i32_0, %c0_i32_1, %c0_i32_2 : i32, i32, i32, i32, i32
  }
  func.func @transform_1(%arg0: i32) -> (i32, i32, i32) {
    %c0_i32 = arith.constant 0 : i32
    %c0_i32_0 = arith.constant 0 : i32
    %c0_i32_1 = arith.constant 0 : i32
    %c0_i32_2 = arith.constant 0 : i32
    return %c0_i32, %c0_i32_0, %c0_i32_1 : i32, i32, i32
  }
  func.func @transform_2(%arg0: i32) -> (i32, i32) {
    %c0_i32 = arith.constant 0 : i32
    %c0_i32_0 = arith.constant 0 : i32
    %c0_i32_1 = arith.constant 0 : i32
    return %c0_i32, %c0_i32_0 : i32, i32
  }
  func.func @transform_3(%arg0: i32) -> (i32, i32) {
    %c0_i32 = arith.constant 0 : i32
    %c0_i32_0 = arith.constant 0 : i32
    %c0_i32_1 = arith.constant 0 : i32
    return %c0_i32, %c0_i32_0 : i32, i32
  }
  func.func @transform_4(%arg0: i32) -> (i32, i32) {
    %c0_i32 = arith.constant 0 : i32
    %c0_i32_0 = arith.constant 0 : i32
    %c0_i32_1 = arith.constant 0 : i32
    return %c0_i32, %c0_i32_0 : i32, i32
  }
  func.func @transform_5(%arg0: i32) -> (i32, i32) {
    %c0_i32 = arith.constant 0 : i32
    %c0_i32_0 = arith.constant 0 : i32
    %c0_i32_1 = arith.constant 0 : i32
    return %c0_i32, %c0_i32_0 : i32, i32
  }
  func.func @transform_6(%arg0: i32) -> (i32, i32) {
    %c0_i32 = arith.constant 0 : i32
    %c0_i32_0 = arith.constant 0 : i32
    %c0_i32_1 = arith.constant 0 : i32
    return %c0_i32, %c0_i32_0 : i32, i32
  }
  func.func @transform_7(%arg0: i32) -> (i32, i32, i32, i32) {
    %c0_i32 = arith.constant 0 : i32
    %c0_i32_0 = arith.constant 0 : i32
    %c0_i32_1 = arith.constant 0 : i32
    %c0_i32_2 = arith.constant 0 : i32
    return %arg0, %c0_i32, %c0_i32_0, %c0_i32_1 : i32, i32, i32, i32
  }
}

module attributes {stable_mosaic.version = 11 : i64} {
  func.func @kernel(%arg0: i32, %arg1: i32, %arg2: i32, %arg3: memref<1x64x128xbf16, #tpu.memory_space<vmem>>, %arg4: memref<128x128xbf16, #tpu.memory_space<vmem>>, %arg5: memref<1x128xf32, #tpu.memory_space<vmem>>, %arg6: memref<1x64x128xbf16, #tpu.memory_space<vmem>>) attributes {dimension_semantics = [#tpu.dimension_semantics<parallel>, #tpu.dimension_semantics<parallel>, #tpu.dimension_semantics<parallel>], iteration_bounds = array<i64: 2, 1, 1>, scalar_prefetch = 0 : i64, scratch_operands = 0 : i64, tpu.core_type = #tpu.core_type<tc>, window_params = [{transform_indices = @transform_0, window_bounds = array<i64: 1, 64, 128>}, {transform_indices = @transform_1, window_bounds = array<i64: 128, 128>}, {transform_indices = @transform_2, window_bounds = array<i64: 1, 128>}, {transform_indices = @transform_3, window_bounds = array<i64: 1, 64, 128>}]} {
    %c0 = arith.constant 0 : index
    %c0_0 = arith.constant 0 : index
    %c0_1 = arith.constant 0 : index
    %0 = vector.load %arg3[%c0, %c0_0, %c0_1] : memref<1x64x128xbf16, #tpu.memory_space<vmem>>, vector<1x64x128xbf16>
    %1 = vector.shape_cast %0 : vector<1x64x128xbf16> to vector<64x128xbf16>
    %c0_2 = arith.constant 0 : index
    %c0_3 = arith.constant 0 : index
    %2 = vector.load %arg4[%c0_2, %c0_3] : memref<128x128xbf16, #tpu.memory_space<vmem>>, vector<128x128xbf16>
    %cst = arith.constant dense<0.000000e+00> : vector<64x128xf32>
    %3 = tpu.matmul %1, %2, %cst {dimension_numbers = #tpu.dot_dimension_numbers<[1], [0], [0], [1], [0, 0, 1, 1], [], []>} : vector<64x128xbf16>, vector<128x128xbf16>, vector<64x128xf32> -> vector<64x128xf32>
    %c0_4 = arith.constant 0 : index
    %c0_5 = arith.constant 0 : index
    %4 = vector.load %arg5[%c0_4, %c0_5] : memref<1x128xf32, #tpu.memory_space<vmem>>, vector<1x128xf32>
    %5 = vector.broadcast %4 : vector<1x128xf32> to vector<64x128xf32>
    %6 = arith.addf %3, %5 : vector<64x128xf32>
    %7 = arith.truncf %6 : vector<64x128xf32> to vector<64x128xbf16>
    %c0_6 = arith.constant 0 : index
    %c0_7 = arith.constant 0 : index
    %c0_8 = arith.constant 0 : index
    %8 = vector.load %arg6[%c0_6, %c0_7, %c0_8] : memref<1x64x128xbf16, #tpu.memory_space<vmem>>, vector<1x64x128xbf16>
    %9 = vector.shape_cast %8 : vector<1x64x128xbf16> to vector<64x128xbf16>
    %10 = vector.shape_cast %7 : vector<64x128xbf16> to vector<1x64x128xbf16>
    tpu.vector_store %arg6[%c0_6, %c0_7, %c0_8], %10 {strides = array<i32>} : memref<1x64x128xbf16, #tpu.memory_space<vmem>>, vector<1x64x128xbf16>,
    return
  }
  func.func @transform_0(%arg0: i32, %arg1: i32, %arg2: i32) -> (i32, i32, i32) {
    %c0_i32 = arith.constant 0 : i32
    %c0_i32_0 = arith.constant 0 : i32
    return %arg0, %arg1, %c0_i32 : i32, i32, i32
  }
  func.func @transform_1(%arg0: i32, %arg1: i32, %arg2: i32) -> (i32, i32) {
    %c0_i32 = arith.constant 0 : i32
    %c0_i32_0 = arith.constant 0 : i32
    return %c0_i32, %arg2 : i32, i32
  }
  func.func @transform_2(%arg0: i32, %arg1: i32, %arg2: i32) -> (i32, i32) {
    %c0_i32 = arith.constant 0 : i32
    %c0_i32_0 = arith.constant 0 : i32
    return %c0_i32, %arg2 : i32, i32
  }
  func.func @transform_3(%arg0: i32, %arg1: i32, %arg2: i32) -> (i32, i32, i32) {
    %c0_i32 = arith.constant 0 : i32
    return %arg0, %arg1, %arg2 : i32, i32, i32
  }
}

module attributes {stable_mosaic.version = 11 : i64} {
  func.func @kernel(%arg0: i32, %arg1: i32, %arg2: i32, %arg3: memref<1x64x128xbf16, #tpu.memory_space<vmem>>, %arg4: memref<128x128xbf16, #tpu.memory_space<vmem>>, %arg5: memref<1x128xf32, #tpu.memory_space<vmem>>, %arg6: memref<1x64x128xbf16, #tpu.memory_space<vmem>>) attributes {dimension_semantics = [#tpu.dimension_semantics<parallel>, #tpu.dimension_semantics<parallel>, #tpu.dimension_semantics<parallel>], iteration_bounds = array<i64: 2, 1, 1>, scalar_prefetch = 0 : i64, scratch_operands = 0 : i64, tpu.core_type = #tpu.core_type<tc>, window_params = [{transform_indices = @transform_0, window_bounds = array<i64: 1, 64, 128>}, {transform_indices = @transform_1, window_bounds = array<i64: 128, 128>}, {transform_indices = @transform_2, window_bounds = array<i64: 1, 128>}, {transform_indices = @transform_3, window_bounds = array<i64: 1, 64, 128>}]} {
    %c0 = arith.constant 0 : index
    %c0_0 = arith.constant 0 : index
    %c0_1 = arith.constant 0 : index
    %0 = vector.load %arg3[%c0, %c0_0, %c0_1] : memref<1x64x128xbf16, #tpu.memory_space<vmem>>, vector<1x64x128xbf16>
    %1 = vector.shape_cast %0 : vector<1x64x128xbf16> to vector<64x128xbf16>
    %c0_2 = arith.constant 0 : index
    %c0_3 = arith.constant 0 : index
    %2 = vector.load %arg4[%c0_2, %c0_3] : memref<128x128xbf16, #tpu.memory_space<vmem>>, vector<128x128xbf16>
    %cst = arith.constant dense<0.000000e+00> : vector<64x128xf32>
    %3 = tpu.matmul %1, %2, %cst {dimension_numbers = #tpu.dot_dimension_numbers<[1], [0], [0], [1], [0, 0, 1, 1], [], []>} : vector<64x128xbf16>, vector<128x128xbf16>, vector<64x128xf32> -> vector<64x128xf32>
    %c0_4 = arith.constant 0 : index
    %c0_5 = arith.constant 0 : index
    %4 = vector.load %arg5[%c0_4, %c0_5] : memref<1x128xf32, #tpu.memory_space<vmem>>, vector<1x128xf32>
    %5 = vector.broadcast %4 : vector<1x128xf32> to vector<64x128xf32>
    %6 = arith.addf %3, %5 : vector<64x128xf32>
    %cst_6 = arith.constant 0.000000e+00 : f32
    %7 = vector.broadcast %cst_6 : f32 to vector<64x128xf32>
    %8 = arith.maximumf %6, %7 : vector<64x128xf32>
    %9 = arith.truncf %8 : vector<64x128xf32> to vector<64x128xbf16>
    %c0_7 = arith.constant 0 : index
    %c0_8 = arith.constant 0 : index
    %c0_9 = arith.constant 0 : index
    %10 = vector.load %arg6[%c0_7, %c0_8, %c0_9] : memref<1x64x128xbf16, #tpu.memory_space<vmem>>, vector<1x64x128xbf16>
    %11 = vector.shape_cast %10 : vector<1x64x128xbf16> to vector<64x128xbf16>
    %12 = vector.shape_cast %9 : vector<64x128xbf16> to vector<1x64x128xbf16>
    tpu.vector_store %arg6[%c0_7, %c0_8, %c0_9], %12 {strides = array<i32>} : memref<1x64x128xbf16, #tpu.memory_space<vmem>>, vector<1x64x128xbf16>,
    return
  }
  func.func @transform_0(%arg0: i32, %arg1: i32, %arg2: i32) -> (i32, i32, i32) {
    %c0_i32 = arith.constant 0 : i32
    %c0_i32_0 = arith.constant 0 : i32
    return %arg0, %arg1, %c0_i32 : i32, i32, i32
  }
  func.func @transform_1(%arg0: i32, %arg1: i32, %arg2: i32) -> (i32, i32) {
    %c0_i32 = arith.constant 0 : i32
    %c0_i32_0 = arith.constant 0 : i32
    return %c0_i32, %arg2 : i32, i32
  }
  func.func @transform_2(%arg0: i32, %arg1: i32, %arg2: i32) -> (i32, i32) {
    %c0_i32 = arith.constant 0 : i32
    %c0_i32_0 = arith.constant 0 : i32
    return %c0_i32, %arg2 : i32, i32
  }
  func.func @transform_3(%arg0: i32, %arg1: i32, %arg2: i32) -> (i32, i32, i32) {
    %c0_i32 = arith.constant 0 : i32
    return %arg0, %arg1, %arg2 : i32, i32, i32
  }
}

module attributes {stable_mosaic.version = 11 : i64} {
  func.func @_dw_kernel(%arg0: i32, %arg1: memref<1x5x2x5x256xbf16, #tpu.memory_space<vmem>>, %arg2: memref<9x1x128xf32, #tpu.memory_space<vmem>>, %arg3: memref<1x128xf32, #tpu.memory_space<vmem>>, %arg4: memref<1x4x4x128xbf16, #tpu.memory_space<vmem>>) attributes {dimension_semantics = [#tpu.dimension_semantics<parallel>], iteration_bounds = array<i64: 2>, scalar_prefetch = 0 : i64, scratch_operands = 0 : i64, tpu.core_type = #tpu.core_type<tc>, window_params = [{transform_indices = @transform_0, window_bounds = array<i64: 1, 5, 2, 5, 256>}, {pipeline_mode = #tpu.pipeline_mode<synchronous>, transform_indices = @transform_1, window_bounds = array<i64: 9, 1, 128>}, {pipeline_mode = #tpu.pipeline_mode<synchronous>, transform_indices = @transform_2, window_bounds = array<i64: 1, 128>}, {transform_indices = @transform_3, window_bounds = array<i64: 1, 4, 4, 128>}]} {
    %c0 = arith.constant 0 : index
    %c0_0 = arith.constant 0 : index
    %c0_1 = arith.constant 0 : index
    %0 = vector.load %arg2[%c0, %c0_0, %c0_1] : memref<9x1x128xf32, #tpu.memory_space<vmem>>, vector<9x1x128xf32>
    %c0_2 = arith.constant 0 : index
    %c0_3 = arith.constant 0 : index
    %c0_4 = arith.constant 0 : index
    %c0_5 = arith.constant 0 : index
    %c0_6 = arith.constant 0 : index
    %1 = vector.load %arg1[%c0_2, %c0_3, %c0_4, %c0_5, %c0_6] : memref<1x5x2x5x256xbf16, #tpu.memory_space<vmem>>, vector<1x4x1x4x128xbf16>
    %2 = vector.shape_cast %1 : vector<1x4x1x4x128xbf16> to vector<4x4x128xbf16>
    %3 = arith.extf %2 : vector<4x4x128xbf16> to vector<4x4x128xf32>
    %4 = vector.extract_strided_slice %0 {offsets = [0, 0, 0], sizes = [1, 1, 128], strides = [1, 1, 1]} : vector<9x1x128xf32> to vector<1x1x128xf32>
    %5 = vector.shape_cast %4 : vector<1x1x128xf32> to vector<1x128xf32>
    %6 = vector.shape_cast %5 : vector<1x128xf32> to vector<1x1x128xf32>
    %7 = vector.broadcast %6 : vector<1x1x128xf32> to vector<4x4x128xf32>
    %8 = arith.mulf %3, %7 : vector<4x4x128xf32>
    %c0_7 = arith.constant 0 : index
    %c0_8 = arith.constant 0 : index
    %c0_9 = arith.constant 0 : index
    %c0_10 = arith.constant 0 : index
    %c128 = arith.constant 128 : index
    %9 = vector.load %arg1[%c0_7, %c0_8, %c0_9, %c0_10, %c128] : memref<1x5x2x5x256xbf16, #tpu.memory_space<vmem>>, vector<1x4x1x4x128xbf16>
    %10 = vector.shape_cast %9 : vector<1x4x1x4x128xbf16> to vector<4x4x128xbf16>
    %11 = arith.extf %10 : vector<4x4x128xbf16> to vector<4x4x128xf32>
    %12 = vector.extract_strided_slice %0 {offsets = [1, 0, 0], sizes = [1, 1, 128], strides = [1, 1, 1]} : vector<9x1x128xf32> to vector<1x1x128xf32>
    %13 = vector.shape_cast %12 : vector<1x1x128xf32> to vector<1x128xf32>
    %14 = vector.shape_cast %13 : vector<1x128xf32> to vector<1x1x128xf32>
    %15 = vector.broadcast %14 : vector<1x1x128xf32> to vector<4x4x128xf32>
    %16 = arith.mulf %11, %15 : vector<4x4x128xf32>
    %17 = arith.addf %8, %16 : vector<4x4x128xf32>
    %c0_11 = arith.constant 0 : index
    %c0_12 = arith.constant 0 : index
    %c0_13 = arith.constant 0 : index
    %c1 = arith.constant 1 : index
    %c0_14 = arith.constant 0 : index
    %18 = vector.load %arg1[%c0_11, %c0_12, %c0_13, %c1, %c0_14] : memref<1x5x2x5x256xbf16, #tpu.memory_space<vmem>>, vector<1x4x1x4x128xbf16>
    %19 = vector.shape_cast %18 : vector<1x4x1x4x128xbf16> to vector<4x4x128xbf16>
    %20 = arith.extf %19 : vector<4x4x128xbf16> to vector<4x4x128xf32>
    %21 = vector.extract_strided_slice %0 {offsets = [2, 0, 0], sizes = [1, 1, 128], strides = [1, 1, 1]} : vector<9x1x128xf32> to vector<1x1x128xf32>
    %22 = vector.shape_cast %21 : vector<1x1x128xf32> to vector<1x128xf32>
    %23 = vector.shape_cast %22 : vector<1x128xf32> to vector<1x1x128xf32>
    %24 = vector.broadcast %23 : vector<1x1x128xf32> to vector<4x4x128xf32>
    %25 = arith.mulf %20, %24 : vector<4x4x128xf32>
    %26 = arith.addf %17, %25 : vector<4x4x128xf32>
    %c0_15 = arith.constant 0 : index
    %c0_16 = arith.constant 0 : index
    %c1_17 = arith.constant 1 : index
    %c0_18 = arith.constant 0 : index
    %c0_19 = arith.constant 0 : index
    %27 = vector.load %arg1[%c0_15, %c0_16, %c1_17, %c0_18, %c0_19] : memref<1x5x2x5x256xbf16, #tpu.memory_space<vmem>>, vector<1x4x1x4x128xbf16>
    %28 = vector.shape_cast %27 : vector<1x4x1x4x128xbf16> to vector<4x4x128xbf16>
    %29 = arith.extf %28 : vector<4x4x128xbf16> to vector<4x4x128xf32>
    %30 = vector.extract_strided_slice %0 {offsets = [3, 0, 0], sizes = [1, 1, 128], strides = [1, 1, 1]} : vector<9x1x128xf32> to vector<1x1x128xf32>
    %31 = vector.shape_cast %30 : vector<1x1x128xf32> to vector<1x128xf32>
    %32 = vector.shape_cast %31 : vector<1x128xf32> to vector<1x1x128xf32>
    %33 = vector.broadcast %32 : vector<1x1x128xf32> to vector<4x4x128xf32>
    %34 = arith.mulf %29, %33 : vector<4x4x128xf32>
    %35 = arith.addf %26, %34 : vector<4x4x128xf32>
    %c0_20 = arith.constant 0 : index
    %c0_21 = arith.constant 0 : index
    %c1_22 = arith.constant 1 : index
    %c0_23 = arith.constant 0 : index
    %c128_24 = arith.constant 128 : index
    %36 = vector.load %arg1[%c0_20, %c0_21, %c1_22, %c0_23, %c128_24] : memref<1x5x2x5x256xbf16, #tpu.memory_space<vmem>>, vector<1x4x1x4x128xbf16>
    %37 = vector.shape_cast %36 : vector<1x4x1x4x128xbf16> to vector<4x4x128xbf16>
    %38 = arith.extf %37 : vector<4x4x128xbf16> to vector<4x4x128xf32>
    %39 = vector.extract_strided_slice %0 {offsets = [4, 0, 0], sizes = [1, 1, 128], strides = [1, 1, 1]} : vector<9x1x128xf32> to vector<1x1x128xf32>
    %40 = vector.shape_cast %39 : vector<1x1x128xf32> to vector<1x128xf32>
    %41 = vector.shape_cast %40 : vector<1x128xf32> to vector<1x1x128xf32>
    %42 = vector.broadcast %41 : vector<1x1x128xf32> to vector<4x4x128xf32>
    %43 = arith.mulf %38, %42 : vector<4x4x128xf32>
    %44 = arith.addf %35, %43 : vector<4x4x128xf32>
    %c0_25 = arith.constant 0 : index
    %c0_26 = arith.constant 0 : index
    %c1_27 = arith.constant 1 : index
    %c1_28 = arith.constant 1 : index
    %c0_29 = arith.constant 0 : index
    %45 = vector.load %arg1[%c0_25, %c0_26, %c1_27, %c1_28, %c0_29] : memref<1x5x2x5x256xbf16, #tpu.memory_space<vmem>>, vector<1x4x1x4x128xbf16>
    %46 = vector.shape_cast %45 : vector<1x4x1x4x128xbf16> to vector<4x4x128xbf16>
    %47 = arith.extf %46 : vector<4x4x128xbf16> to vector<4x4x128xf32>
    %48 = vector.extract_strided_slice %0 {offsets = [5, 0, 0], sizes = [1, 1, 128], strides = [1, 1, 1]} : vector<9x1x128xf32> to vector<1x1x128xf32>
    %49 = vector.shape_cast %48 : vector<1x1x128xf32> to vector<1x128xf32>
    %50 = vector.shape_cast %49 : vector<1x128xf32> to vector<1x1x128xf32>
    %51 = vector.broadcast %50 : vector<1x1x128xf32> to vector<4x4x128xf32>
    %52 = arith.mulf %47, %51 : vector<4x4x128xf32>
    %53 = arith.addf %44, %52 : vector<4x4x128xf32>
    %c0_30 = arith.constant 0 : index
    %c1_31 = arith.constant 1 : index
    %c0_32 = arith.constant 0 : index
    %c0_33 = arith.constant 0 : index
    %c0_34 = arith.constant 0 : index
    %54 = vector.load %arg1[%c0_30, %c1_31, %c0_32, %c0_33, %c0_34] : memref<1x5x2x5x256xbf16, #tpu.memory_space<vmem>>, vector<1x4x1x4x128xbf16>
    %55 = vector.shape_cast %54 : vector<1x4x1x4x128xbf16> to vector<4x4x128xbf16>
    %56 = arith.extf %55 : vector<4x4x128xbf16> to vector<4x4x128xf32>
    %57 = vector.extract_strided_slice %0 {offsets = [6, 0, 0], sizes = [1, 1, 128], strides = [1, 1, 1]} : vector<9x1x128xf32> to vector<1x1x128xf32>
    %58 = vector.shape_cast %57 : vector<1x1x128xf32> to vector<1x128xf32>
    %59 = vector.shape_cast %58 : vector<1x128xf32> to vector<1x1x128xf32>
    %60 = vector.broadcast %59 : vector<1x1x128xf32> to vector<4x4x128xf32>
    %61 = arith.mulf %56, %60 : vector<4x4x128xf32>
    %62 = arith.addf %53, %61 : vector<4x4x128xf32>
    %c0_35 = arith.constant 0 : index
    %c1_36 = arith.constant 1 : index
    %c0_37 = arith.constant 0 : index
    %c0_38 = arith.constant 0 : index
    %c128_39 = arith.constant 128 : index
    %63 = vector.load %arg1[%c0_35, %c1_36, %c0_37, %c0_38, %c128_39] : memref<1x5x2x5x256xbf16, #tpu.memory_space<vmem>>, vector<1x4x1x4x128xbf16>
    %64 = vector.shape_cast %63 : vector<1x4x1x4x128xbf16> to vector<4x4x128xbf16>
    %65 = arith.extf %64 : vector<4x4x128xbf16> to vector<4x4x128xf32>
    %66 = vector.extract_strided_slice %0 {offsets = [7, 0, 0], sizes = [1, 1, 128], strides = [1, 1, 1]} : vector<9x1x128xf32> to vector<1x1x128xf32>
    %67 = vector.shape_cast %66 : vector<1x1x128xf32> to vector<1x128xf32>
    %68 = vector.shape_cast %67 : vector<1x128xf32> to vector<1x1x128xf32>
    %69 = vector.broadcast %68 : vector<1x1x128xf32> to vector<4x4x128xf32>
    %70 = arith.mulf %65, %69 : vector<4x4x128xf32>
    %71 = arith.addf %62, %70 : vector<4x4x128xf32>
    %c0_40 = arith.constant 0 : index
    %c1_41 = arith.constant 1 : index
    %c0_42 = arith.constant 0 : index
    %c1_43 = arith.constant 1 : index
    %c0_44 = arith.constant 0 : index
    %72 = vector.load %arg1[%c0_40, %c1_41, %c0_42, %c1_43, %c0_44] : memref<1x5x2x5x256xbf16, #tpu.memory_space<vmem>>, vector<1x4x1x4x128xbf16>
    %73 = vector.shape_cast %72 : vector<1x4x1x4x128xbf16> to vector<4x4x128xbf16>
    %74 = arith.extf %73 : vector<4x4x128xbf16> to vector<4x4x128xf32>
    %75 = vector.extract_strided_slice %0 {offsets = [8, 0, 0], sizes = [1, 1, 128], strides = [1, 1, 1]} : vector<9x1x128xf32> to vector<1x1x128xf32>
    %76 = vector.shape_cast %75 : vector<1x1x128xf32> to vector<1x128xf32>
    %77 = vector.shape_cast %76 : vector<1x128xf32> to vector<1x1x128xf32>
    %78 = vector.broadcast %77 : vector<1x1x128xf32> to vector<4x4x128xf32>
    %79 = arith.mulf %74, %78 : vector<4x4x128xf32>
    %80 = arith.addf %71, %79 : vector<4x4x128xf32>
    %c0_45 = arith.constant 0 : index
    %c0_46 = arith.constant 0 : index
    %81 = vector.load %arg3[%c0_45, %c0_46] : memref<1x128xf32, #tpu.memory_space<vmem>>, vector<1x128xf32>
    %82 = vector.shape_cast %81 : vector<1x128xf32> to vector<1x1x128xf32>
    %83 = vector.broadcast %82 : vector<1x1x128xf32> to vector<4x4x128xf32>
    %84 = arith.addf %80, %83 : vector<4x4x128xf32>
    %cst = arith.constant 0.000000e+00 : f32
    %85 = vector.broadcast %cst : f32 to vector<4x4x128xf32>
    %86 = arith.maximumf %84, %85 : vector<4x4x128xf32>
    %87 = arith.truncf %86 : vector<4x4x128xf32> to vector<4x4x128xbf16>
    %c0_47 = arith.constant 0 : index
    %c0_48 = arith.constant 0 : index
    %c0_49 = arith.constant 0 : index
    %c0_50 = arith.constant 0 : index
    %88 = vector.load %arg4[%c0_47, %c0_48, %c0_49, %c0_50] : memref<1x4x4x128xbf16, #tpu.memory_space<vmem>>, vector<1x4x4x128xbf16>
    %89 = vector.shape_cast %88 : vector<1x4x4x128xbf16> to vector<4x4x128xbf16>
    %90 = vector.shape_cast %87 : vector<4x4x128xbf16> to vector<1x4x4x128xbf16>
    tpu.vector_store %arg4[%c0_47, %c0_48, %c0_49, %c0_50], %90 {strides = array<i32>} : memref<1x4x4x128xbf16, #tpu.memory_space<vmem>>, vector<1x4x4x128xbf16>,
    return
  }
  func.func @transform_0(%arg0: i32) -> (i32, i32, i32, i32, i32) {
    %c0_i32 = arith.constant 0 : i32
    %c0_i32_0 = arith.constant 0 : i32
    %c0_i32_1 = arith.constant 0 : i32
    %c0_i32_2 = arith.constant 0 : i32
    %c0_i32_3 = arith.constant 0 : i32
    return %arg0, %c0_i32, %c0_i32_0, %c0_i32_1, %c0_i32_2 : i32, i32, i32, i32, i32
  }
  func.func @transform_1(%arg0: i32) -> (i32, i32, i32) {
    %c0_i32 = arith.constant 0 : i32
    %c0_i32_0 = arith.constant 0 : i32
    %c0_i32_1 = arith.constant 0 : i32
    %c0_i32_2 = arith.constant 0 : i32
    return %c0_i32, %c0_i32_0, %c0_i32_1 : i32, i32, i32
  }
  func.func @transform_2(%arg0: i32) -> (i32, i32) {
    %c0_i32 = arith.constant 0 : i32
    %c0_i32_0 = arith.constant 0 : i32
    %c0_i32_1 = arith.constant 0 : i32
    return %c0_i32, %c0_i32_0 : i32, i32
  }
  func.func @transform_3(%arg0: i32) -> (i32, i32, i32, i32) {
    %c0_i32 = arith.constant 0 : i32
    %c0_i32_0 = arith.constant 0 : i32
    %c0_i32_1 = arith.constant 0 : i32
    %c0_i32_2 = arith.constant 0 : i32
    return %arg0, %c0_i32, %c0_i32_0, %c0_i32_1 : i32, i32, i32, i32
  }
}

module attributes {stable_mosaic.version = 11 : i64} {
  func.func @kernel(%arg0: i32, %arg1: i32, %arg2: i32, %arg3: memref<1x16x128xbf16, #tpu.memory_space<vmem>>, %arg4: memref<128x128xbf16, #tpu.memory_space<vmem>>, %arg5: memref<1x128xf32, #tpu.memory_space<vmem>>, %arg6: memref<1x16x128xbf16, #tpu.memory_space<vmem>>) attributes {dimension_semantics = [#tpu.dimension_semantics<parallel>, #tpu.dimension_semantics<parallel>, #tpu.dimension_semantics<parallel>], iteration_bounds = array<i64: 2, 1, 1>, scalar_prefetch = 0 : i64, scratch_operands = 0 : i64, tpu.core_type = #tpu.core_type<tc>, window_params = [{transform_indices = @transform_0, window_bounds = array<i64: 1, 16, 128>}, {transform_indices = @transform_1, window_bounds = array<i64: 128, 128>}, {transform_indices = @transform_2, window_bounds = array<i64: 1, 128>}, {transform_indices = @transform_3, window_bounds = array<i64: 1, 16, 128>}]} {
    %c0 = arith.constant 0 : index
    %c0_0 = arith.constant 0 : index
    %c0_1 = arith.constant 0 : index
    %0 = vector.load %arg3[%c0, %c0_0, %c0_1] : memref<1x16x128xbf16, #tpu.memory_space<vmem>>, vector<1x16x128xbf16>
    %1 = vector.shape_cast %0 : vector<1x16x128xbf16> to vector<16x128xbf16>
    %c0_2 = arith.constant 0 : index
    %c0_3 = arith.constant 0 : index
    %2 = vector.load %arg4[%c0_2, %c0_3] : memref<128x128xbf16, #tpu.memory_space<vmem>>, vector<128x128xbf16>
    %cst = arith.constant dense<0.000000e+00> : vector<16x128xf32>
    %3 = tpu.matmul %1, %2, %cst {dimension_numbers = #tpu.dot_dimension_numbers<[1], [0], [0], [1], [0, 0, 1, 1], [], []>} : vector<16x128xbf16>, vector<128x128xbf16>, vector<16x128xf32> -> vector<16x128xf32>
    %c0_4 = arith.constant 0 : index
    %c0_5 = arith.constant 0 : index
    %4 = vector.load %arg5[%c0_4, %c0_5] : memref<1x128xf32, #tpu.memory_space<vmem>>, vector<1x128xf32>
    %5 = vector.broadcast %4 : vector<1x128xf32> to vector<16x128xf32>
    %6 = arith.addf %3, %5 : vector<16x128xf32>
    %7 = arith.truncf %6 : vector<16x128xf32> to vector<16x128xbf16>
    %c0_6 = arith.constant 0 : index
    %c0_7 = arith.constant 0 : index
    %c0_8 = arith.constant 0 : index
    %8 = vector.load %arg6[%c0_6, %c0_7, %c0_8] : memref<1x16x128xbf16, #tpu.memory_space<vmem>>, vector<1x16x128xbf16>
    %9 = vector.shape_cast %8 : vector<1x16x128xbf16> to vector<16x128xbf16>
    %10 = vector.shape_cast %7 : vector<16x128xbf16> to vector<1x16x128xbf16>
    tpu.vector_store %arg6[%c0_6, %c0_7, %c0_8], %10 {strides = array<i32>} : memref<1x16x128xbf16, #tpu.memory_space<vmem>>, vector<1x16x128xbf16>,
    return
  }
  func.func @transform_0(%arg0: i32, %arg1: i32, %arg2: i32) -> (i32, i32, i32) {
    %c0_i32 = arith.constant 0 : i32
    %c0_i32_0 = arith.constant 0 : i32
    return %arg0, %arg1, %c0_i32 : i32, i32, i32
  }
  func.func @transform_1(%arg0: i32, %arg1: i32, %arg2: i32) -> (i32, i32) {
    %c0_i32 = arith.constant 0 : i32
    %c0_i32_0 = arith.constant 0 : i32
    return %c0_i32, %arg2 : i32, i32
  }
  func.func @transform_2(%arg0: i32, %arg1: i32, %arg2: i32) -> (i32, i32) {
    %c0_i32 = arith.constant 0 : i32
    %c0_i32_0 = arith.constant 0 : i32
    return %c0_i32, %arg2 : i32, i32
  }
  func.func @transform_3(%arg0: i32, %arg1: i32, %arg2: i32) -> (i32, i32, i32) {
    %c0_i32 = arith.constant 0 : i32
    return %arg0, %arg1, %arg2 : i32, i32, i32
  }
}

module attributes {stable_mosaic.version = 11 : i64} {
  func.func @kernel(%arg0: i32, %arg1: i32, %arg2: i32, %arg3: memref<1x16x128xbf16, #tpu.memory_space<vmem>>, %arg4: memref<128x128xbf16, #tpu.memory_space<vmem>>, %arg5: memref<1x128xf32, #tpu.memory_space<vmem>>, %arg6: memref<1x16x128xbf16, #tpu.memory_space<vmem>>) attributes {dimension_semantics = [#tpu.dimension_semantics<parallel>, #tpu.dimension_semantics<parallel>, #tpu.dimension_semantics<parallel>], iteration_bounds = array<i64: 2, 1, 1>, scalar_prefetch = 0 : i64, scratch_operands = 0 : i64, tpu.core_type = #tpu.core_type<tc>, window_params = [{transform_indices = @transform_0, window_bounds = array<i64: 1, 16, 128>}, {transform_indices = @transform_1, window_bounds = array<i64: 128, 128>}, {transform_indices = @transform_2, window_bounds = array<i64: 1, 128>}, {transform_indices = @transform_3, window_bounds = array<i64: 1, 16, 128>}]} {
    %c0 = arith.constant 0 : index
    %c0_0 = arith.constant 0 : index
    %c0_1 = arith.constant 0 : index
    %0 = vector.load %arg3[%c0, %c0_0, %c0_1] : memref<1x16x128xbf16, #tpu.memory_space<vmem>>, vector<1x16x128xbf16>
    %1 = vector.shape_cast %0 : vector<1x16x128xbf16> to vector<16x128xbf16>
    %c0_2 = arith.constant 0 : index
    %c0_3 = arith.constant 0 : index
    %2 = vector.load %arg4[%c0_2, %c0_3] : memref<128x128xbf16, #tpu.memory_space<vmem>>, vector<128x128xbf16>
    %cst = arith.constant dense<0.000000e+00> : vector<16x128xf32>
    %3 = tpu.matmul %1, %2, %cst {dimension_numbers = #tpu.dot_dimension_numbers<[1], [0], [0], [1], [0, 0, 1, 1], [], []>} : vector<16x128xbf16>, vector<128x128xbf16>, vector<16x128xf32> -> vector<16x128xf32>
    %c0_4 = arith.constant 0 : index
    %c0_5 = arith.constant 0 : index
    %4 = vector.load %arg5[%c0_4, %c0_5] : memref<1x128xf32, #tpu.memory_space<vmem>>, vector<1x128xf32>
    %5 = vector.broadcast %4 : vector<1x128xf32> to vector<16x128xf32>
    %6 = arith.addf %3, %5 : vector<16x128xf32>
    %cst_6 = arith.constant 3.000000e+00 : f32
    %7 = vector.broadcast %cst_6 : f32 to vector<16x128xf32>
    %8 = arith.addf %6, %7 : vector<16x128xf32>
    %cst_7 = arith.constant 0.000000e+00 : f32
    %cst_8 = arith.constant 6.000000e+00 : f32
    %9 = vector.broadcast %cst_7 : f32 to vector<16x128xf32>
    %10 = arith.maximumf %9, %8 : vector<16x128xf32>
    %11 = vector.broadcast %cst_8 : f32 to vector<16x128xf32>
    %12 = arith.minimumf %11, %10 : vector<16x128xf32>
    %13 = arith.mulf %6, %12 : vector<16x128xf32>
    %cst_9 = arith.constant 0.166666672 : f32
    %14 = vector.broadcast %cst_9 : f32 to vector<16x128xf32>
    %15 = arith.mulf %13, %14 : vector<16x128xf32>
    %16 = arith.truncf %15 : vector<16x128xf32> to vector<16x128xbf16>
    %c0_10 = arith.constant 0 : index
    %c0_11 = arith.constant 0 : index
    %c0_12 = arith.constant 0 : index
    %17 = vector.load %arg6[%c0_10, %c0_11, %c0_12] : memref<1x16x128xbf16, #tpu.memory_space<vmem>>, vector<1x16x128xbf16>
    %18 = vector.shape_cast %17 : vector<1x16x128xbf16> to vector<16x128xbf16>
    %19 = vector.shape_cast %16 : vector<16x128xbf16> to vector<1x16x128xbf16>
    tpu.vector_store %arg6[%c0_10, %c0_11, %c0_12], %19 {strides = array<i32>} : memref<1x16x128xbf16, #tpu.memory_space<vmem>>, vector<1x16x128xbf16>,
    return
  }
  func.func @transform_0(%arg0: i32, %arg1: i32, %arg2: i32) -> (i32, i32, i32) {
    %c0_i32 = arith.constant 0 : i32
    %c0_i32_0 = arith.constant 0 : i32
    return %arg0, %arg1, %c0_i32 : i32, i32, i32
  }
  func.func @transform_1(%arg0: i32, %arg1: i32, %arg2: i32) -> (i32, i32) {
    %c0_i32 = arith.constant 0 : i32
    %c0_i32_0 = arith.constant 0 : i32
    return %c0_i32, %arg2 : i32, i32
  }
  func.func @transform_2(%arg0: i32, %arg1: i32, %arg2: i32) -> (i32, i32) {
    %c0_i32 = arith.constant 0 : i32
    %c0_i32_0 = arith.constant 0 : i32
    return %c0_i32, %arg2 : i32, i32
  }
  func.func @transform_3(%arg0: i32, %arg1: i32, %arg2: i32) -> (i32, i32, i32) {
    %c0_i32 = arith.constant 0 : i32
    return %arg0, %arg1, %arg2 : i32, i32, i32
  }
}

module attributes {stable_mosaic.version = 11 : i64} {
  func.func @_dw_kernel(%arg0: i32, %arg1: memref<1x8x1x8x128xbf16, #tpu.memory_space<vmem>>, %arg2: memref<25x1x128xf32, #tpu.memory_space<vmem>>, %arg3: memref<1x128xf32, #tpu.memory_space<vmem>>, %arg4: memref<128x128xbf16, #tpu.memory_space<vmem>>, %arg5: memref<1x128xf32, #tpu.memory_space<vmem>>, %arg6: memref<128x128xbf16, #tpu.memory_space<vmem>>, %arg7: memref<1x128xf32, #tpu.memory_space<vmem>>, %arg8: memref<1x4x4x128xbf16, #tpu.memory_space<vmem>>) attributes {dimension_semantics = [#tpu.dimension_semantics<parallel>], iteration_bounds = array<i64: 2>, scalar_prefetch = 0 : i64, scratch_operands = 0 : i64, tpu.core_type = #tpu.core_type<tc>, window_params = [{transform_indices = @transform_0, window_bounds = array<i64: 1, 8, 1, 8, 128>}, {pipeline_mode = #tpu.pipeline_mode<synchronous>, transform_indices = @transform_1, window_bounds = array<i64: 25, 1, 128>}, {pipeline_mode = #tpu.pipeline_mode<synchronous>, transform_indices = @transform_2, window_bounds = array<i64: 1, 128>}, {pipeline_mode = #tpu.pipeline_mode<synchronous>, transform_indices = @transform_3, window_bounds = array<i64: 128, 128>}, {pipeline_mode = #tpu.pipeline_mode<synchronous>, transform_indices = @transform_4, window_bounds = array<i64: 1, 128>}, {pipeline_mode = #tpu.pipeline_mode<synchronous>, transform_indices = @transform_5, window_bounds = array<i64: 128, 128>}, {pipeline_mode = #tpu.pipeline_mode<synchronous>, transform_indices = @transform_6, window_bounds = array<i64: 1, 128>}, {transform_indices = @transform_7, window_bounds = array<i64: 1, 4, 4, 128>}]} {
    %c0 = arith.constant 0 : index
    %c0_0 = arith.constant 0 : index
    %c0_1 = arith.constant 0 : index
    %0 = vector.load %arg2[%c0, %c0_0, %c0_1] : memref<25x1x128xf32, #tpu.memory_space<vmem>>, vector<25x1x128xf32>
    %c0_2 = arith.constant 0 : index
    %c0_3 = arith.constant 0 : index
    %c0_4 = arith.constant 0 : index
    %c0_5 = arith.constant 0 : index
    %c0_6 = arith.constant 0 : index
    %1 = vector.load %arg1[%c0_2, %c0_3, %c0_4, %c0_5, %c0_6] : memref<1x8x1x8x128xbf16, #tpu.memory_space<vmem>>, vector<1x4x1x4x128xbf16>
    %2 = vector.shape_cast %1 : vector<1x4x1x4x128xbf16> to vector<4x4x128xbf16>
    %3 = arith.extf %2 : vector<4x4x128xbf16> to vector<4x4x128xf32>
    %4 = vector.extract_strided_slice %0 {offsets = [0, 0, 0], sizes = [1, 1, 128], strides = [1, 1, 1]} : vector<25x1x128xf32> to vector<1x1x128xf32>
    %5 = vector.shape_cast %4 : vector<1x1x128xf32> to vector<1x128xf32>
    %6 = vector.shape_cast %5 : vector<1x128xf32> to vector<1x1x128xf32>
    %7 = vector.broadcast %6 : vector<1x1x128xf32> to vector<4x4x128xf32>
    %8 = arith.mulf %3, %7 : vector<4x4x128xf32>
    %c0_7 = arith.constant 0 : index
    %c0_8 = arith.constant 0 : index
    %c0_9 = arith.constant 0 : index
    %c1 = arith.constant 1 : index
    %c0_10 = arith.constant 0 : index
    %9 = vector.load %arg1[%c0_7, %c0_8, %c0_9, %c1, %c0_10] : memref<1x8x1x8x128xbf16, #tpu.memory_space<vmem>>, vector<1x4x1x4x128xbf16>
    %10 = vector.shape_cast %9 : vector<1x4x1x4x128xbf16> to vector<4x4x128xbf16>
    %11 = arith.extf %10 : vector<4x4x128xbf16> to vector<4x4x128xf32>
    %12 = vector.extract_strided_slice %0 {offsets = [1, 0, 0], sizes = [1, 1, 128], strides = [1, 1, 1]} : vector<25x1x128xf32> to vector<1x1x128xf32>
    %13 = vector.shape_cast %12 : vector<1x1x128xf32> to vector<1x128xf32>
    %14 = vector.shape_cast %13 : vector<1x128xf32> to vector<1x1x128xf32>
    %15 = vector.broadcast %14 : vector<1x1x128xf32> to vector<4x4x128xf32>
    %16 = arith.mulf %11, %15 : vector<4x4x128xf32>
    %17 = arith.addf %8, %16 : vector<4x4x128xf32>
    %c0_11 = arith.constant 0 : index
    %c0_12 = arith.constant 0 : index
    %c0_13 = arith.constant 0 : index
    %c2 = arith.constant 2 : index
    %c0_14 = arith.constant 0 : index
    %18 = vector.load %arg1[%c0_11, %c0_12, %c0_13, %c2, %c0_14] : memref<1x8x1x8x128xbf16, #tpu.memory_space<vmem>>, vector<1x4x1x4x128xbf16>
    %19 = vector.shape_cast %18 : vector<1x4x1x4x128xbf16> to vector<4x4x128xbf16>
    %20 = arith.extf %19 : vector<4x4x128xbf16> to vector<4x4x128xf32>
    %21 = vector.extract_strided_slice %0 {offsets = [2, 0, 0], sizes = [1, 1, 128], strides = [1, 1, 1]} : vector<25x1x128xf32> to vector<1x1x128xf32>
    %22 = vector.shape_cast %21 : vector<1x1x128xf32> to vector<1x128xf32>
    %23 = vector.shape_cast %22 : vector<1x128xf32> to vector<1x1x128xf32>
    %24 = vector.broadcast %23 : vector<1x1x128xf32> to vector<4x4x128xf32>
    %25 = arith.mulf %20, %24 : vector<4x4x128xf32>
    %26 = arith.addf %17, %25 : vector<4x4x128xf32>
    %c0_15 = arith.constant 0 : index
    %c0_16 = arith.constant 0 : index
    %c0_17 = arith.constant 0 : index
    %c3 = arith.constant 3 : index
    %c0_18 = arith.constant 0 : index
    %27 = vector.load %arg1[%c0_15, %c0_16, %c0_17, %c3, %c0_18] : memref<1x8x1x8x128xbf16, #tpu.memory_space<vmem>>, vector<1x4x1x4x128xbf16>
    %28 = vector.shape_cast %27 : vector<1x4x1x4x128xbf16> to vector<4x4x128xbf16>
    %29 = arith.extf %28 : vector<4x4x128xbf16> to vector<4x4x128xf32>
    %30 = vector.extract_strided_slice %0 {offsets = [3, 0, 0], sizes = [1, 1, 128], strides = [1, 1, 1]} : vector<25x1x128xf32> to vector<1x1x128xf32>
    %31 = vector.shape_cast %30 : vector<1x1x128xf32> to vector<1x128xf32>
    %32 = vector.shape_cast %31 : vector<1x128xf32> to vector<1x1x128xf32>
    %33 = vector.broadcast %32 : vector<1x1x128xf32> to vector<4x4x128xf32>
    %34 = arith.mulf %29, %33 : vector<4x4x128xf32>
    %35 = arith.addf %26, %34 : vector<4x4x128xf32>
    %c0_19 = arith.constant 0 : index
    %c0_20 = arith.constant 0 : index
    %c0_21 = arith.constant 0 : index
    %c4 = arith.constant 4 : index
    %c0_22 = arith.constant 0 : index
    %36 = vector.load %arg1[%c0_19, %c0_20, %c0_21, %c4, %c0_22] : memref<1x8x1x8x128xbf16, #tpu.memory_space<vmem>>, vector<1x4x1x4x128xbf16>
    %37 = vector.shape_cast %36 : vector<1x4x1x4x128xbf16> to vector<4x4x128xbf16>
    %38 = arith.extf %37 : vector<4x4x128xbf16> to vector<4x4x128xf32>
    %39 = vector.extract_strided_slice %0 {offsets = [4, 0, 0], sizes = [1, 1, 128], strides = [1, 1, 1]} : vector<25x1x128xf32> to vector<1x1x128xf32>
    %40 = vector.shape_cast %39 : vector<1x1x128xf32> to vector<1x128xf32>
    %41 = vector.shape_cast %40 : vector<1x128xf32> to vector<1x1x128xf32>
    %42 = vector.broadcast %41 : vector<1x1x128xf32> to vector<4x4x128xf32>
    %43 = arith.mulf %38, %42 : vector<4x4x128xf32>
    %44 = arith.addf %35, %43 : vector<4x4x128xf32>
    %c0_23 = arith.constant 0 : index
    %c1_24 = arith.constant 1 : index
    %c0_25 = arith.constant 0 : index
    %c0_26 = arith.constant 0 : index
    %c0_27 = arith.constant 0 : index
    %45 = vector.load %arg1[%c0_23, %c1_24, %c0_25, %c0_26, %c0_27] : memref<1x8x1x8x128xbf16, #tpu.memory_space<vmem>>, vector<1x4x1x4x128xbf16>
    %46 = vector.shape_cast %45 : vector<1x4x1x4x128xbf16> to vector<4x4x128xbf16>
    %47 = arith.extf %46 : vector<4x4x128xbf16> to vector<4x4x128xf32>
    %48 = vector.extract_strided_slice %0 {offsets = [5, 0, 0], sizes = [1, 1, 128], strides = [1, 1, 1]} : vector<25x1x128xf32> to vector<1x1x128xf32>
    %49 = vector.shape_cast %48 : vector<1x1x128xf32> to vector<1x128xf32>
    %50 = vector.shape_cast %49 : vector<1x128xf32> to vector<1x1x128xf32>
    %51 = vector.broadcast %50 : vector<1x1x128xf32> to vector<4x4x128xf32>
    %52 = arith.mulf %47, %51 : vector<4x4x128xf32>
    %53 = arith.addf %44, %52 : vector<4x4x128xf32>
    %c0_28 = arith.constant 0 : index
    %c1_29 = arith.constant 1 : index
    %c0_30 = arith.constant 0 : index
    %c1_31 = arith.constant 1 : index
    %c0_32 = arith.constant 0 : index
    %54 = vector.load %arg1[%c0_28, %c1_29, %c0_30, %c1_31, %c0_32] : memref<1x8x1x8x128xbf16, #tpu.memory_space<vmem>>, vector<1x4x1x4x128xbf16>
    %55 = vector.shape_cast %54 : vector<1x4x1x4x128xbf16> to vector<4x4x128xbf16>
    %56 = arith.extf %55 : vector<4x4x128xbf16> to vector<4x4x128xf32>
    %57 = vector.extract_strided_slice %0 {offsets = [6, 0, 0], sizes = [1, 1, 128], strides = [1, 1, 1]} : vector<25x1x128xf32> to vector<1x1x128xf32>
    %58 = vector.shape_cast %57 : vector<1x1x128xf32> to vector<1x128xf32>
    %59 = vector.shape_cast %58 : vector<1x128xf32> to vector<1x1x128xf32>
    %60 = vector.broadcast %59 : vector<1x1x128xf32> to vector<4x4x128xf32>
    %61 = arith.mulf %56, %60 : vector<4x4x128xf32>
    %62 = arith.addf %53, %61 : vector<4x4x128xf32>
    %c0_33 = arith.constant 0 : index
    %c1_34 = arith.constant 1 : index
    %c0_35 = arith.constant 0 : index
    %c2_36 = arith.constant 2 : index
    %c0_37 = arith.constant 0 : index
    %63 = vector.load %arg1[%c0_33, %c1_34, %c0_35, %c2_36, %c0_37] : memref<1x8x1x8x128xbf16, #tpu.memory_space<vmem>>, vector<1x4x1x4x128xbf16>
    %64 = vector.shape_cast %63 : vector<1x4x1x4x128xbf16> to vector<4x4x128xbf16>
    %65 = arith.extf %64 : vector<4x4x128xbf16> to vector<4x4x128xf32>
    %66 = vector.extract_strided_slice %0 {offsets = [7, 0, 0], sizes = [1, 1, 128], strides = [1, 1, 1]} : vector<25x1x128xf32> to vector<1x1x128xf32>
    %67 = vector.shape_cast %66 : vector<1x1x128xf32> to vector<1x128xf32>
    %68 = vector.shape_cast %67 : vector<1x128xf32> to vector<1x1x128xf32>
    %69 = vector.broadcast %68 : vector<1x1x128xf32> to vector<4x4x128xf32>
    %70 = arith.mulf %65, %69 : vector<4x4x128xf32>
    %71 = arith.addf %62, %70 : vector<4x4x128xf32>
    %c0_38 = arith.constant 0 : index
    %c1_39 = arith.constant 1 : index
    %c0_40 = arith.constant 0 : index
    %c3_41 = arith.constant 3 : index
    %c0_42 = arith.constant 0 : index
    %72 = vector.load %arg1[%c0_38, %c1_39, %c0_40, %c3_41, %c0_42] : memref<1x8x1x8x128xbf16, #tpu.memory_space<vmem>>, vector<1x4x1x4x128xbf16>
    %73 = vector.shape_cast %72 : vector<1x4x1x4x128xbf16> to vector<4x4x128xbf16>
    %74 = arith.extf %73 : vector<4x4x128xbf16> to vector<4x4x128xf32>
    %75 = vector.extract_strided_slice %0 {offsets = [8, 0, 0], sizes = [1, 1, 128], strides = [1, 1, 1]} : vector<25x1x128xf32> to vector<1x1x128xf32>
    %76 = vector.shape_cast %75 : vector<1x1x128xf32> to vector<1x128xf32>
    %77 = vector.shape_cast %76 : vector<1x128xf32> to vector<1x1x128xf32>
    %78 = vector.broadcast %77 : vector<1x1x128xf32> to vector<4x4x128xf32>
    %79 = arith.mulf %74, %78 : vector<4x4x128xf32>
    %80 = arith.addf %71, %79 : vector<4x4x128xf32>
    %c0_43 = arith.constant 0 : index
    %c1_44 = arith.constant 1 : index
    %c0_45 = arith.constant 0 : index
    %c4_46 = arith.constant 4 : index
    %c0_47 = arith.constant 0 : index
    %81 = vector.load %arg1[%c0_43, %c1_44, %c0_45, %c4_46, %c0_47] : memref<1x8x1x8x128xbf16, #tpu.memory_space<vmem>>, vector<1x4x1x4x128xbf16>
    %82 = vector.shape_cast %81 : vector<1x4x1x4x128xbf16> to vector<4x4x128xbf16>
    %83 = arith.extf %82 : vector<4x4x128xbf16> to vector<4x4x128xf32>
    %84 = vector.extract_strided_slice %0 {offsets = [9, 0, 0], sizes = [1, 1, 128], strides = [1, 1, 1]} : vector<25x1x128xf32> to vector<1x1x128xf32>
    %85 = vector.shape_cast %84 : vector<1x1x128xf32> to vector<1x128xf32>
    %86 = vector.shape_cast %85 : vector<1x128xf32> to vector<1x1x128xf32>
    %87 = vector.broadcast %86 : vector<1x1x128xf32> to vector<4x4x128xf32>
    %88 = arith.mulf %83, %87 : vector<4x4x128xf32>
    %89 = arith.addf %80, %88 : vector<4x4x128xf32>
    %c0_48 = arith.constant 0 : index
    %c2_49 = arith.constant 2 : index
    %c0_50 = arith.constant 0 : index
    %c0_51 = arith.constant 0 : index
    %c0_52 = arith.constant 0 : index
    %90 = vector.load %arg1[%c0_48, %c2_49, %c0_50, %c0_51, %c0_52] : memref<1x8x1x8x128xbf16, #tpu.memory_space<vmem>>, vector<1x4x1x4x128xbf16>
    %91 = vector.shape_cast %90 : vector<1x4x1x4x128xbf16> to vector<4x4x128xbf16>
    %92 = arith.extf %91 : vector<4x4x128xbf16> to vector<4x4x128xf32>
    %93 = vector.extract_strided_slice %0 {offsets = [10, 0, 0], sizes = [1, 1, 128], strides = [1, 1, 1]} : vector<25x1x128xf32> to vector<1x1x128xf32>
    %94 = vector.shape_cast %93 : vector<1x1x128xf32> to vector<1x128xf32>
    %95 = vector.shape_cast %94 : vector<1x128xf32> to vector<1x1x128xf32>
    %96 = vector.broadcast %95 : vector<1x1x128xf32> to vector<4x4x128xf32>
    %97 = arith.mulf %92, %96 : vector<4x4x128xf32>
    %98 = arith.addf %89, %97 : vector<4x4x128xf32>
    %c0_53 = arith.constant 0 : index
    %c2_54 = arith.constant 2 : index
    %c0_55 = arith.constant 0 : index
    %c1_56 = arith.constant 1 : index
    %c0_57 = arith.constant 0 : index
    %99 = vector.load %arg1[%c0_53, %c2_54, %c0_55, %c1_56, %c0_57] : memref<1x8x1x8x128xbf16, #tpu.memory_space<vmem>>, vector<1x4x1x4x128xbf16>
    %100 = vector.shape_cast %99 : vector<1x4x1x4x128xbf16> to vector<4x4x128xbf16>
    %101 = arith.extf %100 : vector<4x4x128xbf16> to vector<4x4x128xf32>
    %102 = vector.extract_strided_slice %0 {offsets = [11, 0, 0], sizes = [1, 1, 128], strides = [1, 1, 1]} : vector<25x1x128xf32> to vector<1x1x128xf32>
    %103 = vector.shape_cast %102 : vector<1x1x128xf32> to vector<1x128xf32>
    %104 = vector.shape_cast %103 : vector<1x128xf32> to vector<1x1x128xf32>
    %105 = vector.broadcast %104 : vector<1x1x128xf32> to vector<4x4x128xf32>
    %106 = arith.mulf %101, %105 : vector<4x4x128xf32>
    %107 = arith.addf %98, %106 : vector<4x4x128xf32>
    %c0_58 = arith.constant 0 : index
    %c2_59 = arith.constant 2 : index
    %c0_60 = arith.constant 0 : index
    %c2_61 = arith.constant 2 : index
    %c0_62 = arith.constant 0 : index
    %108 = vector.load %arg1[%c0_58, %c2_59, %c0_60, %c2_61, %c0_62] : memref<1x8x1x8x128xbf16, #tpu.memory_space<vmem>>, vector<1x4x1x4x128xbf16>
    %109 = vector.shape_cast %108 : vector<1x4x1x4x128xbf16> to vector<4x4x128xbf16>
    %110 = arith.extf %109 : vector<4x4x128xbf16> to vector<4x4x128xf32>
    %111 = vector.extract_strided_slice %0 {offsets = [12, 0, 0], sizes = [1, 1, 128], strides = [1, 1, 1]} : vector<25x1x128xf32> to vector<1x1x128xf32>
    %112 = vector.shape_cast %111 : vector<1x1x128xf32> to vector<1x128xf32>
    %113 = vector.shape_cast %112 : vector<1x128xf32> to vector<1x1x128xf32>
    %114 = vector.broadcast %113 : vector<1x1x128xf32> to vector<4x4x128xf32>
    %115 = arith.mulf %110, %114 : vector<4x4x128xf32>
    %116 = arith.addf %107, %115 : vector<4x4x128xf32>
    %c0_63 = arith.constant 0 : index
    %c2_64 = arith.constant 2 : index
    %c0_65 = arith.constant 0 : index
    %c3_66 = arith.constant 3 : index
    %c0_67 = arith.constant 0 : index
    %117 = vector.load %arg1[%c0_63, %c2_64, %c0_65, %c3_66, %c0_67] : memref<1x8x1x8x128xbf16, #tpu.memory_space<vmem>>, vector<1x4x1x4x128xbf16>
    %118 = vector.shape_cast %117 : vector<1x4x1x4x128xbf16> to vector<4x4x128xbf16>
    %119 = arith.extf %118 : vector<4x4x128xbf16> to vector<4x4x128xf32>
    %120 = vector.extract_strided_slice %0 {offsets = [13, 0, 0], sizes = [1, 1, 128], strides = [1, 1, 1]} : vector<25x1x128xf32> to vector<1x1x128xf32>
    %121 = vector.shape_cast %120 : vector<1x1x128xf32> to vector<1x128xf32>
    %122 = vector.shape_cast %121 : vector<1x128xf32> to vector<1x1x128xf32>
    %123 = vector.broadcast %122 : vector<1x1x128xf32> to vector<4x4x128xf32>
    %124 = arith.mulf %119, %123 : vector<4x4x128xf32>
    %125 = arith.addf %116, %124 : vector<4x4x128xf32>
    %c0_68 = arith.constant 0 : index
    %c2_69 = arith.constant 2 : index
    %c0_70 = arith.constant 0 : index
    %c4_71 = arith.constant 4 : index
    %c0_72 = arith.constant 0 : index
    %126 = vector.load %arg1[%c0_68, %c2_69, %c0_70, %c4_71, %c0_72] : memref<1x8x1x8x128xbf16, #tpu.memory_space<vmem>>, vector<1x4x1x4x128xbf16>
    %127 = vector.shape_cast %126 : vector<1x4x1x4x128xbf16> to vector<4x4x128xbf16>
    %128 = arith.extf %127 : vector<4x4x128xbf16> to vector<4x4x128xf32>
    %129 = vector.extract_strided_slice %0 {offsets = [14, 0, 0], sizes = [1, 1, 128], strides = [1, 1, 1]} : vector<25x1x128xf32> to vector<1x1x128xf32>
    %130 = vector.shape_cast %129 : vector<1x1x128xf32> to vector<1x128xf32>
    %131 = vector.shape_cast %130 : vector<1x128xf32> to vector<1x1x128xf32>
    %132 = vector.broadcast %131 : vector<1x1x128xf32> to vector<4x4x128xf32>
    %133 = arith.mulf %128, %132 : vector<4x4x128xf32>
    %134 = arith.addf %125, %133 : vector<4x4x128xf32>
    %c0_73 = arith.constant 0 : index
    %c3_74 = arith.constant 3 : index
    %c0_75 = arith.constant 0 : index
    %c0_76 = arith.constant 0 : index
    %c0_77 = arith.constant 0 : index
    %135 = vector.load %arg1[%c0_73, %c3_74, %c0_75, %c0_76, %c0_77] : memref<1x8x1x8x128xbf16, #tpu.memory_space<vmem>>, vector<1x4x1x4x128xbf16>
    %136 = vector.shape_cast %135 : vector<1x4x1x4x128xbf16> to vector<4x4x128xbf16>
    %137 = arith.extf %136 : vector<4x4x128xbf16> to vector<4x4x128xf32>
    %138 = vector.extract_strided_slice %0 {offsets = [15, 0, 0], sizes = [1, 1, 128], strides = [1, 1, 1]} : vector<25x1x128xf32> to vector<1x1x128xf32>
    %139 = vector.shape_cast %138 : vector<1x1x128xf32> to vector<1x128xf32>
    %140 = vector.shape_cast %139 : vector<1x128xf32> to vector<1x1x128xf32>
    %141 = vector.broadcast %140 : vector<1x1x128xf32> to vector<4x4x128xf32>
    %142 = arith.mulf %137, %141 : vector<4x4x128xf32>
    %143 = arith.addf %134, %142 : vector<4x4x128xf32>
    %c0_78 = arith.constant 0 : index
    %c3_79 = arith.constant 3 : index
    %c0_80 = arith.constant 0 : index
    %c1_81 = arith.constant 1 : index
    %c0_82 = arith.constant 0 : index
    %144 = vector.load %arg1[%c0_78, %c3_79, %c0_80, %c1_81, %c0_82] : memref<1x8x1x8x128xbf16, #tpu.memory_space<vmem>>, vector<1x4x1x4x128xbf16>
    %145 = vector.shape_cast %144 : vector<1x4x1x4x128xbf16> to vector<4x4x128xbf16>
    %146 = arith.extf %145 : vector<4x4x128xbf16> to vector<4x4x128xf32>
    %147 = vector.extract_strided_slice %0 {offsets = [16, 0, 0], sizes = [1, 1, 128], strides = [1, 1, 1]} : vector<25x1x128xf32> to vector<1x1x128xf32>
    %148 = vector.shape_cast %147 : vector<1x1x128xf32> to vector<1x128xf32>
    %149 = vector.shape_cast %148 : vector<1x128xf32> to vector<1x1x128xf32>
    %150 = vector.broadcast %149 : vector<1x1x128xf32> to vector<4x4x128xf32>
    %151 = arith.mulf %146, %150 : vector<4x4x128xf32>
    %152 = arith.addf %143, %151 : vector<4x4x128xf32>
    %c0_83 = arith.constant 0 : index
    %c3_84 = arith.constant 3 : index
    %c0_85 = arith.constant 0 : index
    %c2_86 = arith.constant 2 : index
    %c0_87 = arith.constant 0 : index
    %153 = vector.load %arg1[%c0_83, %c3_84, %c0_85, %c2_86, %c0_87] : memref<1x8x1x8x128xbf16, #tpu.memory_space<vmem>>, vector<1x4x1x4x128xbf16>
    %154 = vector.shape_cast %153 : vector<1x4x1x4x128xbf16> to vector<4x4x128xbf16>
    %155 = arith.extf %154 : vector<4x4x128xbf16> to vector<4x4x128xf32>
    %156 = vector.extract_strided_slice %0 {offsets = [17, 0, 0], sizes = [1, 1, 128], strides = [1, 1, 1]} : vector<25x1x128xf32> to vector<1x1x128xf32>
    %157 = vector.shape_cast %156 : vector<1x1x128xf32> to vector<1x128xf32>
    %158 = vector.shape_cast %157 : vector<1x128xf32> to vector<1x1x128xf32>
    %159 = vector.broadcast %158 : vector<1x1x128xf32> to vector<4x4x128xf32>
    %160 = arith.mulf %155, %159 : vector<4x4x128xf32>
    %161 = arith.addf %152, %160 : vector<4x4x128xf32>
    %c0_88 = arith.constant 0 : index
    %c3_89 = arith.constant 3 : index
    %c0_90 = arith.constant 0 : index
    %c3_91 = arith.constant 3 : index
    %c0_92 = arith.constant 0 : index
    %162 = vector.load %arg1[%c0_88, %c3_89, %c0_90, %c3_91, %c0_92] : memref<1x8x1x8x128xbf16, #tpu.memory_space<vmem>>, vector<1x4x1x4x128xbf16>
    %163 = vector.shape_cast %162 : vector<1x4x1x4x128xbf16> to vector<4x4x128xbf16>
    %164 = arith.extf %163 : vector<4x4x128xbf16> to vector<4x4x128xf32>
    %165 = vector.extract_strided_slice %0 {offsets = [18, 0, 0], sizes = [1, 1, 128], strides = [1, 1, 1]} : vector<25x1x128xf32> to vector<1x1x128xf32>
    %166 = vector.shape_cast %165 : vector<1x1x128xf32> to vector<1x128xf32>
    %167 = vector.shape_cast %166 : vector<1x128xf32> to vector<1x1x128xf32>
    %168 = vector.broadcast %167 : vector<1x1x128xf32> to vector<4x4x128xf32>
    %169 = arith.mulf %164, %168 : vector<4x4x128xf32>
    %170 = arith.addf %161, %169 : vector<4x4x128xf32>
    %c0_93 = arith.constant 0 : index
    %c3_94 = arith.constant 3 : index
    %c0_95 = arith.constant 0 : index
    %c4_96 = arith.constant 4 : index
    %c0_97 = arith.constant 0 : index
    %171 = vector.load %arg1[%c0_93, %c3_94, %c0_95, %c4_96, %c0_97] : memref<1x8x1x8x128xbf16, #tpu.memory_space<vmem>>, vector<1x4x1x4x128xbf16>
    %172 = vector.shape_cast %171 : vector<1x4x1x4x128xbf16> to vector<4x4x128xbf16>
    %173 = arith.extf %172 : vector<4x4x128xbf16> to vector<4x4x128xf32>
    %174 = vector.extract_strided_slice %0 {offsets = [19, 0, 0], sizes = [1, 1, 128], strides = [1, 1, 1]} : vector<25x1x128xf32> to vector<1x1x128xf32>
    %175 = vector.shape_cast %174 : vector<1x1x128xf32> to vector<1x128xf32>
    %176 = vector.shape_cast %175 : vector<1x128xf32> to vector<1x1x128xf32>
    %177 = vector.broadcast %176 : vector<1x1x128xf32> to vector<4x4x128xf32>
    %178 = arith.mulf %173, %177 : vector<4x4x128xf32>
    %179 = arith.addf %170, %178 : vector<4x4x128xf32>
    %c0_98 = arith.constant 0 : index
    %c4_99 = arith.constant 4 : index
    %c0_100 = arith.constant 0 : index
    %c0_101 = arith.constant 0 : index
    %c0_102 = arith.constant 0 : index
    %180 = vector.load %arg1[%c0_98, %c4_99, %c0_100, %c0_101, %c0_102] : memref<1x8x1x8x128xbf16, #tpu.memory_space<vmem>>, vector<1x4x1x4x128xbf16>
    %181 = vector.shape_cast %180 : vector<1x4x1x4x128xbf16> to vector<4x4x128xbf16>
    %182 = arith.extf %181 : vector<4x4x128xbf16> to vector<4x4x128xf32>
    %183 = vector.extract_strided_slice %0 {offsets = [20, 0, 0], sizes = [1, 1, 128], strides = [1, 1, 1]} : vector<25x1x128xf32> to vector<1x1x128xf32>
    %184 = vector.shape_cast %183 : vector<1x1x128xf32> to vector<1x128xf32>
    %185 = vector.shape_cast %184 : vector<1x128xf32> to vector<1x1x128xf32>
    %186 = vector.broadcast %185 : vector<1x1x128xf32> to vector<4x4x128xf32>
    %187 = arith.mulf %182, %186 : vector<4x4x128xf32>
    %188 = arith.addf %179, %187 : vector<4x4x128xf32>
    %c0_103 = arith.constant 0 : index
    %c4_104 = arith.constant 4 : index
    %c0_105 = arith.constant 0 : index
    %c1_106 = arith.constant 1 : index
    %c0_107 = arith.constant 0 : index
    %189 = vector.load %arg1[%c0_103, %c4_104, %c0_105, %c1_106, %c0_107] : memref<1x8x1x8x128xbf16, #tpu.memory_space<vmem>>, vector<1x4x1x4x128xbf16>
    %190 = vector.shape_cast %189 : vector<1x4x1x4x128xbf16> to vector<4x4x128xbf16>
    %191 = arith.extf %190 : vector<4x4x128xbf16> to vector<4x4x128xf32>
    %192 = vector.extract_strided_slice %0 {offsets = [21, 0, 0], sizes = [1, 1, 128], strides = [1, 1, 1]} : vector<25x1x128xf32> to vector<1x1x128xf32>
    %193 = vector.shape_cast %192 : vector<1x1x128xf32> to vector<1x128xf32>
    %194 = vector.shape_cast %193 : vector<1x128xf32> to vector<1x1x128xf32>
    %195 = vector.broadcast %194 : vector<1x1x128xf32> to vector<4x4x128xf32>
    %196 = arith.mulf %191, %195 : vector<4x4x128xf32>
    %197 = arith.addf %188, %196 : vector<4x4x128xf32>
    %c0_108 = arith.constant 0 : index
    %c4_109 = arith.constant 4 : index
    %c0_110 = arith.constant 0 : index
    %c2_111 = arith.constant 2 : index
    %c0_112 = arith.constant 0 : index
    %198 = vector.load %arg1[%c0_108, %c4_109, %c0_110, %c2_111, %c0_112] : memref<1x8x1x8x128xbf16, #tpu.memory_space<vmem>>, vector<1x4x1x4x128xbf16>
    %199 = vector.shape_cast %198 : vector<1x4x1x4x128xbf16> to vector<4x4x128xbf16>
    %200 = arith.extf %199 : vector<4x4x128xbf16> to vector<4x4x128xf32>
    %201 = vector.extract_strided_slice %0 {offsets = [22, 0, 0], sizes = [1, 1, 128], strides = [1, 1, 1]} : vector<25x1x128xf32> to vector<1x1x128xf32>
    %202 = vector.shape_cast %201 : vector<1x1x128xf32> to vector<1x128xf32>
    %203 = vector.shape_cast %202 : vector<1x128xf32> to vector<1x1x128xf32>
    %204 = vector.broadcast %203 : vector<1x1x128xf32> to vector<4x4x128xf32>
    %205 = arith.mulf %200, %204 : vector<4x4x128xf32>
    %206 = arith.addf %197, %205 : vector<4x4x128xf32>
    %c0_113 = arith.constant 0 : index
    %c4_114 = arith.constant 4 : index
    %c0_115 = arith.constant 0 : index
    %c3_116 = arith.constant 3 : index
    %c0_117 = arith.constant 0 : index
    %207 = vector.load %arg1[%c0_113, %c4_114, %c0_115, %c3_116, %c0_117] : memref<1x8x1x8x128xbf16, #tpu.memory_space<vmem>>, vector<1x4x1x4x128xbf16>
    %208 = vector.shape_cast %207 : vector<1x4x1x4x128xbf16> to vector<4x4x128xbf16>
    %209 = arith.extf %208 : vector<4x4x128xbf16> to vector<4x4x128xf32>
    %210 = vector.extract_strided_slice %0 {offsets = [23, 0, 0], sizes = [1, 1, 128], strides = [1, 1, 1]} : vector<25x1x128xf32> to vector<1x1x128xf32>
    %211 = vector.shape_cast %210 : vector<1x1x128xf32> to vector<1x128xf32>
    %212 = vector.shape_cast %211 : vector<1x128xf32> to vector<1x1x128xf32>
    %213 = vector.broadcast %212 : vector<1x1x128xf32> to vector<4x4x128xf32>
    %214 = arith.mulf %209, %213 : vector<4x4x128xf32>
    %215 = arith.addf %206, %214 : vector<4x4x128xf32>
    %c0_118 = arith.constant 0 : index
    %c4_119 = arith.constant 4 : index
    %c0_120 = arith.constant 0 : index
    %c4_121 = arith.constant 4 : index
    %c0_122 = arith.constant 0 : index
    %216 = vector.load %arg1[%c0_118, %c4_119, %c0_120, %c4_121, %c0_122] : memref<1x8x1x8x128xbf16, #tpu.memory_space<vmem>>, vector<1x4x1x4x128xbf16>
    %217 = vector.shape_cast %216 : vector<1x4x1x4x128xbf16> to vector<4x4x128xbf16>
    %218 = arith.extf %217 : vector<4x4x128xbf16> to vector<4x4x128xf32>
    %219 = vector.extract_strided_slice %0 {offsets = [24, 0, 0], sizes = [1, 1, 128], strides = [1, 1, 1]} : vector<25x1x128xf32> to vector<1x1x128xf32>
    %220 = vector.shape_cast %219 : vector<1x1x128xf32> to vector<1x128xf32>
    %221 = vector.shape_cast %220 : vector<1x128xf32> to vector<1x1x128xf32>
    %222 = vector.broadcast %221 : vector<1x1x128xf32> to vector<4x4x128xf32>
    %223 = arith.mulf %218, %222 : vector<4x4x128xf32>
    %224 = arith.addf %215, %223 : vector<4x4x128xf32>
    %c0_123 = arith.constant 0 : index
    %c0_124 = arith.constant 0 : index
    %225 = vector.load %arg3[%c0_123, %c0_124] : memref<1x128xf32, #tpu.memory_space<vmem>>, vector<1x128xf32>
    %226 = vector.shape_cast %225 : vector<1x128xf32> to vector<1x1x128xf32>
    %227 = vector.broadcast %226 : vector<1x1x128xf32> to vector<4x4x128xf32>
    %228 = arith.addf %224, %227 : vector<4x4x128xf32>
    %cst = arith.constant 3.000000e+00 : f32
    %229 = vector.broadcast %cst : f32 to vector<4x4x128xf32>
    %230 = arith.addf %228, %229 : vector<4x4x128xf32>
    %cst_125 = arith.constant 0.000000e+00 : f32
    %cst_126 = arith.constant 6.000000e+00 : f32
    %231 = vector.broadcast %cst_125 : f32 to vector<4x4x128xf32>
    %232 = arith.maximumf %231, %230 : vector<4x4x128xf32>
    %233 = vector.broadcast %cst_126 : f32 to vector<4x4x128xf32>
    %234 = arith.minimumf %233, %232 : vector<4x4x128xf32>
    %235 = arith.mulf %228, %234 : vector<4x4x128xf32>
    %cst_127 = arith.constant 0.166666672 : f32
    %236 = vector.broadcast %cst_127 : f32 to vector<4x4x128xf32>
    %237 = arith.mulf %235, %236 : vector<4x4x128xf32>
    %cst_128 = arith.constant dense<0.000000e+00> : vector<4x128xf32>
    %238 = vector.multi_reduction <add>, %237, %cst_128 [0] : vector<4x4x128xf32> to vector<4x128xf32>
    %cst_129 = arith.constant 4.000000e+00 : f32
    %239 = vector.broadcast %cst_129 : f32 to vector<4x128xf32>
    %240 = arith.divf %238, %239 : vector<4x128xf32>
    %cst_130 = arith.constant dense<0.000000e+00> : vector<128xf32>
    %241 = vector.multi_reduction <add>, %240, %cst_130 [0] : vector<4x128xf32> to vector<128xf32>
    %242 = vector.shape_cast %241 : vector<128xf32> to vector<1x128xf32>
    %cst_131 = arith.constant 4.000000e+00 : f32
    %243 = vector.broadcast %cst_131 : f32 to vector<1x128xf32>
    %244 = arith.divf %242, %243 : vector<1x128xf32>
    %245 = arith.truncf %244 : vector<1x128xf32> to vector<1x128xbf16>
    %c0_132 = arith.constant 0 : index
    %c0_133 = arith.constant 0 : index
    %246 = vector.load %arg4[%c0_132, %c0_133] : memref<128x128xbf16, #tpu.memory_space<vmem>>, vector<128x128xbf16>
    %cst_134 = arith.constant dense<0.000000e+00> : vector<1x128xf32>
    %247 = tpu.matmul %245, %246, %cst_134 {dimension_numbers = #tpu.dot_dimension_numbers<[1], [0], [0], [1], [0, 0, 1, 1], [], []>} : vector<1x128xbf16>, vector<128x128xbf16>, vector<1x128xf32> -> vector<1x128xf32>
    %c0_135 = arith.constant 0 : index
    %c0_136 = arith.constant 0 : index
    %248 = vector.load %arg5[%c0_135, %c0_136] : memref<1x128xf32, #tpu.memory_space<vmem>>, vector<1x128xf32>
    %249 = arith.addf %247, %248 : vector<1x128xf32>
    %cst_137 = arith.constant 0.000000e+00 : f32
    %250 = vector.broadcast %cst_137 : f32 to vector<1x128xf32>
    %251 = arith.maximumf %249, %250 : vector<1x128xf32>
    %252 = arith.truncf %251 : vector<1x128xf32> to vector<1x128xbf16>
    %c0_138 = arith.constant 0 : index
    %c0_139 = arith.constant 0 : index
    %253 = vector.load %arg6[%c0_138, %c0_139] : memref<128x128xbf16, #tpu.memory_space<vmem>>, vector<128x128xbf16>
    %cst_140 = arith.constant dense<0.000000e+00> : vector<1x128xf32>
    %254 = tpu.matmul %252, %253, %cst_140 {dimension_numbers = #tpu.dot_dimension_numbers<[1], [0], [0], [1], [0, 0, 1, 1], [], []>} : vector<1x128xbf16>, vector<128x128xbf16>, vector<1x128xf32> -> vector<1x128xf32>
    %c0_141 = arith.constant 0 : index
    %c0_142 = arith.constant 0 : index
    %255 = vector.load %arg7[%c0_141, %c0_142] : memref<1x128xf32, #tpu.memory_space<vmem>>, vector<1x128xf32>
    %256 = arith.addf %254, %255 : vector<1x128xf32>
    %cst_143 = arith.constant 3.000000e+00 : f32
    %257 = vector.broadcast %cst_143 : f32 to vector<1x128xf32>
    %258 = arith.addf %256, %257 : vector<1x128xf32>
    %cst_144 = arith.constant 0.000000e+00 : f32
    %cst_145 = arith.constant 6.000000e+00 : f32
    %259 = vector.broadcast %cst_144 : f32 to vector<1x128xf32>
    %260 = arith.maximumf %259, %258 : vector<1x128xf32>
    %261 = vector.broadcast %cst_145 : f32 to vector<1x128xf32>
    %262 = arith.minimumf %261, %260 : vector<1x128xf32>
    %cst_146 = arith.constant 0.166666672 : f32
    %263 = vector.broadcast %cst_146 : f32 to vector<1x128xf32>
    %264 = arith.mulf %262, %263 : vector<1x128xf32>
    %265 = vector.shape_cast %264 : vector<1x128xf32> to vector<1x1x128xf32>
    %266 = vector.broadcast %265 : vector<1x1x128xf32> to vector<4x4x128xf32>
    %267 = arith.mulf %237, %266 : vector<4x4x128xf32>
    %268 = arith.truncf %267 : vector<4x4x128xf32> to vector<4x4x128xbf16>
    %c0_147 = arith.constant 0 : index
    %c0_148 = arith.constant 0 : index
    %c0_149 = arith.constant 0 : index
    %c0_150 = arith.constant 0 : index
    %269 = vector.load %arg8[%c0_147, %c0_148, %c0_149, %c0_150] : memref<1x4x4x128xbf16, #tpu.memory_space<vmem>>, vector<1x4x4x128xbf16>
    %270 = vector.shape_cast %269 : vector<1x4x4x128xbf16> to vector<4x4x128xbf16>
    %271 = vector.shape_cast %268 : vector<4x4x128xbf16> to vector<1x4x4x128xbf16>
    tpu.vector_store %arg8[%c0_147, %c0_148, %c0_149, %c0_150], %271 {strides = array<i32>} : memref<1x4x4x128xbf16, #tpu.memory_space<vmem>>, vector<1x4x4x128xbf16>,
    return
  }
  func.func @transform_0(%arg0: i32) -> (i32, i32, i32, i32, i32) {
    %c0_i32 = arith.constant 0 : i32
    %c0_i32_0 = arith.constant 0 : i32
    %c0_i32_1 = arith.constant 0 : i32
    %c0_i32_2 = arith.constant 0 : i32
    %c0_i32_3 = arith.constant 0 : i32
    return %arg0, %c0_i32, %c0_i32_0, %c0_i32_1, %c0_i32_2 : i32, i32, i32, i32, i32
  }
  func.func @transform_1(%arg0: i32) -> (i32, i32, i32) {
    %c0_i32 = arith.constant 0 : i32
    %c0_i32_0 = arith.constant 0 : i32
    %c0_i32_1 = arith.constant 0 : i32
    %c0_i32_2 = arith.constant 0 : i32
    return %c0_i32, %c0_i32_0, %c0_i32_1 : i32, i32, i32
  }
  func.func @transform_2(%arg0: i32) -> (i32, i32) {
    %c0_i32 = arith.constant 0 : i32
    %c0_i32_0 = arith.constant 0 : i32
    %c0_i32_1 = arith.constant 0 : i32
    return %c0_i32, %c0_i32_0 : i32, i32
  }
  func.func @transform_3(%arg0: i32) -> (i32, i32) {
    %c0_i32 = arith.constant 0 : i32
    %c0_i32_0 = arith.constant 0 : i32
    %c0_i32_1 = arith.constant 0 : i32
    return %c0_i32, %c0_i32_0 : i32, i32
  }
  func.func @transform_4(%arg0: i32) -> (i32, i32) {
    %c0_i32 = arith.constant 0 : i32
    %c0_i32_0 = arith.constant 0 : i32
    %c0_i32_1 = arith.constant 0 : i32
    return %c0_i32, %c0_i32_0 : i32, i32
  }
  func.func @transform_5(%arg0: i32) -> (i32, i32) {
    %c0_i32 = arith.constant 0 : i32
    %c0_i32_0 = arith.constant 0 : i32
    %c0_i32_1 = arith.constant 0 : i32
    return %c0_i32, %c0_i32_0 : i32, i32
  }
  func.func @transform_6(%arg0: i32) -> (i32, i32) {
    %c0_i32 = arith.constant 0 : i32
    %c0_i32_0 = arith.constant 0 : i32
    %c0_i32_1 = arith.constant 0 : i32
    return %c0_i32, %c0_i32_0 : i32, i32
  }
  func.func @transform_7(%arg0: i32) -> (i32, i32, i32, i32) {
    %c0_i32 = arith.constant 0 : i32
    %c0_i32_0 = arith.constant 0 : i32
    %c0_i32_1 = arith.constant 0 : i32
    %c0_i32_2 = arith.constant 0 : i32
    return %arg0, %c0_i32, %c0_i32_0, %c0_i32_1 : i32, i32, i32, i32
  }
}

module attributes {stable_mosaic.version = 11 : i64} {
  func.func @kernel(%arg0: i32, %arg1: i32, %arg2: i32, %arg3: memref<1x16x128xbf16, #tpu.memory_space<vmem>>, %arg4: memref<128x128xbf16, #tpu.memory_space<vmem>>, %arg5: memref<1x128xf32, #tpu.memory_space<vmem>>, %arg6: memref<1x16x128xbf16, #tpu.memory_space<vmem>>, %arg7: memref<1x16x128xbf16, #tpu.memory_space<vmem>>) attributes {dimension_semantics = [#tpu.dimension_semantics<parallel>, #tpu.dimension_semantics<parallel>, #tpu.dimension_semantics<parallel>], iteration_bounds = array<i64: 2, 1, 1>, scalar_prefetch = 0 : i64, scratch_operands = 0 : i64, tpu.core_type = #tpu.core_type<tc>, window_params = [{transform_indices = @transform_0, window_bounds = array<i64: 1, 16, 128>}, {transform_indices = @transform_1, window_bounds = array<i64: 128, 128>}, {transform_indices = @transform_2, window_bounds = array<i64: 1, 128>}, {transform_indices = @transform_3, window_bounds = array<i64: 1, 16, 128>}, {transform_indices = @transform_4, window_bounds = array<i64: 1, 16, 128>}]} {
    %c0 = arith.constant 0 : index
    %c0_0 = arith.constant 0 : index
    %c0_1 = arith.constant 0 : index
    %0 = vector.load %arg3[%c0, %c0_0, %c0_1] : memref<1x16x128xbf16, #tpu.memory_space<vmem>>, vector<1x16x128xbf16>
    %1 = vector.shape_cast %0 : vector<1x16x128xbf16> to vector<16x128xbf16>
    %c0_2 = arith.constant 0 : index
    %c0_3 = arith.constant 0 : index
    %2 = vector.load %arg4[%c0_2, %c0_3] : memref<128x128xbf16, #tpu.memory_space<vmem>>, vector<128x128xbf16>
    %cst = arith.constant dense<0.000000e+00> : vector<16x128xf32>
    %3 = tpu.matmul %1, %2, %cst {dimension_numbers = #tpu.dot_dimension_numbers<[1], [0], [0], [1], [0, 0, 1, 1], [], []>} : vector<16x128xbf16>, vector<128x128xbf16>, vector<16x128xf32> -> vector<16x128xf32>
    %c0_4 = arith.constant 0 : index
    %c0_5 = arith.constant 0 : index
    %4 = vector.load %arg5[%c0_4, %c0_5] : memref<1x128xf32, #tpu.memory_space<vmem>>, vector<1x128xf32>
    %5 = vector.broadcast %4 : vector<1x128xf32> to vector<16x128xf32>
    %6 = arith.addf %3, %5 : vector<16x128xf32>
    %c0_6 = arith.constant 0 : index
    %c0_7 = arith.constant 0 : index
    %c0_8 = arith.constant 0 : index
    %7 = vector.load %arg6[%c0_6, %c0_7, %c0_8] : memref<1x16x128xbf16, #tpu.memory_space<vmem>>, vector<1x16x128xbf16>
    %8 = vector.shape_cast %7 : vector<1x16x128xbf16> to vector<16x128xbf16>
    %9 = arith.extf %8 : vector<16x128xbf16> to vector<16x128xf32>
    %10 = arith.addf %6, %9 : vector<16x128xf32>
    %11 = arith.truncf %10 : vector<16x128xf32> to vector<16x128xbf16>
    %c0_9 = arith.constant 0 : index
    %c0_10 = arith.constant 0 : index
    %c0_11 = arith.constant 0 : index
    %12 = vector.load %arg7[%c0_9, %c0_10, %c0_11] : memref<1x16x128xbf16, #tpu.memory_space<vmem>>, vector<1x16x128xbf16>
    %13 = vector.shape_cast %12 : vector<1x16x128xbf16> to vector<16x128xbf16>
    %14 = vector.shape_cast %11 : vector<16x128xbf16> to vector<1x16x128xbf16>
    tpu.vector_store %arg7[%c0_9, %c0_10, %c0_11], %14 {strides = array<i32>} : memref<1x16x128xbf16, #tpu.memory_space<vmem>>, vector<1x16x128xbf16>,
    return
  }
  func.func @transform_0(%arg0: i32, %arg1: i32, %arg2: i32) -> (i32, i32, i32) {
    %c0_i32 = arith.constant 0 : i32
    %c0_i32_0 = arith.constant 0 : i32
    return %arg0, %arg1, %c0_i32 : i32, i32, i32
  }
  func.func @transform_1(%arg0: i32, %arg1: i32, %arg2: i32) -> (i32, i32) {
    %c0_i32 = arith.constant 0 : i32
    %c0_i32_0 = arith.constant 0 : i32
    return %c0_i32, %arg2 : i32, i32
  }
  func.func @transform_2(%arg0: i32, %arg1: i32, %arg2: i32) -> (i32, i32) {
    %c0_i32 = arith.constant 0 : i32
    %c0_i32_0 = arith.constant 0 : i32
    return %c0_i32, %arg2 : i32, i32
  }
  func.func @transform_3(%arg0: i32, %arg1: i32, %arg2: i32) -> (i32, i32, i32) {
    %c0_i32 = arith.constant 0 : i32
    return %arg0, %arg1, %arg2 : i32, i32, i32
  }
  func.func @transform_4(%arg0: i32, %arg1: i32, %arg2: i32) -> (i32, i32, i32) {
    %c0_i32 = arith.constant 0 : i32
    return %arg0, %arg1, %arg2 : i32, i32, i32
  }
}

module attributes {stable_mosaic.version = 11 : i64} {
  func.func @kernel(%arg0: i32, %arg1: i32, %arg2: i32, %arg3: memref<1x16x128xbf16, #tpu.memory_space<vmem>>, %arg4: memref<128x256xbf16, #tpu.memory_space<vmem>>, %arg5: memref<1x256xf32, #tpu.memory_space<vmem>>, %arg6: memref<1x16x256xbf16, #tpu.memory_space<vmem>>) attributes {dimension_semantics = [#tpu.dimension_semantics<parallel>, #tpu.dimension_semantics<parallel>, #tpu.dimension_semantics<parallel>], iteration_bounds = array<i64: 2, 1, 1>, scalar_prefetch = 0 : i64, scratch_operands = 0 : i64, tpu.core_type = #tpu.core_type<tc>, window_params = [{transform_indices = @transform_0, window_bounds = array<i64: 1, 16, 128>}, {transform_indices = @transform_1, window_bounds = array<i64: 128, 256>}, {transform_indices = @transform_2, window_bounds = array<i64: 1, 256>}, {transform_indices = @transform_3, window_bounds = array<i64: 1, 16, 256>}]} {
    %c0 = arith.constant 0 : index
    %c0_0 = arith.constant 0 : index
    %c0_1 = arith.constant 0 : index
    %0 = vector.load %arg3[%c0, %c0_0, %c0_1] : memref<1x16x128xbf16, #tpu.memory_space<vmem>>, vector<1x16x128xbf16>
    %1 = vector.shape_cast %0 : vector<1x16x128xbf16> to vector<16x128xbf16>
    %c0_2 = arith.constant 0 : index
    %c0_3 = arith.constant 0 : index
    %2 = vector.load %arg4[%c0_2, %c0_3] : memref<128x256xbf16, #tpu.memory_space<vmem>>, vector<128x256xbf16>
    %cst = arith.constant dense<0.000000e+00> : vector<16x256xf32>
    %3 = tpu.matmul %1, %2, %cst {dimension_numbers = #tpu.dot_dimension_numbers<[1], [0], [0], [1], [0, 0, 1, 1], [], []>} : vector<16x128xbf16>, vector<128x256xbf16>, vector<16x256xf32> -> vector<16x256xf32>
    %c0_4 = arith.constant 0 : index
    %c0_5 = arith.constant 0 : index
    %4 = vector.load %arg5[%c0_4, %c0_5] : memref<1x256xf32, #tpu.memory_space<vmem>>, vector<1x256xf32>
    %5 = vector.broadcast %4 : vector<1x256xf32> to vector<16x256xf32>
    %6 = arith.addf %3, %5 : vector<16x256xf32>
    %cst_6 = arith.constant 3.000000e+00 : f32
    %7 = vector.broadcast %cst_6 : f32 to vector<16x256xf32>
    %8 = arith.addf %6, %7 : vector<16x256xf32>
    %cst_7 = arith.constant 0.000000e+00 : f32
    %cst_8 = arith.constant 6.000000e+00 : f32
    %9 = vector.broadcast %cst_7 : f32 to vector<16x256xf32>
    %10 = arith.maximumf %9, %8 : vector<16x256xf32>
    %11 = vector.broadcast %cst_8 : f32 to vector<16x256xf32>
    %12 = arith.minimumf %11, %10 : vector<16x256xf32>
    %13 = arith.mulf %6, %12 : vector<16x256xf32>
    %cst_9 = arith.constant 0.166666672 : f32
    %14 = vector.broadcast %cst_9 : f32 to vector<16x256xf32>
    %15 = arith.mulf %13, %14 : vector<16x256xf32>
    %16 = arith.truncf %15 : vector<16x256xf32> to vector<16x256xbf16>
    %c0_10 = arith.constant 0 : index
    %c0_11 = arith.constant 0 : index
    %c0_12 = arith.constant 0 : index
    %17 = vector.load %arg6[%c0_10, %c0_11, %c0_12] : memref<1x16x256xbf16, #tpu.memory_space<vmem>>, vector<1x16x256xbf16>
    %18 = vector.shape_cast %17 : vector<1x16x256xbf16> to vector<16x256xbf16>
    %19 = vector.shape_cast %16 : vector<16x256xbf16> to vector<1x16x256xbf16>
    tpu.vector_store %arg6[%c0_10, %c0_11, %c0_12], %19 {strides = array<i32>} : memref<1x16x256xbf16, #tpu.memory_space<vmem>>, vector<1x16x256xbf16>,
    return
  }
  func.func @transform_0(%arg0: i32, %arg1: i32, %arg2: i32) -> (i32, i32, i32) {
    %c0_i32 = arith.constant 0 : i32
    %c0_i32_0 = arith.constant 0 : i32
    return %arg0, %arg1, %c0_i32 : i32, i32, i32
  }
  func.func @transform_1(%arg0: i32, %arg1: i32, %arg2: i32) -> (i32, i32) {
    %c0_i32 = arith.constant 0 : i32
    %c0_i32_0 = arith.constant 0 : i32
    return %c0_i32, %arg2 : i32, i32
  }
  func.func @transform_2(%arg0: i32, %arg1: i32, %arg2: i32) -> (i32, i32) {
    %c0_i32 = arith.constant 0 : i32
    %c0_i32_0 = arith.constant 0 : i32
    return %c0_i32, %arg2 : i32, i32
  }
  func.func @transform_3(%arg0: i32, %arg1: i32, %arg2: i32) -> (i32, i32, i32) {
    %c0_i32 = arith.constant 0 : i32
    return %arg0, %arg1, %arg2 : i32, i32, i32
  }
}

module attributes {stable_mosaic.version = 11 : i64} {
  func.func @_gap_kernel(%arg0: memref<2x16x256xbf16, #tpu.memory_space<vmem>>, %arg1: memref<1x2x256xbf16, #tpu.memory_space<vmem>>) attributes {dimension_semantics = [], scalar_prefetch = 0 : i64, scratch_operands = 0 : i64, tpu.core_type = #tpu.core_type<tc>} {
    %c0 = arith.constant 0 : index
    %c0_0 = arith.constant 0 : index
    %c0_1 = arith.constant 0 : index
    %0 = vector.load %arg0[%c0, %c0_0, %c0_1] : memref<2x16x256xbf16, #tpu.memory_space<vmem>>, vector<2x16x256xbf16>
    %1 = arith.extf %0 : vector<2x16x256xbf16> to vector<2x16x256xf32>
    %cst = arith.constant dense<0.000000e+00> : vector<2x256xf32>
    %2 = vector.multi_reduction <add>, %1, %cst [1] : vector<2x16x256xf32> to vector<2x256xf32>
    %cst_2 = arith.constant 1.600000e+01 : f32
    %3 = vector.broadcast %cst_2 : f32 to vector<2x256xf32>
    %4 = arith.divf %2, %3 : vector<2x256xf32>
    %5 = arith.truncf %4 : vector<2x256xf32> to vector<2x256xbf16>
    %c0_3 = arith.constant 0 : index
    %c0_4 = arith.constant 0 : index
    %c0_5 = arith.constant 0 : index
    %6 = vector.load %arg1[%c0_3, %c0_4, %c0_5] : memref<1x2x256xbf16, #tpu.memory_space<vmem>>, vector<1x2x256xbf16>
    %7 = vector.shape_cast %6 : vector<1x2x256xbf16> to vector<2x256xbf16>
    %8 = vector.shape_cast %5 : vector<2x256xbf16> to vector<1x2x256xbf16>
    tpu.vector_store %arg1[%c0_3, %c0_4, %c0_5], %8 {strides = array<i32>} : memref<1x2x256xbf16, #tpu.memory_space<vmem>>, vector<1x2x256xbf16>,
    return
  }
}

module attributes {stable_mosaic.version = 11 : i64} {
  func.func @kernel(%arg0: i32, %arg1: i32, %arg2: i32, %arg3: memref<1x2x256xbf16, #tpu.memory_space<vmem>>, %arg4: memref<256x128xbf16, #tpu.memory_space<vmem>>, %arg5: memref<1x128xf32, #tpu.memory_space<vmem>>, %arg6: memref<1x2x128xbf16, #tpu.memory_space<vmem>>) attributes {dimension_semantics = [#tpu.dimension_semantics<parallel>, #tpu.dimension_semantics<parallel>, #tpu.dimension_semantics<parallel>], iteration_bounds = array<i64: 1, 1, 1>, scalar_prefetch = 0 : i64, scratch_operands = 0 : i64, tpu.core_type = #tpu.core_type<tc>, window_params = [{transform_indices = @transform_0, window_bounds = array<i64: 1, 2, 256>}, {transform_indices = @transform_1, window_bounds = array<i64: 256, 128>}, {transform_indices = @transform_2, window_bounds = array<i64: 1, 128>}, {transform_indices = @transform_3, window_bounds = array<i64: 1, 2, 128>}]} {
    %c0 = arith.constant 0 : index
    %c0_0 = arith.constant 0 : index
    %c0_1 = arith.constant 0 : index
    %0 = vector.load %arg3[%c0, %c0_0, %c0_1] : memref<1x2x256xbf16, #tpu.memory_space<vmem>>, vector<1x2x256xbf16>
    %1 = vector.shape_cast %0 : vector<1x2x256xbf16> to vector<2x256xbf16>
    %c0_2 = arith.constant 0 : index
    %c0_3 = arith.constant 0 : index
    %2 = vector.load %arg4[%c0_2, %c0_3] : memref<256x128xbf16, #tpu.memory_space<vmem>>, vector<256x128xbf16>
    %cst = arith.constant dense<0.000000e+00> : vector<2x128xf32>
    %3 = tpu.matmul %1, %2, %cst {dimension_numbers = #tpu.dot_dimension_numbers<[1], [0], [0], [1], [0, 0, 1, 1], [], []>} : vector<2x256xbf16>, vector<256x128xbf16>, vector<2x128xf32> -> vector<2x128xf32>
    %c0_4 = arith.constant 0 : index
    %c0_5 = arith.constant 0 : index
    %4 = vector.load %arg5[%c0_4, %c0_5] : memref<1x128xf32, #tpu.memory_space<vmem>>, vector<1x128xf32>
    %5 = vector.broadcast %4 : vector<1x128xf32> to vector<2x128xf32>
    %6 = arith.addf %3, %5 : vector<2x128xf32>
    %cst_6 = arith.constant 3.000000e+00 : f32
    %7 = vector.broadcast %cst_6 : f32 to vector<2x128xf32>
    %8 = arith.addf %6, %7 : vector<2x128xf32>
    %cst_7 = arith.constant 0.000000e+00 : f32
    %cst_8 = arith.constant 6.000000e+00 : f32
    %9 = vector.broadcast %cst_7 : f32 to vector<2x128xf32>
    %10 = arith.maximumf %9, %8 : vector<2x128xf32>
    %11 = vector.broadcast %cst_8 : f32 to vector<2x128xf32>
    %12 = arith.minimumf %11, %10 : vector<2x128xf32>
    %13 = arith.mulf %6, %12 : vector<2x128xf32>
    %cst_9 = arith.constant 0.166666672 : f32
    %14 = vector.broadcast %cst_9 : f32 to vector<2x128xf32>
    %15 = arith.mulf %13, %14 : vector<2x128xf32>
    %16 = arith.truncf %15 : vector<2x128xf32> to vector<2x128xbf16>
    %c0_10 = arith.constant 0 : index
    %c0_11 = arith.constant 0 : index
    %c0_12 = arith.constant 0 : index
    %17 = vector.load %arg6[%c0_10, %c0_11, %c0_12] : memref<1x2x128xbf16, #tpu.memory_space<vmem>>, vector<1x2x128xbf16>
    %18 = vector.shape_cast %17 : vector<1x2x128xbf16> to vector<2x128xbf16>
    %19 = vector.shape_cast %16 : vector<2x128xbf16> to vector<1x2x128xbf16>
    tpu.vector_store %arg6[%c0_10, %c0_11, %c0_12], %19 {strides = array<i32>} : memref<1x2x128xbf16, #tpu.memory_space<vmem>>, vector<1x2x128xbf16>,
    return
  }
  func.func @transform_0(%arg0: i32, %arg1: i32, %arg2: i32) -> (i32, i32, i32) {
    %c0_i32 = arith.constant 0 : i32
    %c0_i32_0 = arith.constant 0 : i32
    return %arg0, %arg1, %c0_i32 : i32, i32, i32
  }
  func.func @transform_1(%arg0: i32, %arg1: i32, %arg2: i32) -> (i32, i32) {
    %c0_i32 = arith.constant 0 : i32
    %c0_i32_0 = arith.constant 0 : i32
    return %c0_i32, %arg2 : i32, i32
  }
  func.func @transform_2(%arg0: i32, %arg1: i32, %arg2: i32) -> (i32, i32) {
    %c0_i32 = arith.constant 0 : i32
    %c0_i32_0 = arith.constant 0 : i32
    return %c0_i32, %arg2 : i32, i32
  }
  func.func @transform_3(%arg0: i32, %arg1: i32, %arg2: i32) -> (i32, i32, i32) {
    %c0_i32 = arith.constant 0 : i32
    return %arg0, %arg1, %arg2 : i32, i32, i32
  }
}

module attributes {stable_mosaic.version = 11 : i64} {
  func.func @kernel(%arg0: i32, %arg1: i32, %arg2: i32, %arg3: memref<1x2x128xbf16, #tpu.memory_space<vmem>>, %arg4: memref<128x128xbf16, #tpu.memory_space<vmem>>, %arg5: memref<1x128xf32, #tpu.memory_space<vmem>>, %arg6: memref<1x2x128xf32, #tpu.memory_space<vmem>>) attributes {dimension_semantics = [#tpu.dimension_semantics<parallel>, #tpu.dimension_semantics<parallel>, #tpu.dimension_semantics<parallel>], iteration_bounds = array<i64: 1, 1, 1>, scalar_prefetch = 0 : i64, scratch_operands = 0 : i64, tpu.core_type = #tpu.core_type<tc>, window_params = [{transform_indices = @transform_0, window_bounds = array<i64: 1, 2, 128>}, {transform_indices = @transform_1, window_bounds = array<i64: 128, 128>}, {transform_indices = @transform_2, window_bounds = array<i64: 1, 128>}, {transform_indices = @transform_3, window_bounds = array<i64: 1, 2, 128>}]} {
    %c0 = arith.constant 0 : index
    %c0_0 = arith.constant 0 : index
    %c0_1 = arith.constant 0 : index
    %0 = vector.load %arg3[%c0, %c0_0, %c0_1] : memref<1x2x128xbf16, #tpu.memory_space<vmem>>, vector<1x2x128xbf16>
    %1 = vector.shape_cast %0 : vector<1x2x128xbf16> to vector<2x128xbf16>
    %c0_2 = arith.constant 0 : index
    %c0_3 = arith.constant 0 : index
    %2 = vector.load %arg4[%c0_2, %c0_3] : memref<128x128xbf16, #tpu.memory_space<vmem>>, vector<128x128xbf16>
    %cst = arith.constant dense<0.000000e+00> : vector<2x128xf32>
    %3 = tpu.matmul %1, %2, %cst {dimension_numbers = #tpu.dot_dimension_numbers<[1], [0], [0], [1], [0, 0, 1, 1], [], []>} : vector<2x128xbf16>, vector<128x128xbf16>, vector<2x128xf32> -> vector<2x128xf32>
    %c0_4 = arith.constant 0 : index
    %c0_5 = arith.constant 0 : index
    %4 = vector.load %arg5[%c0_4, %c0_5] : memref<1x128xf32, #tpu.memory_space<vmem>>, vector<1x128xf32>
    %5 = vector.broadcast %4 : vector<1x128xf32> to vector<2x128xf32>
    %6 = arith.addf %3, %5 : vector<2x128xf32>
    %c0_6 = arith.constant 0 : index
    %c0_7 = arith.constant 0 : index
    %c0_8 = arith.constant 0 : index
    %7 = vector.load %arg6[%c0_6, %c0_7, %c0_8] : memref<1x2x128xf32, #tpu.memory_space<vmem>>, vector<1x2x128xf32>
    %8 = vector.shape_cast %7 : vector<1x2x128xf32> to vector<2x128xf32>
    %9 = vector.shape_cast %6 : vector<2x128xf32> to vector<1x2x128xf32>
    tpu.vector_store %arg6[%c0_6, %c0_7, %c0_8], %9 {strides = array<i32>} : memref<1x2x128xf32, #tpu.memory_space<vmem>>, vector<1x2x128xf32>,
    return
  }
  func.func @transform_0(%arg0: i32, %arg1: i32, %arg2: i32) -> (i32, i32, i32) {
    %c0_i32 = arith.constant 0 : i32
    %c0_i32_0 = arith.constant 0 : i32
    return %arg0, %arg1, %c0_i32 : i32, i32, i32
  }
  func.func @transform_1(%arg0: i32, %arg1: i32, %arg2: i32) -> (i32, i32) {
    %c0_i32 = arith.constant 0 : i32
    %c0_i32_0 = arith.constant 0 : i32
    return %c0_i32, %arg2 : i32, i32
  }
  func.func @transform_2(%arg0: i32, %arg1: i32, %arg2: i32) -> (i32, i32) {
    %c0_i32 = arith.constant 0 : i32
    %c0_i32_0 = arith.constant 0 : i32
    return %c0_i32, %arg2 : i32, i32
  }
  func.func @transform_3(%arg0: i32, %arg1: i32, %arg2: i32) -> (i32, i32, i32) {
    %c0_i32 = arith.constant 0 : i32
    return %arg0, %arg1, %arg2 : i32, i32, i32
  }
}

</mosaic_0001>

<bundles_post_ra>
// kernel: _lambda_.16
= control target key start
LH: loop header
LB: loop body
LE: loop exit
PB: predicated region body
PF: predicated region fallthrough
CT: control target
= control target key end

     0   :  { %s1443_s12 = smov 0   ;;  %s1445_s13 = smov 0   ;;  %s1604_s0 = inlined_call_operand.vmem [shape: bf16[2,256,128], index: 0, kind: input, shape index: {}]   ;;  %s1605_s1 = inlined_call_operand.vmem [shape: bf16[128,128], index: 1, kind: input, shape index: {}]   ;;  %s1606_s2 = inlined_call_operand.vmem [shape: f32[1,128], index: 2, kind: input, shape index: {}]   ;;  %s1607_s3 = inlined_call_operand.vmem [shape: bf16[2,256,128], index: 3, kind: output, shape index: {}]  }
   0x1   :  { %s1447_s14 = smov 0  }
   0x2 LB: > { %s32_s15 = sadd.s32 1, %s1417_s13  ;;  %p1070_p0 = scmp.ge.s32.totalorder %s1421_s14, 1  ;;  %s1421_s14 = sphi %s1447_s14, %s13_s14   ;;  %s1417_s13 = sphi %s1445_s13, %s1609_s13   ;;  %s1413_s12 = sphi %s1443_s12, %s1608_s12  }
   0x3   : > { %p34_p1 = scmp.ge.s32.totalorder %s32_s15, 2  ;;  %p184_p2 = scmp.lt.s32.totalorder %s1421_s14, 3 }
   0x5   : > { %s1611_s15 = smov (%p34_p1, %s32_s15), 0  ;;  %p185_p3 = pnand %p1070_p0, %p184_p2 }
   0x6   : > { %v1375_v0 = vld [vmem:[%s1605_s1] sm:$0xff] (!%p185_p3)   ;;  %p227_p4 = scmp.lt.s32.totalorder (!%p185_p3), %s1413_s12, 1  ;;  %v1376_v1 = vld [vmem:[%s1605_s1 + $0x8] sm:$0xff] (!%p185_p3)   ;;  %v1377_v2 = vld [vmem:[%s1605_s1 + $0x10] sm:$0xff] (!%p185_p3)  }
   0x7   : > { %188 = sbr.rel (%p185_p3) target bundleno = 310 (0x136), region = 32  ;;  %1287 = vmatprep.subr.bf16.mxu0 (!%p185_p3), %v1375_v0  ;;  %1335 = vmatprep.subr.bf16.mxu1 (!%p185_p3), %v1375_v0  ;;  %v1378_v3 = vld [vmem:[%s1605_s1 + $0x18] sm:$0xff] (!%p185_p3)   ;;  %v1379_v6 = vld [vmem:[%s1605_s1 + $0x20] sm:$0xff] (!%p185_p3)   ;;  %v1380_v7 = vld [vmem:[%s1605_s1 + $0x28] sm:$0xff] (!%p185_p3)  }
   0x8   : > { %1288 = vmatpush3.bf16.msra.mxu0 (!%p185_p3), %v1375_v0  ;;  %1343 = vmatpush3.bf16.msra.mxu1 (!%p185_p3), %v1375_v0  ;;  %v1381_v8 = vld [vmem:[%s1605_s1 + $0x30] sm:$0xff] (!%p185_p3)   ;;  %v1382_v9 = vld [vmem:[%s1605_s1 + $0x38] sm:$0xff] (!%p185_p3)   ;;  %v1514_v24 = vld [vmem:[%s1606_s2] ss:$0 sm:$0xff] (!%p185_p3) }
   0x9   : > { %1289 = vmatprep.subr.bf16.mxu0 (!%p185_p3), %v1376_v1  ;;  %1336 = vmatprep.subr.bf16.mxu1 (!%p185_p3), %v1376_v1 }
   0xc   : > { %1290 = vmatpush3.bf16.msra.mxu0 (!%p185_p3), %v1376_v1  ;;  %1344 = vmatpush3.bf16.msra.mxu1 (!%p185_p3), %v1376_v1 }
   0xd   : > { %1291 = vmatprep.subr.bf16.mxu0 (!%p185_p3), %v1377_v2  ;;  %1337 = vmatprep.subr.bf16.mxu1 (!%p185_p3), %v1377_v2 }
   0xe   : > { %s1613_s12 = smov (!%p227_p4, %s1413_s12), 1 }
   0xf   : > { %s1134_s22 = sshll.u32 %s1613_s12, 7 }
  0x10   : > { %s1478_s25 = scalar_lea.vmem %s1604_s0, %s1134_s22  ;;  %1292 = vmatpush3.bf16.msra.mxu0 %v1377_v2  ;;  %1345 = vmatpush3.bf16.msra.mxu1 %v1377_v2  ;;  %s1531_s17 = scalar_lea.vmem %s1607_s3, %s1134_s22 }
  0x11   : > { %v1383_v4 = vld [vmem:[%s1478_s25] sm:$0xff]   ;;  %1293 = vmatprep.subr.bf16.mxu0 %v1378_v3  ;;  %1338 = vmatprep.subr.bf16.mxu1 %v1378_v3  ;;  %v1385_v10 = vld [vmem:[%s1478_s25 + $0x8] sm:$0xff]   ;;  %v1387_v12 = vld [vmem:[%s1478_s25 + $0x10] sm:$0xff]  }
  0x12   : > { %v1384_v5 = vld [vmem:[%s1478_s25 + $0x40] sm:$0xff]   ;;  %1303 = vmatprep.mubr.bf16.mxu0 %v1383_v4  ;;  %v1386_v11 = vld [vmem:[%s1478_s25 + $0x48] sm:$0xff]   ;;  %v1388_v13 = vld [vmem:[%s1478_s25 + $0x50] sm:$0xff]  }
  0x13   : > { %1319 = vmatprep.mubr.bf16.mxu1 %v1384_v5  ;;  %v1389_v14 = vld [vmem:[%s1478_s25 + $0x18] sm:$0xff]   ;;  %v1391_v16 = vld [vmem:[%s1478_s25 + $0x20] sm:$0xff]   ;;  %v1393_v18 = vld [vmem:[%s1478_s25 + $0x28] sm:$0xff]  }
  0x14   : > { %1294 = vmatpush3.bf16.msra.mxu0 %v1378_v3  ;;  %1346 = vmatpush3.bf16.msra.mxu1 %v1378_v3  ;;  %v1390_v15 = vld [vmem:[%s1478_s25 + $0x58] sm:$0xff]   ;;  %v1392_v17 = vld [vmem:[%s1478_s25 + $0x60] sm:$0xff]   ;;  %v1394_v19 = vld [vmem:[%s1478_s25 + $0x68] sm:$0xff]  }
  0x15   : > { %1295 = vmatprep.subr.bf16.mxu0 %v1379_v6  ;;  %1339 = vmatprep.subr.bf16.mxu1 %v1379_v6  ;;  %v1395_v20 = vld [vmem:[%s1478_s25 + $0x30] sm:$0xff]   ;;  %v1397_v22 = vld [vmem:[%s1478_s25 + $0x38] sm:$0xff]  }
  0x16   : > { %v1396_v21 = vld [vmem:[%s1478_s25 + $0x70] sm:$0xff]   ;;  %v1398_v23 = vld [vmem:[%s1478_s25 + $0x78] sm:$0xff]  }
  0x18   : > { %1296 = vmatpush3.bf16.msra.mxu0 %v1379_v6  ;;  %1347 = vmatpush3.bf16.msra.mxu1 %v1379_v6 }
  0x19   : > { %1297 = vmatprep.subr.bf16.mxu0 %v1380_v7  ;;  %1340 = vmatprep.subr.bf16.mxu1 %v1380_v7 }
  0x1c   : > { %1298 = vmatpush3.bf16.msra.mxu0 %v1380_v7  ;;  %1348 = vmatpush3.bf16.msra.mxu1 %v1380_v7 }
  0x1d   : > { %1299 = vmatprep.subr.bf16.mxu0 %v1381_v8  ;;  %1341 = vmatprep.subr.bf16.mxu1 %v1381_v8 }
  0x20   : > { %1300 = vmatpush3.bf16.msra.mxu0 %v1381_v8  ;;  %1349 = vmatpush3.bf16.msra.mxu1 %v1381_v8 }
  0x21   : > { %1301 = vmatprep.subr.bf16.mxu0 %v1382_v9  ;;  %1342 = vmatprep.subr.bf16.mxu1 %v1382_v9 }
  0x24   : > { %1302 = vmatpush3.bf16.msra.mxu0 %v1382_v9  ;;  %1350 = vmatpush3.bf16.msra.mxu1 %v1382_v9 }
  0x27   : > { %1304 = vmatmul.mubr.bf16.vlgmr.msra.gmra.mrb[0].mxu0 %v1385_v10  ;;  %1320 = vmatmul.mubr.bf16.vlgmr.msra.gmra.mrb[0].mxu1 %v1386_v11 }
  0x28   : > { %1307 = vmatprep.mubr.bf16.mxu0 %v1387_v12  ;;  %1323 = vmatprep.mubr.bf16.mxu1 %v1388_v13 }
  0x2f   : > { %1308 = vmatmul.mubr.bf16.gmra.mrb[4].mxu0 %v1389_v14  ;;  %1324 = vmatmul.mubr.bf16.gmra.mrb[4].mxu1 %v1390_v15 }
  0x30   : > { %1311 = vmatprep.mubr.bf16.mxu0 %v1391_v16  ;;  %1327 = vmatprep.mubr.bf16.mxu1 %v1392_v17 }
  0x37   : > { %1312 = vmatmul.mubr.bf16.gmra.mrb[8].mxu0 %v1393_v18  ;;  %1328 = vmatmul.mubr.bf16.gmra.mrb[8].mxu1 %v1394_v19 }
  0x38   : > { %1315 = vmatprep.mubr.bf16.mxu0 %v1395_v20  ;;  %1331 = vmatprep.mubr.bf16.mxu1 %v1396_v21 }
  0x3f   : > { %1316 = vmatmul.mubr.bf16.gmra.mrb[12].mxu0 %v1397_v22  ;;  %1332 = vmatmul.mubr.bf16.gmra.mrb[12].mxu1 %v1398_v23 }
  0xfa   : > { %v1305_v25 = vpop.f32.mrb[0].mxu0  ;;  %v1321_v26 = vpop.f32.mrb[0].mxu1 }
  0xfb   : > { %v499_v27 = vadd.f32 %v1305_v25, %v1514_v24  ;;  %v563_v28 = vadd.f32 %v1321_v26, %v1514_v24  ;;  %v490_v29 = vpop.f32.mrb[1].mxu0  ;;  %v554_v30 = vpop.f32.mrb[1].mxu1 }
  0xfc   : > { %v491_v31 = vadd.f32 %v1514_v24, %v490_v29  ;;  %v555_v32 = vadd.f32 %v1514_v24, %v554_v30  ;;  %v1306_v33 = vpop.f32.mrb[2].mxu0  ;;  %v1322_v34 = vpop.f32.mrb[2].mxu1 }
  0xfd   : > { %v619_v35 = vadd.f32 3.0, %v499_v27  ;;  %v635_v36 = vadd.f32 3.0, %v563_v28  ;;  %v502_v37 = vadd.f32 %v1306_v33, %v1514_v24  ;;  %v566_v38 = vadd.f32 %v1322_v34, %v1514_v24  ;;  %v493_v39 = vpop.f32.mrb[3].mxu0  ;;  %v557_v40 = vpop.f32.mrb[3].mxu1 }
  0xfe   : > { %v617_v41 = vadd.f32 3.0, %v491_v31  ;;  %v633_v42 = vadd.f32 3.0, %v555_v32  ;;  %v494_v43 = vadd.f32 %v1514_v24, %v493_v39  ;;  %v558_v44 = vadd.f32 %v1514_v24, %v557_v40 }
  0xff   : > { %v651_v45 = vmax.f32 %v619_v35, 0.0  ;;  %v667_v46 = vmax.f32 %v635_v36, 0.0  ;;  %v620_v47 = vadd.f32 3.0, %v502_v37  ;;  %v636_v48 = vadd.f32 3.0, %v566_v38 }
 0x100   : > { %v649_v49 = vmax.f32 %v617_v41, 0.0  ;;  %v665_v50 = vmax.f32 %v633_v42, 0.0  ;;  %v618_v51 = vadd.f32 3.0, %v494_v43  ;;  %v634_v52 = vadd.f32 3.0, %v558_v44 }
 0x101   : > { %v683_v53 = vmin.f32 %v651_v45, 6.0  ;;  %v699_v54 = vmin.f32 %v667_v46, 6.0  ;;  %v652_v55 = vmax.f32 %v620_v47, 0.0  ;;  %v668_v56 = vmax.f32 %v636_v48, 0.0 }
 0x102   : > { %v681_v57 = vmin.f32 %v649_v49, 6.0  ;;  %v697_v58 = vmin.f32 %v665_v50, 6.0  ;;  %v650_v59 = vmax.f32 %v618_v51, 0.0  ;;  %v666_v60 = vmax.f32 %v634_v52, 0.0  ;;  %v1309_v61 = vpop.f32.mrb[4].mxu0  ;;  %v1325_v62 = vpop.f32.mrb[4].mxu1 }
 0x103   : > { %v715_v63 = vmul.f32 %v683_v53, %v499_v27  ;;  %v731_v0 = vmul.f32 %v699_v54, %v563_v28  ;;  %v684_v1 = vmin.f32 %v652_v55, 6.0  ;;  %v700_v2 = vmin.f32 %v668_v56, 6.0  ;;  %v506_v3 = vpop.f32.mrb[5].mxu0  ;;  %v570_v4 = vpop.f32.mrb[5].mxu1 }
 0x104   : > { %v713_v5 = vmul.f32 %v681_v57, %v491_v31  ;;  %v729_v6 = vmul.f32 %v697_v58, %v555_v32  ;;  %v682_v7 = vmin.f32 %v650_v59, 6.0  ;;  %v698_v8 = vmin.f32 %v666_v60, 6.0  ;;  %v1310_v9 = vpop.f32.mrb[6].mxu0  ;;  %v1326_v10 = vpop.f32.mrb[6].mxu1 }
 0x105   : > { %v747_v11 = vmul.f32 0.16666667, %v715_v63  ;;  %v763_v12 = vmul.f32 0.16666667, %v731_v0  ;;  %v716_v13 = vmul.f32 %v684_v1, %v502_v37  ;;  %v732_v14 = vmul.f32 %v700_v2, %v566_v38  ;;  %v509_v15 = vpop.f32.mrb[7].mxu0  ;;  %v573_v16 = vpop.f32.mrb[7].mxu1 }
 0x106   : > { %v745_v17 = vmul.f32 0.16666667, %v713_v5  ;;  %v761_v18 = vmul.f32 0.16666667, %v729_v6  ;;  %v714_v19 = vmul.f32 %v682_v7, %v494_v43  ;;  %v730_v20 = vmul.f32 %v698_v8, %v558_v44 }
 0x107   : > { %v748_v21 = vmul.f32 0.16666667, %v716_v13  ;;  %v764_v22 = vmul.f32 0.16666667, %v732_v14  ;;  %v515_v23 = vadd.f32 %v1309_v61, %v1514_v24  ;;  %v579_v25 = vadd.f32 %v1325_v62, %v1514_v24 }
 0x108   : > { %v746_v26 = vmul.f32 0.16666667, %v714_v19  ;;  %v762_v27 = vmul.f32 0.16666667, %v730_v20  ;;  %v507_v28 = vadd.f32 %v1514_v24, %v506_v3  ;;  %v571_v29 = vadd.f32 %v1514_v24, %v570_v4 }
 0x109   : > { %v1176_v30 = vpack.c.bf16 %v748_v21, %v747_v11  ;;  %v1216_v31 = vpack.c.bf16 %v764_v22, %v763_v12  ;;  %v623_v32 = vadd.f32 3.0, %v515_v23  ;;  %v639_v33 = vadd.f32 3.0, %v579_v25 }
 0x10a   : > { %v1171_v34 = vpack.c.bf16 %v746_v26, %v745_v17  ;;  %v1211_v35 = vpack.c.bf16 %v762_v27, %v761_v18  ;;  %v621_v36 = vadd.f32 3.0, %v507_v28  ;;  %v637_v37 = vadd.f32 3.0, %v571_v29  ;;  %v1313_v38 = vpop.f32.mrb[8].mxu0  ;;  %v1329_v39 = vpop.f32.mrb[8].mxu1 }
 0x10b   : > { %1248 = vst [vmem:[%s1531_s17 + $0x8] sm:$0xff] %v1176_v30   ;;  %1256 = vst [vmem:[%s1531_s17 + $0x48] sm:$0xff] %v1216_v31   ;;  %v655_v40 = vmax.f32 %v623_v32, 0.0  ;;  %v671_v41 = vmax.f32 %v639_v33, 0.0  ;;  %v518_v42 = vadd.f32 %v1310_v9, %v1514_v24  ;;  %v582_v43 = vadd.f32 %v1326_v10, %v1514_v24  ;;  %v522_v44 = vpop.f32.mrb[9].mxu0  ;;  %v586_v45 = vpop.f32.mrb[9].mxu1 }
 0x10c   : > { %1172 = vst [vmem:[%s1531_s17] sm:$0xff] %v1171_v34   ;;  %1255 = vst [vmem:[%s1531_s17 + $0x40] sm:$0xff] %v1211_v35   ;;  %v653_v46 = vmax.f32 %v621_v36, 0.0  ;;  %v669_v47 = vmax.f32 %v637_v37, 0.0  ;;  %v510_v48 = vadd.f32 %v1514_v24, %v509_v15  ;;  %v574_v49 = vadd.f32 %v1514_v24, %v573_v16  ;;  %v1543_v50 = vpop.f32.mrb[10].mxu0  ;;  %v1545_v51 = vpop.f32.mrb[10].mxu1 }
 0x10d   : > { %v687_v52 = vmin.f32 %v655_v40, 6.0  ;;  %v703_v53 = vmin.f32 %v671_v41, 6.0  ;;  %v624_v54 = vadd.f32 3.0, %v518_v42  ;;  %v640_v55 = vadd.f32 3.0, %v582_v43  ;;  %v1547_v56 = vpop.f32.mrb[11].mxu0  ;;  %v1549_v57 = vpop.f32.mrb[11].mxu1 }
 0x10e   : > { %v685_v58 = vmin.f32 %v653_v46, 6.0  ;;  %v701_v59 = vmin.f32 %v669_v47, 6.0  ;;  %v622_v60 = vadd.f32 3.0, %v510_v48  ;;  %v638_v61 = vadd.f32 3.0, %v574_v49 }
 0x10f   : > { %v719_v62 = vmul.f32 %v687_v52, %v515_v23  ;;  %v735_v63 = vmul.f32 %v703_v53, %v579_v25  ;;  %v656_v0 = vmax.f32 %v624_v54, 0.0  ;;  %v672_v1 = vmax.f32 %v640_v55, 0.0 }
 0x110   : > { %v717_v2 = vmul.f32 %v685_v58, %v507_v28  ;;  %v733_v3 = vmul.f32 %v701_v59, %v571_v29  ;;  %v654_v4 = vmax.f32 %v622_v60, 0.0  ;;  %v670_v5 = vmax.f32 %v638_v61, 0.0 }
 0x111   : > { %v751_v6 = vmul.f32 0.16666667, %v719_v62  ;;  %v767_v7 = vmul.f32 0.16666667, %v735_v63  ;;  %v688_v8 = vmin.f32 %v656_v0, 6.0  ;;  %v704_v9 = vmin.f32 %v672_v1, 6.0 }
 0x112   : > { %v749_v10 = vmul.f32 0.16666667, %v717_v2  ;;  %v765_v11 = vmul.f32 0.16666667, %v733_v3  ;;  %v686_v12 = vmin.f32 %v654_v4, 6.0  ;;  %v702_v13 = vmin.f32 %v670_v5, 6.0 }
 0x113   : > { %v720_v14 = vmul.f32 %v688_v8, %v518_v42  ;;  %v736_v15 = vmul.f32 %v704_v9, %v582_v43  ;;  %v531_v16 = vadd.f32 %v1313_v38, %v1514_v24  ;;  %v595_v17 = vadd.f32 %v1329_v39, %v1514_v24  ;;  %v1317_v18 = vpop.f32.mrb[12].mxu0  ;;  %v1333_v19 = vpop.f32.mrb[12].mxu1 }
 0x114   : > { %v718_v20 = vmul.f32 %v686_v12, %v510_v48  ;;  %v734_v21 = vmul.f32 %v702_v13, %v574_v49  ;;  %v523_v22 = vadd.f32 %v1514_v24, %v522_v44  ;;  %v587_v23 = vadd.f32 %v1514_v24, %v586_v45  ;;  %v538_v25 = vpop.f32.mrb[13].mxu0  ;;  %v602_v26 = vpop.f32.mrb[13].mxu1 }
 0x115   : > { %v752_v27 = vmul.f32 0.16666667, %v720_v14  ;;  %v768_v28 = vmul.f32 0.16666667, %v736_v15  ;;  %v627_v29 = vadd.f32 3.0, %v531_v16  ;;  %v643_v30 = vadd.f32 3.0, %v595_v17 }
 0x116   : > { %v750_v31 = vmul.f32 0.16666667, %v718_v20  ;;  %v766_v32 = vmul.f32 0.16666667, %v734_v21  ;;  %v625_v33 = vadd.f32 3.0, %v523_v22  ;;  %v641_v34 = vadd.f32 3.0, %v587_v23 }
 0x117   : > { %v1186_v35 = vpack.c.bf16 %v752_v27, %v751_v6  ;;  %v1226_v36 = vpack.c.bf16 %v768_v28, %v767_v7  ;;  %v659_v37 = vmax.f32 %v627_v29, 0.0  ;;  %v675_v38 = vmax.f32 %v643_v30, 0.0  ;;  %v1555_v39 = vpop.f32.mrb[14].mxu0  ;;  %v1557_v40 = vpop.f32.mrb[14].mxu1 }
 0x118   : > { %v1181_v41 = vpack.c.bf16 %v750_v31, %v749_v10  ;;  %v1221_v42 = vpack.c.bf16 %v766_v32, %v765_v11  ;;  %v657_v43 = vmax.f32 %v625_v33, 0.0  ;;  %v673_v44 = vmax.f32 %v641_v34, 0.0  ;;  %v1559_v45 = vpop.f32.mrb[15].mxu0  ;;  %v1561_v46 = vpop.f32.mrb[15].mxu1 }
 0x119   : > { %1250 = vst [vmem:[%s1531_s17 + $0x18] sm:$0xff] %v1186_v35   ;;  %1258 = vst [vmem:[%s1531_s17 + $0x58] sm:$0xff] %v1226_v36   ;;  %v691_v47 = vmin.f32 %v659_v37, 6.0  ;;  %v707_v48 = vmin.f32 %v675_v38, 6.0  ;;  %v534_v49 = vadd.f32 %v1543_v50, %v1514_v24  ;;  %v598_v52 = vadd.f32 %v1545_v51, %v1514_v24 }
 0x11a   : > { %1249 = vst [vmem:[%s1531_s17 + $0x10] sm:$0xff] %v1181_v41   ;;  %1257 = vst [vmem:[%s1531_s17 + $0x50] sm:$0xff] %v1221_v42   ;;  %v689_v53 = vmin.f32 %v657_v43, 6.0  ;;  %v705_v54 = vmin.f32 %v673_v44, 6.0  ;;  %v526_v55 = vadd.f32 %v1514_v24, %v1547_v56  ;;  %v590_v58 = vadd.f32 %v1514_v24, %v1549_v57 }
 0x11b   : > { %v723_v59 = vmul.f32 %v691_v47, %v531_v16  ;;  %v739_v60 = vmul.f32 %v707_v48, %v595_v17  ;;  %v628_v61 = vadd.f32 3.0, %v534_v49  ;;  %v644_v62 = vadd.f32 3.0, %v598_v52 }
 0x11c   : > { %v721_v63 = vmul.f32 %v689_v53, %v523_v22  ;;  %v626_v0 = vadd.f32 3.0, %v526_v55  ;;  %v642_v50 = vadd.f32 3.0, %v590_v58  ;;  %v737_v2 = vmul.f32 %v705_v54, %v587_v23 }
 0x11d   : > { %v755_v1 = vmul.f32 0.16666667, %v723_v59  ;;  %v660_v51 = vmax.f32 %v628_v61, 0.0  ;;  %v676_v3 = vmax.f32 %v644_v62, 0.0  ;;  %v771_v4 = vmul.f32 0.16666667, %v739_v60 }
 0x11e   : > { %v753_v5 = vmul.f32 0.16666667, %v721_v63  ;;  %v658_v6 = vmax.f32 %v626_v0, 0.0  ;;  %v674_v7 = vmax.f32 %v642_v50, 0.0  ;;  %v547_v9 = vadd.f32 %v1317_v18, %v1514_v24 }
 0x11f   : > { %v692_v8 = vmin.f32 %v660_v51, 6.0  ;;  %v708_v56 = vmin.f32 %v676_v3, 6.0  ;;  %v611_v57 = vadd.f32 %v1333_v19, %v1514_v24  ;;  %v539_v12 = vadd.f32 %v1514_v24, %v538_v25 }
 0x120   : > { %v690_v10 = vmin.f32 %v658_v6, 6.0  ;;  %v706_v11 = vmin.f32 %v674_v7, 6.0  ;;  %v603_v13 = vadd.f32 %v1514_v24, %v602_v26  ;;  %v631_v16 = vadd.f32 3.0, %v547_v9 }
 0x121   : > { %v724_v14 = vmul.f32 %v692_v8, %v534_v49  ;;  %v740_v15 = vmul.f32 %v708_v56, %v598_v52  ;;  %v647_v17 = vadd.f32 3.0, %v611_v57  ;;  %v629_v22 = vadd.f32 3.0, %v539_v12 }
 0x122   : > { %v722_v20 = vmul.f32 %v690_v10, %v526_v55  ;;  %v738_v21 = vmul.f32 %v706_v11, %v590_v58  ;;  %v645_v23 = vadd.f32 3.0, %v603_v13  ;;  %v769_v27 = vmul.f32 0.16666667, %v737_v2 }
 0x123   : > { %v756_v18 = vmul.f32 0.16666667, %v724_v14  ;;  %v772_v19 = vmul.f32 0.16666667, %v740_v15  ;;  %v663_v25 = vmax.f32 %v631_v16, 0.0  ;;  %v679_v30 = vmax.f32 %v647_v17, 0.0 }
 0x124   : > { %v754_v28 = vmul.f32 0.16666667, %v722_v20  ;;  %v770_v29 = vmul.f32 0.16666667, %v738_v21  ;;  %v661_v32 = vmax.f32 %v629_v22, 0.0  ;;  %v677_v35 = vmax.f32 %v645_v23, 0.0 }
 0x125   : > { %v1196_v26 = vpack.c.bf16 %v756_v18, %v755_v1  ;;  %v1236_v31 = vpack.c.bf16 %v772_v19, %v771_v4  ;;  %v550_v36 = vadd.f32 %v1555_v39, %v1514_v24  ;;  %v614_v37 = vadd.f32 %v1557_v40, %v1514_v24 }
 0x126   : > { %v1191_v33 = vpack.c.bf16 %v754_v28, %v753_v5  ;;  %v1231_v34 = vpack.c.bf16 %v770_v29, %v769_v27  ;;  %v695_v38 = vmin.f32 %v663_v25, 6.0  ;;  %v711_v41 = vmin.f32 %v679_v30, 6.0 }
 0x127   : > { %1252 = vst [vmem:[%s1531_s17 + $0x28] sm:$0xff] %v1196_v26   ;;  %1260 = vst [vmem:[%s1531_s17 + $0x68] sm:$0xff] %v1236_v31   ;;  %v542_v42 = vadd.f32 %v1514_v24, %v1559_v45  ;;  %v606_v43 = vadd.f32 %v1514_v24, %v1561_v46  ;;  %v693_v44 = vmin.f32 %v661_v32, 6.0  ;;  %v632_v47 = vadd.f32 3.0, %v550_v36 }
 0x128   : > { %1251 = vst [vmem:[%s1531_s17 + $0x20] sm:$0xff] %v1191_v33   ;;  %1259 = vst [vmem:[%s1531_s17 + $0x60] sm:$0xff] %v1231_v34   ;;  %v648_v48 = vadd.f32 3.0, %v614_v37  ;;  %v709_v49 = vmin.f32 %v677_v35, 6.0  ;;  %v727_v55 = vmul.f32 %v695_v38, %v547_v9  ;;  %v743_v40 = vmul.f32 %v711_v41, %v611_v57 }
 0x129   : > { %v630_v52 = vadd.f32 3.0, %v542_v42  ;;  %v646_v53 = vadd.f32 3.0, %v606_v43  ;;  %v664_v39 = vmax.f32 %v632_v47, 0.0  ;;  %v725_v60 = vmul.f32 %v693_v44, %v539_v12 }
 0x12a   : > { %v680_v54 = vmax.f32 %v648_v48, 0.0  ;;  %v741_v63 = vmul.f32 %v709_v49, %v603_v13  ;;  %v759_v46 = vmul.f32 0.16666667, %v727_v55  ;;  %v775_v1 = vmul.f32 0.16666667, %v743_v40 }
 0x12b   : > { %v662_v58 = vmax.f32 %v630_v52, 0.0  ;;  %v678_v59 = vmax.f32 %v646_v53, 0.0  ;;  %v696_v61 = vmin.f32 %v664_v39, 6.0  ;;  %v757_v3 = vmul.f32 0.16666667, %v725_v60 }
 0x12c   : > { %v712_v62 = vmin.f32 %v680_v54, 6.0  ;;  %v773_v6 = vmul.f32 0.16666667, %v741_v63 }
 0x12d   : > { %v694_v45 = vmin.f32 %v662_v58, 6.0  ;;  %v710_v0 = vmin.f32 %v678_v59, 6.0  ;;  %v728_v50 = vmul.f32 %v696_v61, %v550_v36 }
 0x12e   : > { %v744_v24 = vmul.f32 %v712_v62, %v614_v37 }
 0x12f   : > { %v726_v2 = vmul.f32 %v694_v45, %v542_v42  ;;  %v742_v51 = vmul.f32 %v710_v0, %v606_v43  ;;  %v760_v4 = vmul.f32 0.16666667, %v728_v50 }
 0x130   : > { %v776_v5 = vmul.f32 0.16666667, %v744_v24 }
 0x131   : > { %v758_v7 = vmul.f32 0.16666667, %v726_v2  ;;  %v774_v8 = vmul.f32 0.16666667, %v742_v51  ;;  %v1206_v56 = vpack.c.bf16 %v760_v4, %v759_v46 }
 0x132   : > { %v1246_v9 = vpack.c.bf16 %v776_v5, %v775_v1 }
 0x133   : > { %v1201_v57 = vpack.c.bf16 %v758_v7, %v757_v3  ;;  %v1241_v10 = vpack.c.bf16 %v774_v8, %v773_v6  ;;  %1254 = vst [vmem:[%s1531_s17 + $0x38] sm:$0xff] %v1206_v56  }
 0x134   : > { %1262 = vst [vmem:[%s1531_s17 + $0x78] sm:$0xff] %v1246_v9  }
 0x135   : > { %1253 = vst [vmem:[%s1531_s17 + $0x30] sm:$0xff] %v1201_v57   ;;  %1261 = vst [vmem:[%s1531_s17 + $0x70] sm:$0xff] %v1241_v10  }
 0x136 PF: > { %s13_s14 = sadd.s32 1, %s1421_s14   ;;  %s1608_s12 = smov %s1417_s13 }
 0x137   : > { %p10_p5 = scmp.ge.s32.totalorder %s13_s14, 4   ;;  %s1609_s13 = smov %s1611_s15 }
 0x139   :  { %12 = sbr.rel (!%p10_p5) target bundleno = 2 (0x2), region = 68 }

// kernel: _lambda_.17
= control target key start
LH: loop header
LB: loop body
LE: loop exit
PB: predicated region body
PF: predicated region fallthrough
CT: control target
= control target key end

     0   :  { %s1376_s24 = smov 0   ;;  %s1843_s0 = inlined_call_operand.vmem [shape: bf16[2,9,2,9,256], index: 0, kind: input, shape index: {}]   ;;  %s1844_s1 = inlined_call_operand.vmem [shape: f32[9,1,128], index: 1, kind: input, shape index: {}]   ;;  %s1845_s2 = inlined_call_operand.vmem [shape: f32[1,128], index: 2, kind: input, shape index: {}, may-alias: {2,4,6}]   ;;  %s1846_s3 = inlined_call_operand.vmem [shape: bf16[128,128], index: 3, kind: input, shape index: {}]   ;;  %s1847_s4 = inlined_call_operand.vmem [shape: f32[1,128], index: 4, kind: input, shape index: {}, may-alias: {2,4,6}]   ;;  %s1848_s5 = inlined_call_operand.vmem [shape: bf16[128,128], index: 5, kind: input, shape index: {}]   ;;  %s1849_s6 = inlined_call_operand.vmem [shape: f32[1,128], index: 6, kind: input, shape index: {}, may-alias: {2,4,6}]   ;;  %s1850_s7 = inlined_call_operand.vmem [shape: bf16[2,8,8,128], index: 7, kind: output, shape index: {}]  }
   0x1 LB: > { %s1133_s25 = sadd.s32 4294967295, %s1332_s24   ;;  %p1137_p0 = scmp.ge.s32.totalorder %s1332_s24, 1  ;;  %s1332_s24 = sphi %s1376_s24, %s17_s24  }
   0x2   : > { %p237_p1 = scmp.lt.s32.totalorder %s1332_s24, 3 }
   0x4   : > { %p238_p2 = pnand %p1137_p0, %p237_p1 }
   0x5   : > { %v1310_v0 = vld [vmem:[%s1846_s3] sm:$0xff] (!%p238_p2)   ;;  %v1334_v1 = vmov (!%p238_p2), 0.0   ;;  %v1311_v2 = vld [vmem:[%s1846_s3 + $0x8] sm:$0xff] (!%p238_p2)   ;;  %vm1335_vm0 = vmmov (!%p238_p2), 0   ;;  %p269_p3 = scmp.lt.s32.totalorder (!%p238_p2), %s1133_s25, 1  ;;  %v1312_v3 = vld [vmem:[%s1846_s3 + $0x10] sm:$0xff] (!%p238_p2)  }
   0x6   : > { %241 = sbr.rel (%p238_p2) target bundleno = 578 (0x242), region = 48  ;;  %1259 = vmatprep.subr.bf16.mxu0 (!%p238_p2), %v1334_v1  ;;  %1279 = vmatprep.subr.bf16.mxu1 (!%p238_p2), %v1334_v1  ;;  %v1313_v4 = vld [vmem:[%s1846_s3 + $0x18] sm:$0xff] (!%p238_p2)   ;;  %v1141_v5 = vld [vmem:[%s1844_s1] ss:$0 sm:$0xff] (!%p238_p2)  ;;  %v1142_v25 = vld [vmem:[%s1844_s1 + $0x1] ss:$0 sm:$0xff] (!%p238_p2) }
   0x7   : > { %1260 = vmatpush3.bf16.msra.mxu0 (!%p238_p2), %v1310_v0  ;;  %1275 = vmatprep.mubr.msk.bf16.mxu0 (!%p238_p2), %vm1335_vm0, %v1334_v1  ;;  %v1314_v20 = vld [vmem:[%s1846_s3 + $0x20] sm:$0xff] (!%p238_p2)   ;;  %v1315_v38 = vld [vmem:[%s1846_s3 + $0x28] sm:$0xff] (!%p238_p2)   ;;  %vm411_vm1 = vcmask (!%p238_p2), 1046528   ;;  %v1316_v0 = vld [vmem:[%s1846_s3 + $0x30] sm:$0xff] (!%p238_p2)  }
   0x8   : > { %1261 = vmatprep.subr.bf16.mxu0 (!%p238_p2), %v1334_v1  ;;  %1295 = vmatprep.mubr.msk.bf16.mxu1 (!%p238_p2), %vm1335_vm0, %v1334_v1  ;;  %v1143_v59 = vld [vmem:[%s1844_s1 + $0x2] ss:$0 sm:$0xff] (!%p238_p2) }
   0xb   : > { %1262 = vmatpush3.bf16.msra.mxu0 (!%p238_p2), %v1311_v2 }
   0xc   : > { %1263 = vmatprep.subr.bf16.mxu0 (!%p238_p2), %v1334_v1 }
   0xd   : > { %s1852_s25 = smov (!%p269_p3, %s1133_s25), 1 }
   0xe   : > { %s1299_s9 = smul.u32 288, %s1852_s25  ;;  %s1217_s22 = sshll.u32 %s1852_s25, 5 }
   0xf   : > { %1264 = vmatpush3.bf16.msra.mxu0 %v1312_v3  ;;  %s278_s27 = scalar_lea.vmem %s1850_s7, %s1217_s22 }
  0x10   : > { %s1405_s12 = scalar_lea.vmem %s1843_s0, %s1299_s9  ;;  %1265 = vmatprep.subr.bf16.mxu0 %v1334_v1 }
  0x11   : > { %v1415_v6 = vld [vmem:[%s1405_s12] sm:$0xff]   ;;  %v357_v43 = vld [vmem:[%s1405_s12 + $0x8] sm:$0x1] }
  0x12   : > { %v1418_v7 = vld [vmem:[%s1405_s12 + $0x20] sm:$0xff]   ;;  %v297_v12 = vunpack.c.l.bf16 %v1415_v6  ;;  %v327_v23 = vunpack.c.h.bf16 %v1415_v6  ;;  %v358_v44 = vld [vmem:[%s1405_s12 + $0x28] sm:$0x1]  ;;  %v365_v2 = vunpack.c.l.bf16 %v357_v43 }
  0x13   : > { %v1421_v8 = vld [vmem:[%s1405_s12 + $0x40] sm:$0xff]   ;;  %v298_v13 = vunpack.c.l.bf16 %v1418_v7  ;;  %1266 = vmatpush3.bf16.msra.mxu0 %v1313_v4  ;;  %v328_v24 = vunpack.c.h.bf16 %v1418_v7  ;;  %v359_v49 = vld [vmem:[%s1405_s12 + $0x48] sm:$0x1]  ;;  %v366_v3 = vunpack.c.l.bf16 %v358_v44 }
  0x14   : > { %v1424_v9 = vld [vmem:[%s1405_s12 + $0x60] sm:$0xff]   ;;  %v299_v14 = vunpack.c.l.bf16 %v1421_v8  ;;  %1267 = vmatprep.subr.bf16.mxu0 %v1334_v1  ;;  %v311_v26 = vmul.f32 %v1141_v5, %v297_v12  ;;  %v329_v32 = vunpack.c.h.bf16 %v1421_v8  ;;  %v341_v39 = vmul.f32 %v1142_v25, %v327_v23  ;;  %v360_v50 = vld [vmem:[%s1405_s12 + $0x68] sm:$0x1] }
  0x15   : > { %v1427_v10 = vld [vmem:[%s1405_s12 + $0x80] sm:$0xff]   ;;  %v300_v17 = vunpack.c.l.bf16 %v1424_v9  ;;  %v312_v27 = vmul.f32 %v1141_v5, %v298_v13  ;;  %v330_v33 = vunpack.c.h.bf16 %v1424_v9  ;;  %v342_v40 = vmul.f32 %v1142_v25, %v328_v24  ;;  %v361_v51 = vld [vmem:[%s1405_s12 + $0x88] sm:$0x1] }
  0x16   : > { %v1430_v11 = vld [vmem:[%s1405_s12 + $0xa0] sm:$0xff]   ;;  %v301_v18 = vunpack.c.l.bf16 %v1427_v10  ;;  %v313_v28 = vmul.f32 %v1141_v5, %v299_v14  ;;  %v331_v34 = vunpack.c.h.bf16 %v1427_v10  ;;  %v343_v41 = vmul.f32 %v1142_v25, %v329_v32  ;;  %v362_v56 = vld [vmem:[%s1405_s12 + $0xa8] sm:$0x1] }
  0x17   : > { %v1436_v15 = vld [vmem:[%s1405_s12 + $0xc0] sm:$0xff]   ;;  %v302_v19 = vunpack.c.l.bf16 %v1430_v11  ;;  %v314_v29 = vmul.f32 %v1141_v5, %v300_v17  ;;  %v332_v35 = vunpack.c.h.bf16 %v1430_v11  ;;  %1268 = vmatpush3.bf16.msra.mxu0 %v1314_v20  ;;  %v344_v42 = vmul.f32 %v1142_v25, %v330_v33  ;;  %v363_v57 = vld [vmem:[%s1405_s12 + $0xc8] sm:$0x1] }
  0x18   : > { %v1439_v16 = vld [vmem:[%s1405_s12 + $0xe0] sm:$0xff]   ;;  %v303_v21 = vunpack.c.l.bf16 %v1436_v15  ;;  %v315_v30 = vmul.f32 %v1141_v5, %v301_v18  ;;  %v333_v36 = vunpack.c.h.bf16 %v1436_v15  ;;  %1269 = vmatprep.subr.bf16.mxu0 %v1334_v1  ;;  %v345_v47 = vmul.f32 %v1142_v25, %v331_v34  ;;  %v364_v58 = vld [vmem:[%s1405_s12 + $0xe8] sm:$0x1]  ;;  %v1317_v34 = vld [vmem:[%s1846_s3 + $0x38] sm:$0xff]  }
  0x19   : > { %v304_v22 = vunpack.c.l.bf16 %v1439_v16  ;;  %v316_v31 = vmul.f32 %v1141_v5, %v302_v19  ;;  %v334_v37 = vunpack.c.h.bf16 %v1439_v16  ;;  %v346_v48 = vmul.f32 %v1142_v25, %v332_v35  ;;  %v1318_v11 = vld [vmem:[%s1848_s5] sm:$0xff]  }
  0x1a   : > { %v1481_v45 = vmul.f32 %v1141_v5, %v303_v21  ;;  %v1490_v52 = vmul.f32 %v1142_v25, %v333_v36  ;;  %v1494_v54 = vadd.f32 %v341_v39, %v311_v26  ;;  %v1496_v55 = vadd.f32 %v342_v40, %v312_v27  ;;  %1280 = vmatpush3.bf16.msra.mxu1 %v1318_v11 }
  0x1b   : > { %v1485_v46 = vmul.f32 %v1141_v5, %v304_v22  ;;  %v1492_v53 = vmul.f32 %v1142_v25, %v334_v37  ;;  %v1504_v60 = vadd.f32 %v343_v41, %v313_v28  ;;  %v1506_v61 = vadd.f32 %v344_v42, %v314_v29  ;;  %1270 = vmatpush3.bf16.msra.mxu0 %v1315_v38  ;;  %v1545_v41 = vld [vmem:[%s1405_s12 + $0x10] sm:$0xff]  }
  0x1c   : > { %v1508_v62 = vadd.f32 %v345_v47, %v315_v30  ;;  %v1510_v63 = vadd.f32 %v346_v48, %v316_v31  ;;  %v367_v4 = vunpack.c.l.bf16 %v359_v49  ;;  %v368_v5 = vunpack.c.l.bf16 %v360_v50  ;;  %1271 = vmatprep.subr.bf16.mxu0 %v1334_v1  ;;  %v1550_v48 = vld [vmem:[%s1405_s12 + $0x30] sm:$0xff]   ;;  %1281 = vmatprep.subr.bf16.mxu1 %v1334_v1 }
  0x1d   : > { %v369_v20 = vunpack.c.l.bf16 %v361_v51  ;;  %v370_v23 = vunpack.c.l.bf16 %v362_v56  ;;  %v371_v24 = vunpack.c.l.bf16 %v363_v57  ;;  %v372_v25 = vunpack.c.l.bf16 %v364_v58  ;;  %v1553_v49 = vld [vmem:[%s1405_s12 + $0x50] sm:$0xff]  }
  0x1e   : > { %v379_v26 = vmul.f32 %v1143_v59, %v297_v12  ;;  %v380_v27 = vmul.f32 %v1143_v59, %v365_v2  ;;  %v381_v28 = vmul.f32 %v1143_v59, %v298_v13  ;;  %v382_v29 = vmul.f32 %v1143_v59, %v366_v3  ;;  %v1556_v50 = vld [vmem:[%s1405_s12 + $0x70] sm:$0xff]  }
  0x1f   : > { %v383_v30 = vmul.f32 %v1143_v59, %v299_v14  ;;  %v384_v31 = vmul.f32 %v1143_v59, %v367_v4  ;;  %v385_v32 = vmul.f32 %v1143_v59, %v300_v17  ;;  %v386_v33 = vmul.f32 %v1143_v59, %v368_v5  ;;  %1272 = vmatpush3.bf16.msra.mxu0 %v1316_v0  ;;  %v1564_v0 = vld [vmem:[%s1405_s12 + $0xb0] sm:$0xff]  }
  0x20   : > { %v387_v6 = vmul.f32 %v1143_v59, %v301_v18  ;;  %v388_v12 = vmul.f32 %v1143_v59, %v369_v20  ;;  %v389_v7 = vmul.f32 %v1143_v59, %v302_v19  ;;  %v390_v13 = vmul.f32 %v1143_v59, %v370_v23  ;;  %1273 = vmatprep.subr.bf16.mxu0 %v1334_v1  ;;  %v1319_v19 = vld [vmem:[%s1848_s5 + $0x8] sm:$0xff]   ;;  %v1567_v2 = vld [vmem:[%s1405_s12 + $0xd0] sm:$0xff]  }
  0x21   : > { %v391_v8 = vmul.f32 %v1143_v59, %v303_v21  ;;  %v392_v9 = vmul.f32 %v1143_v59, %v371_v24  ;;  %v393_v14 = vmul.f32 %v1143_v59, %v304_v22  ;;  %v394_v17 = vmul.f32 %v1143_v59, %v372_v25  ;;  %v1561_v59 = vld [vmem:[%s1405_s12 + $0x90] sm:$0xff]   ;;  %1282 = vmatpush3.bf16.msra.mxu1 %v1319_v19 }
  0x22   : > { %v412_v35 = vrot.slane %v379_v26, 1  ;;  %v413_v36 = vrot.slane %v380_v27, 1  ;;  %v415_v10 = vrot.slane %v381_v28, 1  ;;  %v416_v18 = vrot.slane %v382_v29, 1  ;;  %v1570_v3 = vld [vmem:[%s1405_s12 + $0xf0] sm:$0xff]   ;;  %1283 = vmatprep.subr.bf16.mxu1 %v1334_v1 }
  0x23   : > { %v418_v15 = vrot.slane %v383_v30, 1  ;;  %v419_v21 = vrot.slane %v384_v31, 1  ;;  %v421_v16 = vrot.slane %v385_v32, 1  ;;  %v422_v22 = vrot.slane %v386_v33, 1  ;;  %1274 = vmatpush3.bf16.msra.mxu0 %v1317_v34  ;;  %v1320_v24 = vld [vmem:[%s1848_s5 + $0x10] sm:$0xff]  }
  0x24   : > { %v414_v37 = vsel %vm411_vm1, %v412_v35, %v413_v36  ;;  %v417_v38 = vsel %vm411_vm1, %v415_v10, %v416_v18  ;;  %v424_v39 = vrot.slane %v387_v6, 1  ;;  %v425_v40 = vrot.slane %v388_v12, 1  ;;  %v1321_v12 = vld [vmem:[%s1848_s5 + $0x18] sm:$0xff]   ;;  %v1161_v10 = vld [vmem:[%s1844_s1 + $0x4] ss:$0 sm:$0xff] }
  0x25   : > { %v420_v42 = vsel %vm411_vm1, %v418_v15, %v419_v21  ;;  %v423_v43 = vsel %vm411_vm1, %v421_v16, %v422_v22  ;;  %v427_v44 = vrot.slane %v389_v7, 1  ;;  %v428_v47 = vrot.slane %v390_v13, 1  ;;  %1284 = vmatpush3.bf16.msra.mxu1 %v1320_v24 }
  0x26   : > { %v426_v51 = vsel %vm411_vm1, %v424_v39, %v425_v40  ;;  %v430_v56 = vrot.slane %v391_v8, 1  ;;  %v431_v57 = vrot.slane %v392_v9, 1  ;;  %v433_v58 = vrot.slane %v393_v14, 1  ;;  %1285 = vmatprep.subr.bf16.mxu1 %v1334_v1 }
  0x27   : > { %v355_v4 = vadd.f32 %v1490_v52, %v1481_v45  ;;  %v356_v5 = vadd.f32 %v1492_v53, %v1485_v46  ;;  %v429_v20 = vsel %vm411_vm1, %v427_v44, %v428_v47  ;;  %v434_v23 = vrot.slane %v394_v17, 1  ;;  %v1152_v45 = vld [vmem:[%s1844_s1 + $0x3] ss:$0 sm:$0xff] }
  0x28   : > { %v432_v25 = vsel %vm411_vm1, %v430_v56, %v431_v57  ;;  %v444_v26 = vadd.f32 %v414_v37, %v1494_v54  ;;  %v445_v27 = vadd.f32 %v417_v38, %v1496_v55  ;;  %v446_v28 = vadd.f32 %v420_v42, %v1504_v60  ;;  %v1322_v38 = vld [vmem:[%s1848_s5 + $0x20] sm:$0xff]   ;;  %v1162_v57 = vld [vmem:[%s1405_s12 + $0x18] sm:$0x1] }
  0x29   : > { %v435_v46 = vsel %vm411_vm1, %v433_v58, %v434_v23  ;;  %v447_v52 = vadd.f32 %v423_v43, %v1506_v61  ;;  %v448_v53 = vadd.f32 %v426_v51, %v1508_v62  ;;  %v461_v29 = vunpack.c.l.bf16 %v1545_v41  ;;  %1286 = vmatpush3.bf16.msra.mxu1 %v1321_v12  ;;  %v1163_v58 = vld [vmem:[%s1405_s12 + $0x38] sm:$0x1] }
  0x2a   : > { %v449_v54 = vadd.f32 %v429_v20, %v1510_v63  ;;  %v462_v55 = vunpack.c.l.bf16 %v1550_v48  ;;  %v463_v60 = vunpack.c.l.bf16 %v1553_v49  ;;  %v464_v30 = vunpack.c.l.bf16 %v1556_v50  ;;  %1287 = vmatprep.subr.bf16.mxu1 %v1334_v1 }
  0x2b   : > { %v465_v31 = vunpack.c.l.bf16 %v1561_v59  ;;  %v466_v32 = vunpack.c.l.bf16 %v1564_v0  ;;  %v467_v61 = vunpack.c.l.bf16 %v1567_v2  ;;  %v468_v62 = vunpack.c.l.bf16 %v1570_v3 }
  0x2c   : > { %v475_v33 = vmul.f32 %v1152_v45, %v461_v29  ;;  %v476_v63 = vmul.f32 %v1152_v45, %v462_v55  ;;  %v477_v34 = vmul.f32 %v1152_v45, %v463_v60  ;;  %v478_v6 = vmul.f32 %v1152_v45, %v464_v30 }
  0x2d   : > { %v450_v7 = vadd.f32 %v432_v25, %v355_v4  ;;  %v451_v13 = vadd.f32 %v435_v46, %v356_v5  ;;  %v479_v8 = vmul.f32 %v1152_v45, %v465_v31  ;;  %v480_v9 = vmul.f32 %v1152_v45, %v466_v32  ;;  %v1164_v4 = vld [vmem:[%s1405_s12 + $0x58] sm:$0x1]  ;;  %1288 = vmatpush3.bf16.msra.mxu1 %v1322_v38 }
  0x2e   : > { %v481_v14 = vmul.f32 %v1152_v45, %v467_v61  ;;  %v482_v17 = vmul.f32 %v1152_v45, %v468_v62  ;;  %v483_v35 = vadd.f32 %v475_v33, %v444_v26  ;;  %v484_v36 = vadd.f32 %v476_v63, %v445_v27  ;;  %v1165_v25 = vld [vmem:[%s1405_s12 + $0x78] sm:$0x1]  ;;  %v1323_v33 = vld [vmem:[%s1848_s5 + $0x28] sm:$0xff]   ;;  %v1170_v63 = vld [vmem:[%s1844_s1 + $0x5] ss:$0 sm:$0xff]  ;;  %1289 = vmatprep.subr.bf16.mxu1 %v1334_v1 }
  0x2f   : > { %v485_v18 = vadd.f32 %v477_v34, %v446_v28  ;;  %v486_v11 = vadd.f32 %v478_v6, %v447_v52  ;;  %v487_v19 = vadd.f32 %v479_v8, %v448_v53  ;;  %v488_v15 = vadd.f32 %v480_v9, %v449_v54  ;;  %v1166_v26 = vld [vmem:[%s1405_s12 + $0x98] sm:$0x1] }
  0x30   : > { %v499_v21 = vunpack.c.h.bf16 %v1545_v41  ;;  %v500_v16 = vunpack.c.h.bf16 %v1550_v48  ;;  %v501_v22 = vunpack.c.h.bf16 %v1553_v49  ;;  %v502_v37 = vunpack.c.h.bf16 %v1556_v50  ;;  %v1167_v27 = vld [vmem:[%s1405_s12 + $0xb8] sm:$0x1] }
  0x31   : > { %v503_v39 = vunpack.c.h.bf16 %v1561_v59  ;;  %v504_v40 = vunpack.c.h.bf16 %v1564_v0  ;;  %v505_v42 = vunpack.c.h.bf16 %v1567_v2  ;;  %v506_v43 = vunpack.c.h.bf16 %v1570_v3  ;;  %v1168_v53 = vld [vmem:[%s1405_s12 + $0xd8] sm:$0x1]  ;;  %1290 = vmatpush3.bf16.msra.mxu1 %v1323_v33  ;;  %v1701_v33 = vld [vmem:[%s1405_s12 + $0x80] sm:$0xff]  }
  0x32   : > { %v513_v44 = vmul.f32 %v1161_v10, %v499_v21  ;;  %v514_v47 = vmul.f32 %v1161_v10, %v500_v16  ;;  %v515_v51 = vmul.f32 %v1161_v10, %v501_v22  ;;  %v516_v56 = vmul.f32 %v1161_v10, %v502_v37  ;;  %v1169_v54 = vld [vmem:[%s1405_s12 + $0xf8] sm:$0x1]  ;;  %1291 = vmatprep.subr.bf16.mxu1 %v1334_v1 }
  0x33   : > { %v1638_v5 = vadd.f32 %v481_v14, %v450_v7  ;;  %v1640_v20 = vadd.f32 %v482_v17, %v451_v13  ;;  %v517_v23 = vmul.f32 %v1161_v10, %v503_v39  ;;  %v518_v24 = vmul.f32 %v1161_v10, %v504_v40 }
  0x34   : > { %v519_v28 = vmul.f32 %v1161_v10, %v505_v42  ;;  %v520_v45 = vmul.f32 %v1161_v10, %v506_v43  ;;  %v1645_v46 = vadd.f32 %v513_v44, %v483_v35  ;;  %v1647_v52 = vadd.f32 %v514_v47, %v484_v36 }
  0x35   : > { %v1657_v34 = vadd.f32 %v515_v51, %v485_v18  ;;  %v1659_v6 = vadd.f32 %v516_v56, %v486_v11  ;;  %v1661_v12 = vadd.f32 %v517_v23, %v487_v19  ;;  %v1663_v7 = vadd.f32 %v518_v24, %v488_v15  ;;  %v1689_v23 = vld [vmem:[%s1405_s12 + $0x20] sm:$0xff]  }
  0x36   : > { %v537_v13 = vunpack.c.l.bf16 %v1162_v57  ;;  %v538_v8 = vunpack.c.l.bf16 %v1163_v58  ;;  %v539_v9 = vunpack.c.l.bf16 %v1164_v4  ;;  %v540_v14 = vunpack.c.l.bf16 %v1165_v25  ;;  %v1692_v24 = vld [vmem:[%s1405_s12 + $0x40] sm:$0xff]  }
  0x37   : > { %v541_v17 = vunpack.c.l.bf16 %v1166_v26  ;;  %v542_v35 = vunpack.c.l.bf16 %v1167_v27  ;;  %v543_v36 = vunpack.c.l.bf16 %v1168_v53  ;;  %v544_v10 = vunpack.c.l.bf16 %v1169_v54  ;;  %v1698_v54 = vld [vmem:[%s1405_s12 + $0x60] sm:$0xff]  }
  0x38   : > { %v551_v18 = vmul.f32 %v1170_v63, %v461_v29  ;;  %v552_v21 = vmul.f32 %v1170_v63, %v537_v13  ;;  %v553_v11 = vmul.f32 %v1170_v63, %v462_v55  ;;  %v554_v19 = vmul.f32 %v1170_v63, %v538_v8 }
  0x39   : > { %v555_v15 = vmul.f32 %v1170_v63, %v463_v60  ;;  %v556_v16 = vmul.f32 %v1170_v63, %v539_v9  ;;  %v557_v22 = vmul.f32 %v1170_v63, %v464_v30  ;;  %v558_v37 = vmul.f32 %v1170_v63, %v540_v14 }
  0x3a   : > { %v559_v41 = vmul.f32 %v1170_v63, %v465_v31  ;;  %v560_v29 = vmul.f32 %v1170_v63, %v541_v17  ;;  %v561_v48 = vmul.f32 %v1170_v63, %v466_v32  ;;  %v562_v55 = vmul.f32 %v1170_v63, %v542_v35 }
  0x3b   : > { %v563_v38 = vmul.f32 %v1170_v63, %v467_v61  ;;  %v564_v49 = vmul.f32 %v1170_v63, %v543_v36  ;;  %v565_v60 = vmul.f32 %v1170_v63, %v468_v62  ;;  %v566_v50 = vmul.f32 %v1170_v63, %v544_v10  ;;  %v1704_v63 = vld [vmem:[%s1405_s12 + $0xa0] sm:$0xff]  }
  0x3c   : > { %v583_v30 = vrot.slane %v551_v18, 1  ;;  %v584_v39 = vrot.slane %v552_v21, 1  ;;  %v586_v40 = vrot.slane %v553_v11, 1  ;;  %v587_v42 = vrot.slane %v554_v19, 1 }
  0x3d   : > { %v589_v43 = vrot.slane %v555_v15, 1  ;;  %v590_v59 = vrot.slane %v556_v16, 1  ;;  %v592_v31 = vrot.slane %v557_v22, 1  ;;  %v593_v0 = vrot.slane %v558_v37, 1 }
  0x3e   : > { %v585_v32 = vsel %vm411_vm1, %v583_v30, %v584_v39  ;;  %v588_v2 = vsel %vm411_vm1, %v586_v40, %v587_v42  ;;  %v595_v61 = vrot.slane %v559_v41, 1  ;;  %v596_v44 = vrot.slane %v560_v29, 1 }
  0x3f   : > { %v591_v3 = vsel %vm411_vm1, %v589_v43, %v590_v59  ;;  %v594_v62 = vsel %vm411_vm1, %v592_v31, %v593_v0  ;;  %v598_v47 = vrot.slane %v561_v48, 1  ;;  %v599_v51 = vrot.slane %v562_v55, 1 }
  0x40   : > { %v597_v56 = vsel %vm411_vm1, %v595_v61, %v596_v44  ;;  %v601_v57 = vrot.slane %v563_v38, 1  ;;  %v602_v58 = vrot.slane %v564_v49, 1  ;;  %v604_v4 = vrot.slane %v565_v60, 1  ;;  %v1188_v60 = vld [vmem:[%s1844_s1 + $0x7] ss:$0 sm:$0xff] }
  0x41   : > { %v527_v25 = vadd.f32 %v519_v28, %v1638_v5  ;;  %v528_v26 = vadd.f32 %v520_v45, %v1640_v20  ;;  %v600_v27 = vsel %vm411_vm1, %v598_v47, %v599_v51  ;;  %v605_v53 = vrot.slane %v566_v50, 1  ;;  %v1711_v5 = vld [vmem:[%s1405_s12 + $0xc0] sm:$0xff]   ;;  %v1189_v51 = vld [vmem:[%s1405_s12 + $0x28] sm:$0x1] }
  0x42   : > { %v603_v13 = vsel %vm411_vm1, %v601_v57, %v602_v58  ;;  %v615_v8 = vadd.f32 %v585_v32, %v1645_v46  ;;  %v616_v9 = vadd.f32 %v588_v2, %v1647_v52  ;;  %v617_v14 = vadd.f32 %v591_v3, %v1657_v34  ;;  %v1714_v20 = vld [vmem:[%s1405_s12 + $0xe0] sm:$0xff]  }
  0x43   : > { %v1717_v28 = vld [vmem:[%s1405_s12 + $0x100] sm:$0xff]   ;;  %v606_v17 = vsel %vm411_vm1, %v604_v4, %v605_v53  ;;  %v618_v35 = vadd.f32 %v594_v62, %v1659_v6  ;;  %v619_v46 = vadd.f32 %v597_v56, %v1661_v12  ;;  %v632_v52 = vunpack.c.l.bf16 %v1689_v23  ;;  %v1190_v56 = vld [vmem:[%s1405_s12 + $0x48] sm:$0x1] }
  0x44   : > { %v1179_v45 = vld [vmem:[%s1844_s1 + $0x6] ss:$0 sm:$0xff]  ;;  %v620_v34 = vadd.f32 %v600_v27, %v1663_v7  ;;  %v633_v36 = vunpack.c.l.bf16 %v1692_v24  ;;  %v634_v10 = vunpack.c.l.bf16 %v1698_v54  ;;  %v635_v18 = vunpack.c.l.bf16 %v1701_v33  ;;  %v1192_v27 = vld [vmem:[%s1405_s12 + $0x88] sm:$0x1] }
  0x45   : > { %v636_v21 = vunpack.c.l.bf16 %v1704_v63  ;;  %v637_v11 = vunpack.c.l.bf16 %v1711_v5  ;;  %v638_v19 = vunpack.c.l.bf16 %v1714_v20  ;;  %v639_v6 = vunpack.c.l.bf16 %v1717_v28  ;;  %v1193_v53 = vld [vmem:[%s1405_s12 + $0xa8] sm:$0x1] }
  0x46   : > { %v646_v12 = vmul.f32 %v1179_v45, %v632_v52  ;;  %v647_v7 = vmul.f32 %v1179_v45, %v633_v36  ;;  %v648_v15 = vmul.f32 %v1179_v45, %v634_v10  ;;  %v649_v16 = vmul.f32 %v1179_v45, %v635_v18 }
  0x47   : > { %v621_v22 = vadd.f32 %v603_v13, %v527_v25  ;;  %v622_v37 = vadd.f32 %v606_v17, %v528_v26  ;;  %v650_v41 = vmul.f32 %v1179_v45, %v636_v21  ;;  %v651_v29 = vmul.f32 %v1179_v45, %v637_v11  ;;  %v1191_v26 = vld [vmem:[%s1405_s12 + $0x68] sm:$0x1] }
  0x48   : > { %v652_v48 = vmul.f32 %v1179_v45, %v638_v19  ;;  %v653_v55 = vmul.f32 %v1179_v45, %v639_v6  ;;  %v654_v38 = vadd.f32 %v646_v12, %v615_v8  ;;  %v655_v49 = vadd.f32 %v647_v7, %v616_v9  ;;  %v1194_v45 = vld [vmem:[%s1405_s12 + $0xc8] sm:$0x1] }
  0x49   : > { %v656_v50 = vadd.f32 %v648_v15, %v617_v14  ;;  %v657_v30 = vadd.f32 %v649_v16, %v618_v35  ;;  %v658_v39 = vadd.f32 %v650_v41, %v619_v46  ;;  %v659_v40 = vadd.f32 %v651_v29, %v620_v34  ;;  %v1195_v17 = vld [vmem:[%s1405_s12 + $0xe8] sm:$0x1] }
  0x4a   : > { %v670_v42 = vunpack.c.h.bf16 %v1689_v23  ;;  %v671_v43 = vunpack.c.h.bf16 %v1692_v24  ;;  %v672_v59 = vunpack.c.h.bf16 %v1698_v54  ;;  %v673_v31 = vunpack.c.h.bf16 %v1701_v33  ;;  %v1196_v35 = vld [vmem:[%s1405_s12 + $0x108] sm:$0x1] }
  0x4b   : > { %v674_v0 = vunpack.c.h.bf16 %v1704_v63  ;;  %v675_v32 = vunpack.c.h.bf16 %v1711_v5  ;;  %v676_v2 = vunpack.c.h.bf16 %v1714_v20  ;;  %v677_v61 = vunpack.c.h.bf16 %v1717_v28  ;;  %v1197_v46 = vld [vmem:[%s1844_s1 + $0x8] ss:$0 sm:$0xff] }
  0x4c   : > { %v684_v44 = vmul.f32 %v1188_v60, %v670_v42  ;;  %v685_v3 = vmul.f32 %v1188_v60, %v671_v43  ;;  %v686_v62 = vmul.f32 %v1188_v60, %v672_v59  ;;  %v687_v47 = vmul.f32 %v1188_v60, %v673_v31 }
  0x4d   : > { %v1763_v57 = vadd.f32 %v652_v48, %v621_v22  ;;  %v1765_v58 = vadd.f32 %v653_v55, %v622_v37  ;;  %v688_v4 = vmul.f32 %v1188_v60, %v674_v0  ;;  %v689_v25 = vmul.f32 %v1188_v60, %v675_v32 }
  0x4e   : > { %v690_v13 = vmul.f32 %v1188_v60, %v676_v2  ;;  %v1770_v8 = vmul.f32 %v1188_v60, %v677_v61  ;;  %v692_v9 = vadd.f32 %v684_v44, %v654_v38  ;;  %v693_v14 = vadd.f32 %v685_v3, %v655_v49 }
  0x4f   : > { %v694_v34 = vadd.f32 %v686_v62, %v656_v50  ;;  %v695_v12 = vadd.f32 %v687_v47, %v657_v30  ;;  %v696_v7 = vadd.f32 %v688_v4, %v658_v39  ;;  %v697_v15 = vadd.f32 %v689_v25, %v659_v40  ;;  %v1198_v4 = vld [vmem:[%s1845_s2] ss:$0 sm:$0xff] }
  0x50   : > { %v708_v16 = vunpack.c.l.bf16 %v1189_v51  ;;  %v709_v22 = vunpack.c.l.bf16 %v1190_v56  ;;  %v710_v37 = vunpack.c.l.bf16 %v1191_v26  ;;  %v711_v41 = vunpack.c.l.bf16 %v1192_v27 }
  0x51   : > { %v712_v29 = vunpack.c.l.bf16 %v1193_v53  ;;  %v713_v48 = vunpack.c.l.bf16 %v1194_v45  ;;  %v714_v55 = vunpack.c.l.bf16 %v1195_v17  ;;  %v715_v38 = vunpack.c.l.bf16 %v1196_v35 }
  0x52   : > { %v722_v49 = vmul.f32 %v1197_v46, %v632_v52  ;;  %v723_v60 = vmul.f32 %v1197_v46, %v708_v16  ;;  %v724_v42 = vmul.f32 %v1197_v46, %v633_v36  ;;  %v725_v43 = vmul.f32 %v1197_v46, %v709_v22 }
  0x53   : > { %v726_v50 = vmul.f32 %v1197_v46, %v634_v10  ;;  %v727_v30 = vmul.f32 %v1197_v46, %v710_v37  ;;  %v728_v39 = vmul.f32 %v1197_v46, %v635_v18  ;;  %v729_v40 = vmul.f32 %v1197_v46, %v711_v41 }
  0x54   : > { %v730_v59 = vmul.f32 %v1197_v46, %v636_v21  ;;  %v731_v31 = vmul.f32 %v1197_v46, %v712_v29  ;;  %v732_v23 = vmul.f32 %v1197_v46, %v637_v11  ;;  %v733_v52 = vmul.f32 %v1197_v46, %v713_v48 }
  0x55   : > { %v734_v24 = vmul.f32 %v1197_v46, %v638_v19  ;;  %v735_v36 = vmul.f32 %v1197_v46, %v714_v55  ;;  %v736_v54 = vmul.f32 %v1197_v46, %v639_v6  ;;  %v737_v10 = vmul.f32 %v1197_v46, %v715_v38 }
  0x56   : > { %v754_v0 = vrot.slane %v722_v49, 1  ;;  %v755_v33 = vrot.slane %v723_v60, 1  ;;  %v757_v18 = vrot.slane %v724_v42, 1  ;;  %v758_v32 = vrot.slane %v725_v43, 1 }
  0x57   : > { %v760_v2 = vrot.slane %v726_v50, 1  ;;  %v761_v63 = vrot.slane %v727_v30, 1  ;;  %v763_v21 = vrot.slane %v728_v39, 1  ;;  %v764_v61 = vrot.slane %v729_v40, 1 }
  0x58   : > { %v756_v5 = vsel %vm411_vm1, %v754_v0, %v755_v33  ;;  %v759_v11 = vsel %vm411_vm1, %v757_v18, %v758_v32  ;;  %v766_v44 = vrot.slane %v730_v59, 1  ;;  %v767_v20 = vrot.slane %v731_v31, 1 }
  0x59   : > { %v762_v19 = vsel %vm411_vm1, %v760_v2, %v761_v63  ;;  %v765_v28 = vsel %vm411_vm1, %v763_v21, %v764_v61  ;;  %v769_v6 = vrot.slane %v732_v23, 1  ;;  %v770_v3 = vrot.slane %v733_v52, 1  ;;  %v1324_v2 = vld [vmem:[%s1848_s5 + $0x30] sm:$0xff]   ;;  %v1325_v63 = vld [vmem:[%s1848_s5 + $0x38] sm:$0xff]   ;;  %v850_v21 = vld [vmem:[%s1847_s4] sm:$0x1] }
  0x5a   : > { %v768_v62 = vsel %vm411_vm1, %v766_v44, %v767_v20  ;;  %v772_v47 = vrot.slane %v734_v24, 1  ;;  %v773_v51 = vrot.slane %v735_v36, 1  ;;  %v775_v56 = vrot.slane %v736_v54, 1  ;;  %1292 = vmatpush3.bf16.msra.mxu1 %v1324_v2 }
  0x5b   : > { %v771_v25 = vsel %vm411_vm1, %v769_v6, %v770_v3  ;;  %v776_v26 = vrot.slane %v737_v10, 1  ;;  %v786_v27 = vadd.f32 %v756_v5, %v692_v9  ;;  %v787_v53 = vadd.f32 %v759_v11, %v693_v14  ;;  %1293 = vmatprep.subr.bf16.mxu1 %v1334_v1  ;;  %v957_v1 = vld [vmem:[%s1849_s6] sm:$0x1] }
  0x5c   : > { %v698_v45 = vadd.f32 %v690_v13, %v1763_v57  ;;  %v788_v17 = vadd.f32 %v762_v19, %v694_v34  ;;  %v789_v35 = vadd.f32 %v765_v28, %v695_v12  ;;  %v790_v46 = vadd.f32 %v768_v62, %v696_v7 }
  0x5d   : > { %v699_v16 = vadd.f32 %v1770_v8, %v1765_v58  ;;  %v774_v22 = vsel %vm411_vm1, %v772_v47, %v773_v51  ;;  %v1807_v37 = vadd.f32 %v1198_v4, %v786_v27  ;;  %v791_v41 = vadd.f32 %v771_v25, %v697_v15 }
  0x5e   : > { %v1809_v29 = vadd.f32 %v1198_v4, %v787_v53  ;;  %v1811_v48 = vadd.f32 %v1198_v4, %v788_v17  ;;  %v1813_v55 = vadd.f32 %v1198_v4, %v789_v35  ;;  %v777_v9 = vsel %vm411_vm1, %v775_v56, %v776_v26  ;;  %1294 = vmatpush3.bf16.msra.mxu1 %v1325_v63 }
  0x5f   : > { %v809_v57 = vmax.f32 %v1807_v37, 0.0  ;;  %v792_v13 = vadd.f32 %v774_v22, %v698_v45  ;;  %v1817_v14 = vadd.f32 %v1198_v4, %v790_v46  ;;  %v793_v34 = vadd.f32 %v777_v9, %v699_v16 }
  0x60   : > { %v810_v58 = vmax.f32 %v1809_v29, 0.0  ;;  %v811_v8 = vmax.f32 %v1811_v48, 0.0  ;;  %v806_v12 = vadd.f32 %v1198_v4, %v791_v41  ;;  %v812_v7 = vmax.f32 %v1813_v55, 0.0 }
  0x61   : > { %v807_v38 = vadd.f32 %v1198_v4, %v792_v13  ;;  %v813_v49 = vmax.f32 %v1817_v14, 0.0  ;;  %v808_v42 = vadd.f32 %v1198_v4, %v793_v34  ;;  %v1050_v6 = vlaneseq }
  0x62   : > { %v817_v15 = vadd.f32 %v810_v58, %v809_v57  ;;  %v814_v43 = vmax.f32 %v806_v12, 0.0 }
  0x63   : > { %v815_v30 = vmax.f32 %v807_v38, 0.0  ;;  %v816_v40 = vmax.f32 %v808_v42, 0.0  ;;  %v1051_v4 = vshrl.u32 %v1050_v6, 7 }
  0x64   : > { %v818_v60 = vadd.f32 %v817_v15, %v811_v8 }
  0x65   : > { %v1052_v53 = vsub.s32 0, %v1051_v4 }
  0x66   : > { %v819_v50 = vadd.f32 %v818_v60, %v812_v7 }
  0x68   : > { %v820_v39 = vadd.f32 %v819_v50, %v813_v49 }
  0x6a   : > { %v821_v59 = vadd.f32 %v820_v39, %v814_v43 }
  0x6c   : > { %v822_v31 = vadd.f32 %v821_v59, %v815_v30 }
  0x6e   : > { %v823_v23 = vadd.f32 %v822_v31, %v816_v40 }
  0x70   : > { %v825_v52 = vmul.f32 0.125, %v823_v23 }
  0x72   : > { %v826_v24 = vrot.slane %v825_v52, 4 }
  0x74   : > { %v827_v36 = vadd.f32 %v826_v24, %v825_v52 }
  0x76   : > { %v828_v54 = vrot.slane %v827_v36, 2 }
  0x78   : > { %v829_v10 = vadd.f32 %v828_v54, %v827_v36 }
  0x7a   : > { %v830_v0 = vrot.slane %v829_v10, 1 }
  0x7c   : > { %v831_v33 = vadd.f32 %v830_v0, %v829_v10 }
  0x7e   : > { %v832_v18 = vmul.f32 0.125, %v831_v33 }
  0x80   : > { %v833_v32 = vpack.c.bf16 %v832_v18, %v832_v18 }
  0x82   : > { %1276 = vmatmul.mubr.bf16.vlgmr.msra.gmra.mrb[0].mxu0 %v833_v32 }
 0x155   : > { %v933_v61 = vpop.f32.mrb[0].mxu0 }
 0x156   : > { %v934_v5 = vadd.f32 %v933_v61, %v850_v21  ;;  %v1277_v11 = vpop.f32.mrb[1].mxu0 }
 0x157   : > { %v936_v44 = vpop.f32.mrb[2].mxu0 }
 0x158   : > { %v939_v20 = vmax.f32 %v934_v5, 0.0  ;;  %v1278_v19 = vpop.f32.mrb[3].mxu0 }
 0x15a   : > { %v940_v28 = vpack.c.bf16 %v939_v20, %v939_v20 }
 0x15c   : > { %1296 = vmatmul.mubr.bf16.vlgmr.msra.gmra.mrb[0].mxu1 %v940_v28 }
 0x22f   : > { %v1040_v3 = vpop.f32.mrb[0].mxu1 }
 0x230   : > { %v1041_v62 = vadd.f32 %v1040_v3, %v957_v1  ;;  %v1297_v47 = vpop.f32.mrb[1].mxu1 }
 0x231   : > { %v1043_v51 = vpop.f32.mrb[2].mxu1 }
 0x232   : > { %v1046_v56 = vadd.f32 3.0, %v1041_v62  ;;  %v1298_v25 = vpop.f32.mrb[3].mxu1 }
 0x234   : > { %v1047_v26 = vmax.f32 %v1046_v56, 0.0 }
 0x236   : > { %v1048_v27 = vmin.f32 %v1047_v26, 6.0 }
 0x238   : > { %v1049_v45 = vmul.f32 0.16666667, %v1048_v27 }
 0x23a   : > { %v1053_v17 = vrot.slane %v1049_v45, %v1052_v53 }
 0x23c   : > { %v1054_v35 = vmul.f32 %v1053_v17, %v809_v57  ;;  %v1055_v46 = vmul.f32 %v1053_v17, %v810_v58  ;;  %v1056_v16 = vmul.f32 %v1053_v17, %v811_v8  ;;  %v1057_v22 = vmul.f32 %v1053_v17, %v812_v7 }
 0x23d   : > { %v1058_v37 = vmul.f32 %v1053_v17, %v813_v49  ;;  %v1059_v41 = vmul.f32 %v1053_v17, %v814_v43  ;;  %v1060_v29 = vmul.f32 %v1053_v17, %v815_v30  ;;  %v1061_v48 = vmul.f32 %v1053_v17, %v816_v40 }
 0x23e   : > { %v1221_v55 = vpack.c.bf16 %v1055_v46, %v1054_v35  ;;  %v1226_v9 = vpack.c.bf16 %v1057_v22, %v1056_v16 }
 0x23f   : > { %v1231_v13 = vpack.c.bf16 %v1059_v41, %v1058_v37  ;;  %v1236_v14 = vpack.c.bf16 %v1061_v48, %v1060_v29 }
 0x240   : > { %1222 = vst [vmem:[%s278_s27] sm:$0xff] %v1221_v55   ;;  %1238 = vst [vmem:[%s278_s27 + $0x8] sm:$0xff] %v1226_v9  }
 0x241   : > { %1239 = vst [vmem:[%s278_s27 + $0x10] sm:$0xff] %v1231_v13   ;;  %1240 = vst [vmem:[%s278_s27 + $0x18] sm:$0xff] %v1236_v14  }
 0x242 PF: > { %s17_s24 = sadd.s32 1, %s1332_s24  }
 0x243   : > { %p14_p4 = scmp.ge.s32.totalorder %s17_s24, 4  }
 0x245   :  { %16 = sbr.rel (!%p14_p4) target bundleno = 1 (0x1), region = 80 }

// kernel: _lambda_.18
= control target key start
LH: loop header
LB: loop body
LE: loop exit
PB: predicated region body
PF: predicated region fallthrough
CT: control target
= control target key end

     0   :  { %s791_s12 = smov 0   ;;  %s793_s13 = smov 0   ;;  %s864_s0 = inlined_call_operand.vmem [shape: bf16[2,64,128], index: 0, kind: input, shape index: {}]   ;;  %s865_s1 = inlined_call_operand.vmem [shape: bf16[128,128], index: 1, kind: input, shape index: {}]   ;;  %s866_s2 = inlined_call_operand.vmem [shape: f32[1,128], index: 2, kind: input, shape index: {}]   ;;  %s867_s3 = inlined_call_operand.vmem [shape: bf16[2,64,128], index: 3, kind: output, shape index: {}]  }
   0x1   :  { %s795_s14 = smov 0  }
   0x2 LB: > { %s32_s15 = sadd.s32 1, %s765_s13  ;;  %p598_p0 = scmp.ge.s32.totalorder %s769_s14, 1  ;;  %s769_s14 = sphi %s795_s14, %s13_s14   ;;  %s765_s13 = sphi %s793_s13, %s869_s13   ;;  %s761_s12 = sphi %s791_s12, %s868_s12  }
   0x3   : > { %p34_p1 = scmp.ge.s32.totalorder %s32_s15, 2  ;;  %p184_p2 = scmp.lt.s32.totalorder %s769_s14, 3 }
   0x5   : > { %s871_s15 = smov (%p34_p1, %s32_s15), 0  ;;  %p185_p3 = pnand %p598_p0, %p184_p2 }
   0x6   : > { %v735_v0 = vld [vmem:[%s865_s1] sm:$0xff] (!%p185_p3)   ;;  %p227_p4 = scmp.lt.s32.totalorder (!%p185_p3), %s761_s12, 1  ;;  %v736_v1 = vld [vmem:[%s865_s1 + $0x8] sm:$0xff] (!%p185_p3)   ;;  %v737_v2 = vld [vmem:[%s865_s1 + $0x10] sm:$0xff] (!%p185_p3)  }
   0x7   : > { %188 = sbr.rel (%p185_p3) target bundleno = 259 (0x103), region = 32  ;;  %671 = vmatprep.subr.bf16.mxu0 (!%p185_p3), %v735_v0  ;;  %695 = vmatprep.subr.bf16.mxu1 (!%p185_p3), %v735_v0  ;;  %v738_v3 = vld [vmem:[%s865_s1 + $0x18] sm:$0xff] (!%p185_p3)   ;;  %v739_v6 = vld [vmem:[%s865_s1 + $0x20] sm:$0xff] (!%p185_p3)   ;;  %v740_v7 = vld [vmem:[%s865_s1 + $0x28] sm:$0xff] (!%p185_p3)  }
   0x8   : > { %672 = vmatpush3.bf16.msra.mxu0 (!%p185_p3), %v735_v0  ;;  %703 = vmatpush3.bf16.msra.mxu1 (!%p185_p3), %v735_v0  ;;  %v741_v8 = vld [vmem:[%s865_s1 + $0x30] sm:$0xff] (!%p185_p3)   ;;  %v742_v9 = vld [vmem:[%s865_s1 + $0x38] sm:$0xff] (!%p185_p3)   ;;  %v603_v13 = vld [vmem:[%s866_s2] ss:$0 sm:$0xff] (!%p185_p3) }
   0x9   : > { %673 = vmatprep.subr.bf16.mxu0 (!%p185_p3), %v736_v1  ;;  %696 = vmatprep.subr.bf16.mxu1 (!%p185_p3), %v736_v1 }
   0xc   : > { %674 = vmatpush3.bf16.msra.mxu0 (!%p185_p3), %v736_v1  ;;  %704 = vmatpush3.bf16.msra.mxu1 (!%p185_p3), %v736_v1 }
   0xd   : > { %675 = vmatprep.subr.bf16.mxu0 (!%p185_p3), %v737_v2  ;;  %697 = vmatprep.subr.bf16.mxu1 (!%p185_p3), %v737_v2 }
   0xe   : > { %s873_s12 = smov (!%p227_p4, %s761_s12), 1 }
   0xf   : > { %s626_s22 = sshll.u32 %s873_s12, 5 }
  0x10   : > { %s826_s25 = scalar_lea.vmem %s864_s0, %s626_s22  ;;  %676 = vmatpush3.bf16.msra.mxu0 %v737_v2  ;;  %705 = vmatpush3.bf16.msra.mxu1 %v737_v2  ;;  %s254_s17 = scalar_lea.vmem %s867_s3, %s626_s22 }
  0x11   : > { %v743_v4 = vld [vmem:[%s826_s25] sm:$0xff]   ;;  %v744_v5 = vld [vmem:[%s826_s25 + $0x10] sm:$0xff]   ;;  %677 = vmatprep.subr.bf16.mxu0 %v738_v3  ;;  %698 = vmatprep.subr.bf16.mxu1 %v738_v3  ;;  %v745_v10 = vld [vmem:[%s826_s25 + $0x8] sm:$0xff]  }
  0x12   : > { %687 = vmatprep.mubr.bf16.mxu0 %v743_v4  ;;  %691 = vmatprep.mubr.bf16.mxu1 %v744_v5  ;;  %v746_v11 = vld [vmem:[%s826_s25 + $0x18] sm:$0xff]  }
  0x14   : > { %678 = vmatpush3.bf16.msra.mxu0 %v738_v3  ;;  %706 = vmatpush3.bf16.msra.mxu1 %v738_v3 }
  0x15   : > { %679 = vmatprep.subr.bf16.mxu0 %v739_v6  ;;  %699 = vmatprep.subr.bf16.mxu1 %v739_v6 }
  0x18   : > { %680 = vmatpush3.bf16.msra.mxu0 %v739_v6  ;;  %707 = vmatpush3.bf16.msra.mxu1 %v739_v6 }
  0x19   : > { %681 = vmatprep.subr.bf16.mxu0 %v740_v7  ;;  %700 = vmatprep.subr.bf16.mxu1 %v740_v7 }
  0x1c   : > { %682 = vmatpush3.bf16.msra.mxu0 %v740_v7  ;;  %708 = vmatpush3.bf16.msra.mxu1 %v740_v7 }
  0x1d   : > { %683 = vmatprep.subr.bf16.mxu0 %v741_v8  ;;  %701 = vmatprep.subr.bf16.mxu1 %v741_v8 }
  0x20   : > { %684 = vmatpush3.bf16.msra.mxu0 %v741_v8  ;;  %709 = vmatpush3.bf16.msra.mxu1 %v741_v8 }
  0x21   : > { %685 = vmatprep.subr.bf16.mxu0 %v742_v9  ;;  %702 = vmatprep.subr.bf16.mxu1 %v742_v9 }
  0x24   : > { %686 = vmatpush3.bf16.msra.mxu0 %v742_v9  ;;  %710 = vmatpush3.bf16.msra.mxu1 %v742_v9 }
  0x27   : > { %688 = vmatmul.mubr.bf16.vlgmr.msra.gmra.mrb[0].mxu0 %v745_v10  ;;  %692 = vmatmul.mubr.bf16.vlgmr.msra.gmra.mrb[0].mxu1 %v746_v11 }
  0xfa   : > { %v689_v12 = vpop.f32.mrb[0].mxu0  ;;  %v693_v14 = vpop.f32.mrb[0].mxu1 }
  0xfb   : > { %v394_v15 = vpop.f32.mrb[1].mxu0  ;;  %v410_v16 = vpop.f32.mrb[1].mxu1  ;;  %v403_v19 = vadd.f32 %v689_v12, %v603_v13  ;;  %v419_v20 = vadd.f32 %v693_v14, %v603_v13 }
  0xfc   : > { %v690_v17 = vpop.f32.mrb[2].mxu0  ;;  %v694_v18 = vpop.f32.mrb[2].mxu1  ;;  %v395_v25 = vadd.f32 %v603_v13, %v394_v15  ;;  %v411_v26 = vadd.f32 %v603_v13, %v410_v16 }
  0xfd   : > { %v406_v21 = vadd.f32 %v690_v17, %v603_v13  ;;  %v422_v22 = vadd.f32 %v694_v18, %v603_v13  ;;  %v397_v23 = vpop.f32.mrb[3].mxu0  ;;  %v413_v24 = vpop.f32.mrb[3].mxu1 }
  0xfe   : > { %v398_v27 = vadd.f32 %v603_v13, %v397_v23  ;;  %v414_v28 = vadd.f32 %v603_v13, %v413_v24 }
  0xff   : > { %v644_v29 = vpack.c.bf16 %v406_v21, %v403_v19  ;;  %v654_v30 = vpack.c.bf16 %v422_v22, %v419_v20 }
 0x100   : > { %v639_v31 = vpack.c.bf16 %v398_v27, %v395_v25  ;;  %v649_v32 = vpack.c.bf16 %v414_v28, %v411_v26 }
 0x101   : > { %656 = vst [vmem:[%s254_s17 + $0x8] sm:$0xff] %v644_v29   ;;  %658 = vst [vmem:[%s254_s17 + $0x18] sm:$0xff] %v654_v30  }
 0x102   : > { %640 = vst [vmem:[%s254_s17] sm:$0xff] %v639_v31   ;;  %657 = vst [vmem:[%s254_s17 + $0x10] sm:$0xff] %v649_v32  }
 0x103 PF: > { %s13_s14 = sadd.s32 1, %s769_s14   ;;  %s868_s12 = smov %s765_s13 }
 0x104   : > { %p10_p5 = scmp.ge.s32.totalorder %s13_s14, 4   ;;  %s869_s13 = smov %s871_s15 }
 0x106   :  { %12 = sbr.rel (!%p10_p5) target bundleno = 2 (0x2), region = 68 }

// kernel: _lambda_.19
= control target key start
LH: loop header
LB: loop body
LE: loop exit
PB: predicated region body
PF: predicated region fallthrough
CT: control target
= control target key end

     0   :  { %s799_s12 = smov 0   ;;  %s801_s13 = smov 0   ;;  %s872_s0 = inlined_call_operand.vmem [shape: bf16[2,64,128], index: 0, kind: input, shape index: {}]   ;;  %s873_s1 = inlined_call_operand.vmem [shape: bf16[128,128], index: 1, kind: input, shape index: {}]   ;;  %s874_s2 = inlined_call_operand.vmem [shape: f32[1,128], index: 2, kind: input, shape index: {}]   ;;  %s875_s3 = inlined_call_operand.vmem [shape: bf16[2,64,128], index: 3, kind: output, shape index: {}]  }
   0x1   :  { %s803_s14 = smov 0  }
   0x2 LB: > { %s32_s15 = sadd.s32 1, %s773_s13  ;;  %p606_p0 = scmp.ge.s32.totalorder %s777_s14, 1  ;;  %s777_s14 = sphi %s803_s14, %s13_s14   ;;  %s773_s13 = sphi %s801_s13, %s877_s13   ;;  %s769_s12 = sphi %s799_s12, %s876_s12  }
   0x3   : > { %p34_p1 = scmp.ge.s32.totalorder %s32_s15, 2  ;;  %p184_p2 = scmp.lt.s32.totalorder %s777_s14, 3 }
   0x5   : > { %s879_s15 = smov (%p34_p1, %s32_s15), 0  ;;  %p185_p3 = pnand %p606_p0, %p184_p2 }
   0x6   : > { %v743_v0 = vld [vmem:[%s873_s1] sm:$0xff] (!%p185_p3)   ;;  %p227_p4 = scmp.lt.s32.totalorder (!%p185_p3), %s769_s12, 1  ;;  %v744_v1 = vld [vmem:[%s873_s1 + $0x8] sm:$0xff] (!%p185_p3)   ;;  %v745_v2 = vld [vmem:[%s873_s1 + $0x10] sm:$0xff] (!%p185_p3)  }
   0x7   : > { %188 = sbr.rel (%p185_p3) target bundleno = 261 (0x105), region = 32  ;;  %679 = vmatprep.subr.bf16.mxu0 (!%p185_p3), %v743_v0  ;;  %703 = vmatprep.subr.bf16.mxu1 (!%p185_p3), %v743_v0  ;;  %v746_v3 = vld [vmem:[%s873_s1 + $0x18] sm:$0xff] (!%p185_p3)   ;;  %v747_v6 = vld [vmem:[%s873_s1 + $0x20] sm:$0xff] (!%p185_p3)   ;;  %v748_v7 = vld [vmem:[%s873_s1 + $0x28] sm:$0xff] (!%p185_p3)  }
   0x8   : > { %680 = vmatpush3.bf16.msra.mxu0 (!%p185_p3), %v743_v0  ;;  %711 = vmatpush3.bf16.msra.mxu1 (!%p185_p3), %v743_v0  ;;  %v749_v8 = vld [vmem:[%s873_s1 + $0x30] sm:$0xff] (!%p185_p3)   ;;  %v750_v9 = vld [vmem:[%s873_s1 + $0x38] sm:$0xff] (!%p185_p3)   ;;  %v611_v12 = vld [vmem:[%s874_s2] ss:$0 sm:$0xff] (!%p185_p3) }
   0x9   : > { %681 = vmatprep.subr.bf16.mxu0 (!%p185_p3), %v744_v1  ;;  %704 = vmatprep.subr.bf16.mxu1 (!%p185_p3), %v744_v1 }
   0xc   : > { %682 = vmatpush3.bf16.msra.mxu0 (!%p185_p3), %v744_v1  ;;  %712 = vmatpush3.bf16.msra.mxu1 (!%p185_p3), %v744_v1 }
   0xd   : > { %683 = vmatprep.subr.bf16.mxu0 (!%p185_p3), %v745_v2  ;;  %705 = vmatprep.subr.bf16.mxu1 (!%p185_p3), %v745_v2 }
   0xe   : > { %s881_s12 = smov (!%p227_p4, %s769_s12), 1 }
   0xf   : > { %s634_s22 = sshll.u32 %s881_s12, 5 }
  0x10   : > { %s834_s25 = scalar_lea.vmem %s872_s0, %s634_s22  ;;  %684 = vmatpush3.bf16.msra.mxu0 %v745_v2  ;;  %713 = vmatpush3.bf16.msra.mxu1 %v745_v2  ;;  %s254_s17 = scalar_lea.vmem %s875_s3, %s634_s22 }
  0x11   : > { %v751_v4 = vld [vmem:[%s834_s25] sm:$0xff]   ;;  %v752_v5 = vld [vmem:[%s834_s25 + $0x10] sm:$0xff]   ;;  %685 = vmatprep.subr.bf16.mxu0 %v746_v3  ;;  %706 = vmatprep.subr.bf16.mxu1 %v746_v3  ;;  %v753_v10 = vld [vmem:[%s834_s25 + $0x8] sm:$0xff]  }
  0x12   : > { %695 = vmatprep.mubr.bf16.mxu0 %v751_v4  ;;  %699 = vmatprep.mubr.bf16.mxu1 %v752_v5  ;;  %v754_v11 = vld [vmem:[%s834_s25 + $0x18] sm:$0xff]  }
  0x14   : > { %686 = vmatpush3.bf16.msra.mxu0 %v746_v3  ;;  %714 = vmatpush3.bf16.msra.mxu1 %v746_v3 }
  0x15   : > { %687 = vmatprep.subr.bf16.mxu0 %v747_v6  ;;  %707 = vmatprep.subr.bf16.mxu1 %v747_v6 }
  0x18   : > { %688 = vmatpush3.bf16.msra.mxu0 %v747_v6  ;;  %715 = vmatpush3.bf16.msra.mxu1 %v747_v6 }
  0x19   : > { %689 = vmatprep.subr.bf16.mxu0 %v748_v7  ;;  %708 = vmatprep.subr.bf16.mxu1 %v748_v7 }
  0x1c   : > { %690 = vmatpush3.bf16.msra.mxu0 %v748_v7  ;;  %716 = vmatpush3.bf16.msra.mxu1 %v748_v7 }
  0x1d   : > { %691 = vmatprep.subr.bf16.mxu0 %v749_v8  ;;  %709 = vmatprep.subr.bf16.mxu1 %v749_v8 }
  0x20   : > { %692 = vmatpush3.bf16.msra.mxu0 %v749_v8  ;;  %717 = vmatpush3.bf16.msra.mxu1 %v749_v8 }
  0x21   : > { %693 = vmatprep.subr.bf16.mxu0 %v750_v9  ;;  %710 = vmatprep.subr.bf16.mxu1 %v750_v9 }
  0x24   : > { %694 = vmatpush3.bf16.msra.mxu0 %v750_v9  ;;  %718 = vmatpush3.bf16.msra.mxu1 %v750_v9 }
  0x27   : > { %696 = vmatmul.mubr.bf16.vlgmr.msra.gmra.mrb[0].mxu0 %v753_v10  ;;  %700 = vmatmul.mubr.bf16.vlgmr.msra.gmra.mrb[0].mxu1 %v754_v11 }
  0xfa   : > { %v697_v13 = vpop.f32.mrb[0].mxu0  ;;  %v701_v14 = vpop.f32.mrb[0].mxu1 }
  0xfb   : > { %v403_v15 = vadd.f32 %v697_v13, %v611_v12  ;;  %v419_v16 = vadd.f32 %v701_v14, %v611_v12  ;;  %v394_v17 = vpop.f32.mrb[1].mxu0  ;;  %v410_v18 = vpop.f32.mrb[1].mxu1 }
  0xfc   : > { %v395_v19 = vadd.f32 %v611_v12, %v394_v17  ;;  %v411_v20 = vadd.f32 %v611_v12, %v410_v18  ;;  %v698_v21 = vpop.f32.mrb[2].mxu0  ;;  %v702_v22 = vpop.f32.mrb[2].mxu1 }
  0xfd   : > { %v406_v23 = vadd.f32 %v698_v21, %v611_v12  ;;  %v422_v24 = vadd.f32 %v702_v22, %v611_v12  ;;  %v397_v25 = vpop.f32.mrb[3].mxu0  ;;  %v413_v26 = vpop.f32.mrb[3].mxu1  ;;  %v427_v29 = vmax.f32 %v403_v15, 0.0  ;;  %v431_v30 = vmax.f32 %v419_v16, 0.0 }
  0xfe   : > { %v398_v27 = vadd.f32 %v611_v12, %v397_v25  ;;  %v414_v28 = vadd.f32 %v611_v12, %v413_v26  ;;  %v425_v33 = vmax.f32 %v395_v19, 0.0  ;;  %v429_v34 = vmax.f32 %v411_v20, 0.0 }
  0xff   : > { %v428_v31 = vmax.f32 %v406_v23, 0.0  ;;  %v432_v32 = vmax.f32 %v422_v24, 0.0 }
 0x100   : > { %v426_v35 = vmax.f32 %v398_v27, 0.0  ;;  %v430_v36 = vmax.f32 %v414_v28, 0.0 }
 0x101   : > { %v652_v37 = vpack.c.bf16 %v428_v31, %v427_v29  ;;  %v662_v38 = vpack.c.bf16 %v432_v32, %v431_v30 }
 0x102   : > { %v647_v39 = vpack.c.bf16 %v426_v35, %v425_v33  ;;  %v657_v40 = vpack.c.bf16 %v430_v36, %v429_v34 }
 0x103   : > { %664 = vst [vmem:[%s254_s17 + $0x8] sm:$0xff] %v652_v37   ;;  %666 = vst [vmem:[%s254_s17 + $0x18] sm:$0xff] %v662_v38  }
 0x104   : > { %648 = vst [vmem:[%s254_s17] sm:$0xff] %v647_v39   ;;  %665 = vst [vmem:[%s254_s17 + $0x10] sm:$0xff] %v657_v40  }
 0x105 PF: > { %s13_s14 = sadd.s32 1, %s777_s14   ;;  %s876_s12 = smov %s773_s13 }
 0x106   : > { %p10_p5 = scmp.ge.s32.totalorder %s13_s14, 4   ;;  %s877_s13 = smov %s879_s15 }
 0x108   :  { %12 = sbr.rel (!%p10_p5) target bundleno = 2 (0x2), region = 68 }

// kernel: _lambda_.21
= control target key start
LH: loop header
LB: loop body
LE: loop exit
PB: predicated region body
PF: predicated region fallthrough
CT: control target
= control target key end

     0   :  { %s658_s12 = smov 0   ;;  %s660_s13 = smov 0   ;;  %s721_s0 = inlined_call_operand.vmem [shape: bf16[2,16,128], index: 0, kind: input, shape index: {}]   ;;  %s722_s1 = inlined_call_operand.vmem [shape: bf16[128,128], index: 1, kind: input, shape index: {}]   ;;  %s723_s2 = inlined_call_operand.vmem [shape: f32[1,128], index: 2, kind: input, shape index: {}]   ;;  %s724_s3 = inlined_call_operand.vmem [shape: bf16[2,16,128], index: 3, kind: output, shape index: {}]  }
   0x1   :  { %s662_s14 = smov 0  }
   0x2 LB: > { %s32_s15 = sadd.s32 1, %s630_s13  ;;  %p520_p0 = scmp.ge.s32.totalorder %s634_s14, 1  ;;  %s634_s14 = sphi %s662_s14, %s13_s14   ;;  %s630_s13 = sphi %s660_s13, %s726_s13   ;;  %s626_s12 = sphi %s658_s12, %s725_s12  }
   0x3   : > { %p34_p1 = scmp.ge.s32.totalorder %s32_s15, 2  ;;  %p184_p2 = scmp.lt.s32.totalorder %s634_s14, 3 }
   0x5   : > { %s728_s15 = smov (%p34_p1, %s32_s15), 0  ;;  %p185_p3 = pnand %p520_p0, %p184_p2 }
   0x6   : > { %v603_v0 = vld [vmem:[%s722_s1] sm:$0xff] (!%p185_p3)   ;;  %v636_v1 = vmov (!%p185_p3), 0.0   ;;  %v604_v2 = vld [vmem:[%s722_s1 + $0x8] sm:$0xff] (!%p185_p3)   ;;  %vm637_vm0 = vmmov (!%p185_p3), 0   ;;  %p227_p4 = scmp.lt.s32.totalorder (!%p185_p3), %s626_s12, 1  ;;  %v605_v3 = vld [vmem:[%s722_s1 + $0x10] sm:$0xff] (!%p185_p3)  }
   0x7   : > { %188 = sbr.rel (%p185_p3) target bundleno = 258 (0x102), region = 32  ;;  %557 = vmatprep.subr.bf16.mxu0 (!%p185_p3), %v636_v1  ;;  %573 = vmatprep.mubr.msk.bf16.mxu0 (!%p185_p3), %vm637_vm0, %v636_v1  ;;  %v606_v4 = vld [vmem:[%s722_s1 + $0x18] sm:$0xff] (!%p185_p3)   ;;  %v607_v5 = vld [vmem:[%s722_s1 + $0x20] sm:$0xff] (!%p185_p3)   ;;  %v608_v6 = vld [vmem:[%s722_s1 + $0x28] sm:$0xff] (!%p185_p3)  }
   0x8   : > { %558 = vmatpush3.bf16.msra.mxu0 (!%p185_p3), %v603_v0  ;;  %v609_v7 = vld [vmem:[%s722_s1 + $0x30] sm:$0xff] (!%p185_p3)   ;;  %v610_v8 = vld [vmem:[%s722_s1 + $0x38] sm:$0xff] (!%p185_p3)   ;;  %v525_v10 = vld [vmem:[%s723_s2] ss:$0 sm:$0xff] (!%p185_p3) }
   0x9   : > { %559 = vmatprep.subr.bf16.mxu0 (!%p185_p3), %v636_v1 }
   0xc   : > { %560 = vmatpush3.bf16.msra.mxu0 (!%p185_p3), %v604_v2 }
   0xd   : > { %561 = vmatprep.subr.bf16.mxu0 (!%p185_p3), %v636_v1 }
   0xe   : > { %s730_s12 = smov (!%p227_p4, %s626_s12), 1 }
   0xf   : > { %s539_s22 = sshll.u32 %s730_s12, 3 }
  0x10   : > { %s234_s25 = scalar_lea.vmem %s721_s0, %s539_s22  ;;  %562 = vmatpush3.bf16.msra.mxu0 %v605_v3  ;;  %s254_s16 = scalar_lea.vmem %s724_s3, %s539_s22 }
  0x11   : > { %563 = vmatprep.subr.bf16.mxu0 %v636_v1  ;;  %v611_v9 = vld [vmem:[%s234_s25] sm:$0xff]  }
  0x14   : > { %564 = vmatpush3.bf16.msra.mxu0 %v606_v4 }
  0x15   : > { %565 = vmatprep.subr.bf16.mxu0 %v636_v1 }
  0x18   : > { %566 = vmatpush3.bf16.msra.mxu0 %v607_v5 }
  0x19   : > { %567 = vmatprep.subr.bf16.mxu0 %v636_v1 }
  0x1c   : > { %568 = vmatpush3.bf16.msra.mxu0 %v608_v6 }
  0x1d   : > { %569 = vmatprep.subr.bf16.mxu0 %v636_v1 }
  0x20   : > { %570 = vmatpush3.bf16.msra.mxu0 %v609_v7 }
  0x21   : > { %571 = vmatprep.subr.bf16.mxu0 %v636_v1 }
  0x24   : > { %572 = vmatpush3.bf16.msra.mxu0 %v610_v8 }
  0x27   : > { %574 = vmatmul.mubr.bf16.vlgmr.msra.gmra.mrb[0].mxu0 %v611_v9 }
  0xfa   : > { %v370_v11 = vpop.f32.mrb[0].mxu0 }
  0xfb   : > { %v575_v12 = vpop.f32.mrb[1].mxu0  ;;  %v371_v14 = vadd.f32 %v525_v10, %v370_v11 }
  0xfc   : > { %v373_v13 = vpop.f32.mrb[2].mxu0 }
  0xfd   : > { %v374_v15 = vadd.f32 %v525_v10, %v373_v13  ;;  %v576_v16 = vpop.f32.mrb[3].mxu0 }
  0xff   : > { %v546_v17 = vpack.c.bf16 %v374_v15, %v371_v14 }
 0x101   : > { %547 = vst [vmem:[%s254_s16] sm:$0xff] %v546_v17  }
 0x102 PF: > { %s13_s14 = sadd.s32 1, %s634_s14   ;;  %s725_s12 = smov %s630_s13 }
 0x103   : > { %p10_p5 = scmp.ge.s32.totalorder %s13_s14, 4   ;;  %s726_s13 = smov %s728_s15 }
 0x105   :  { %12 = sbr.rel (!%p10_p5) target bundleno = 2 (0x2), region = 68 }

// kernel: _lambda_.20
= control target key start
LH: loop header
LB: loop body
LE: loop exit
PB: predicated region body
PF: predicated region fallthrough
CT: control target
= control target key end

     0   :  { %s572_s12 = smov 0   ;;  %s730_s0 = inlined_call_operand.vmem [shape: bf16[2,5,2,5,256], index: 0, kind: input, shape index: {}]   ;;  %s731_s1 = inlined_call_operand.vmem [shape: f32[9,1,128], index: 1, kind: input, shape index: {}]   ;;  %s732_s2 = inlined_call_operand.vmem [shape: f32[1,128], index: 2, kind: input, shape index: {}]   ;;  %s733_s3 = inlined_call_operand.vmem [shape: bf16[2,4,4,128], index: 3, kind: output, shape index: {}]  }
   0x1 LB: > { %s490_s13 = sadd.s32 4294967295, %s550_s12   ;;  %p494_p0 = scmp.ge.s32.totalorder %s550_s12, 1  ;;  %s550_s12 = sphi %s572_s12, %s13_s12  }
   0x2   : > { %p137_p1 = scmp.lt.s32.totalorder %s550_s12, 3 }
   0x4   : > { %p138_p2 = pnand %p494_p0, %p137_p1 }
   0x5   : > { %p161_p3 = scmp.lt.s32.totalorder (!%p138_p2), %s490_s13, 1  ;;  %v586_v0 = vld [vmem:[%s731_s1] ss:$0 sm:$0xff] (!%p138_p2)  ;;  %v596_v1 = vld [vmem:[%s731_s1 + $0x1] ss:$0 sm:$0xff] (!%p138_p2) }
   0x6   : > { %141 = sbr.rel (%p138_p2) target bundleno = 65 (0x41), region = 32  ;;  %v601_v2 = vld [vmem:[%s731_s1 + $0x2] ss:$0 sm:$0xff] (!%p138_p2)  ;;  %v606_v3 = vld [vmem:[%s731_s1 + $0x3] ss:$0 sm:$0xff] (!%p138_p2) }
   0x7   : > { %v614_v7 = vld [vmem:[%s731_s1 + $0x4] ss:$0 sm:$0xff] (!%p138_p2)  ;;  %v622_v14 = vld [vmem:[%s731_s1 + $0x5] ss:$0 sm:$0xff] (!%p138_p2)  ;;  %v635_v26 = vld [vmem:[%s731_s1 + $0x8] ss:$0 sm:$0xff] (!%p138_p2) }
   0x8   : > { %v646_v37 = vld [vmem:[%s731_s1 + $0x6] ss:$0 sm:$0xff] (!%p138_p2)  ;;  %v652_v42 = vld [vmem:[%s731_s1 + $0x7] ss:$0 sm:$0xff] (!%p138_p2) }
   0xd   : > { %s735_s13 = smov (!%p161_p3, %s490_s13), 1 }
   0xe   : > { %s535_s14 = smul.u32 80, %s735_s13  ;;  %s534_s11 = sshll.u32 %s735_s13, 3 }
   0xf   : > { %s706_s15 = scalar_lea.vmem %s733_s3, %s534_s11 }
  0x10   : > { %s591_s19 = scalar_lea.vmem %s730_s0, %s535_s14 }
  0x11   : > { %v180_v4 = vld [vmem:[%s591_s19] sm:$0x3]  ;;  %v198_v5 = vld [vmem:[%s591_s19 + $0x4] sm:$0x3]  ;;  %v501_v11 = vld [vmem:[%s591_s19 + $0x8] sm:$0x3] }
  0x12   : > { %v220_v6 = vld [vmem:[%s591_s19] sm:$0x7]  ;;  %v184_v8 = vunpack.c.l.bf16 %v180_v4  ;;  %v202_v9 = vunpack.c.l.bf16 %v198_v5  ;;  %v506_v12 = vld [vmem:[%s591_s19 + $0xc] sm:$0x3]  ;;  %v511_v13 = vld [vmem:[%s591_s19 + $0x8] sm:$0x7]  ;;  %v259_v15 = vunpack.c.l.bf16 %v501_v11 }
  0x13   : > { %v224_v10 = vunpack.c.l.bf16 %v220_v6  ;;  %v281_v16 = vunpack.c.l.bf16 %v506_v12  ;;  %v303_v17 = vunpack.c.l.bf16 %v511_v13  ;;  %v516_v18 = vld [vmem:[%s591_s19 + $0x10] sm:$0x3]  ;;  %v521_v23 = vld [vmem:[%s591_s19 + $0x14] sm:$0x3]  ;;  %v502_v30 = vld [vmem:[%s591_s19 + $0x18] sm:$0x3] }
  0x14   : > { %v526_v19 = vld [vmem:[%s591_s19 + $0x10] sm:$0x7]  ;;  %v194_v20 = vmul.f32 %v586_v0, %v184_v8  ;;  %v212_v21 = vmul.f32 %v596_v1, %v202_v9  ;;  %v199_v25 = vld [vmem:[%s591_s19 + $0x14] sm:$0x3]  ;;  %v269_v27 = vmul.f32 %v606_v3, %v259_v15  ;;  %v338_v28 = vunpack.c.l.bf16 %v516_v18  ;;  %v507_v35 = vld [vmem:[%s591_s19 + $0x1c] sm:$0x3] }
  0x15   : > { %v234_v22 = vmul.f32 %v601_v2, %v224_v10  ;;  %v181_v24 = vld [vmem:[%s591_s19 + $0x10] sm:$0x3]  ;;  %v313_v33 = vmul.f32 %v622_v14, %v303_v17  ;;  %v382_v34 = vunpack.c.l.bf16 %v526_v19  ;;  %v512_v36 = vld [vmem:[%s591_s19 + $0x18] sm:$0x7]  ;;  %v291_v38 = vmul.f32 %v614_v7, %v281_v16  ;;  %v517_v51 = vld [vmem:[%s591_s19 + $0x20] sm:$0x3] }
  0x16   : > { %v221_v29 = vld [vmem:[%s591_s19 + $0x10] sm:$0x7]  ;;  %v216_v31 = vadd.f32 %v212_v21, %v194_v20  ;;  %v360_v39 = vunpack.c.l.bf16 %v521_v23  ;;  %v185_v40 = vunpack.c.l.bf16 %v181_v24  ;;  %v203_v41 = vunpack.c.l.bf16 %v199_v25  ;;  %v527_v52 = vld [vmem:[%s591_s19 + $0x20] sm:$0x7]  ;;  %v200_v58 = vld [vmem:[%s591_s19 + $0x24] sm:$0x3] }
  0x17   : > { %v242_v32 = vrot.slane %v234_v22, 1  ;;  %v655_v44 = vmul.f32 %v635_v26, %v382_v34  ;;  %v225_v45 = vunpack.c.l.bf16 %v221_v29  ;;  %v260_v46 = vunpack.c.l.bf16 %v502_v30  ;;  %v182_v57 = vld [vmem:[%s591_s19 + $0x20] sm:$0x3]  ;;  %v522_v63 = vld [vmem:[%s591_s19 + $0x24] sm:$0x3] }
  0x18   : > { %v195_v47 = vmul.f32 %v586_v0, %v185_v40  ;;  %v213_v48 = vmul.f32 %v596_v1, %v203_v41  ;;  %v282_v49 = vunpack.c.l.bf16 %v507_v35  ;;  %v304_v50 = vunpack.c.l.bf16 %v512_v36  ;;  %v222_v9 = vld [vmem:[%s591_s19 + $0x20] sm:$0x7]  ;;  %v503_v10 = vld [vmem:[%s591_s19 + $0x28] sm:$0x3]  ;;  %v508_v16 = vld [vmem:[%s591_s19 + $0x2c] sm:$0x3] }
  0x19   : > { %v250_v43 = vadd.f32 %v242_v32, %v216_v31  ;;  %v321_v54 = vrot.slane %v313_v33, 1  ;;  %v348_v55 = vmul.f32 %v646_v37, %v338_v28  ;;  %v235_v56 = vmul.f32 %v601_v2, %v225_v45  ;;  %v513_v21 = vld [vmem:[%s591_s19 + $0x28] sm:$0x7]  ;;  %v528_v31 = vld [vmem:[%s591_s19 + $0x30] sm:$0x7] }
  0x1a   : > { %v370_v59 = vmul.f32 %v652_v42, %v360_v39  ;;  %v400_v60 = vrot.slane %v655_v44, 1  ;;  %v217_v61 = vadd.f32 %v213_v48, %v195_v47  ;;  %v270_v62 = vmul.f32 %v606_v3, %v260_v46  ;;  %v183_v36 = vld [vmem:[%s591_s19 + $0x30] sm:$0x3]  ;;  %v523_v44 = vld [vmem:[%s591_s19 + $0x34] sm:$0x3] }
  0x1b   : > { %v273_v53 = vadd.f32 %v269_v27, %v250_v43  ;;  %v243_v5 = vrot.slane %v235_v56, 1  ;;  %v314_v6 = vmul.f32 %v622_v14, %v304_v50  ;;  %v383_v8 = vunpack.c.l.bf16 %v527_v52  ;;  %v518_v43 = vld [vmem:[%s591_s19 + $0x30] sm:$0x3]  ;;  %v688_v45 = vld [vmem:[%s732_s2] ss:$0 sm:$0xff] }
  0x1c   : > { %v292_v11 = vmul.f32 %v614_v7, %v282_v49  ;;  %v339_v12 = vunpack.c.l.bf16 %v517_v51  ;;  %v186_v13 = vunpack.c.l.bf16 %v182_v57  ;;  %v204_v15 = vunpack.c.l.bf16 %v200_v58  ;;  %v201_v50 = vld [vmem:[%s591_s19 + $0x34] sm:$0x3]  ;;  %v504_v56 = vld [vmem:[%s591_s19 + $0x38] sm:$0x3] }
  0x1d   : > { %v295_v4 = vadd.f32 %v291_v38, %v273_v53  ;;  %v251_v18 = vadd.f32 %v243_v5, %v217_v61  ;;  %v361_v19 = vunpack.c.l.bf16 %v522_v63  ;;  %v393_v20 = vmul.f32 %v635_v26, %v383_v8 }
  0x1e   : > { %v196_v22 = vmul.f32 %v586_v0, %v186_v13  ;;  %v214_v23 = vmul.f32 %v596_v1, %v204_v15  ;;  %v226_v24 = vunpack.c.l.bf16 %v222_v9  ;;  %v261_v25 = vunpack.c.l.bf16 %v503_v10 }
  0x1f   : > { %v329_v17 = vadd.f32 %v321_v54, %v295_v4  ;;  %v274_v28 = vadd.f32 %v270_v62, %v251_v18  ;;  %v322_v29 = vrot.slane %v314_v6, 1  ;;  %v283_v30 = vunpack.c.l.bf16 %v508_v16  ;;  %v509_v62 = vld [vmem:[%s591_s19 + $0x3c] sm:$0x3] }
  0x20   : > { %v349_v32 = vmul.f32 %v646_v37, %v339_v12  ;;  %v218_v33 = vadd.f32 %v214_v23, %v196_v22  ;;  %v236_v34 = vmul.f32 %v601_v2, %v226_v24  ;;  %v305_v35 = vunpack.c.l.bf16 %v513_v21  ;;  %v529_v24 = vld [vmem:[%s591_s19 + $0x40] sm:$0x7] }
  0x21   : > { %v352_v27 = vadd.f32 %v348_v55, %v329_v17  ;;  %v296_v39 = vadd.f32 %v292_v11, %v274_v28  ;;  %v371_v40 = vmul.f32 %v652_v42, %v361_v19  ;;  %v401_v41 = vrot.slane %v393_v20, 1  ;;  %v223_v55 = vld [vmem:[%s591_s19 + $0x30] sm:$0x7] }
  0x22   : > { %v244_v46 = vrot.slane %v236_v34, 1  ;;  %v271_v47 = vmul.f32 %v606_v3, %v261_v25  ;;  %v315_v48 = vmul.f32 %v622_v14, %v305_v35  ;;  %v384_v49 = vunpack.c.l.bf16 %v528_v31 }
  0x23   : > { %v374_v38 = vadd.f32 %v370_v59, %v352_v27  ;;  %v330_v52 = vadd.f32 %v322_v29, %v296_v39  ;;  %v293_v53 = vmul.f32 %v614_v7, %v283_v30  ;;  %v187_v54 = vunpack.c.l.bf16 %v183_v36 }
  0x24   : > { %v252_v57 = vadd.f32 %v244_v46, %v218_v33  ;;  %v323_v58 = vrot.slane %v315_v48, 1  ;;  %v340_v59 = vunpack.c.l.bf16 %v518_v43  ;;  %v362_v61 = vunpack.c.l.bf16 %v523_v44 }
  0x25   : > { %v408_v51 = vadd.f32 %v400_v60, %v374_v38  ;;  %v353_v4 = vadd.f32 %v349_v32, %v330_v52  ;;  %v197_v5 = vmul.f32 %v586_v0, %v187_v54  ;;  %v205_v6 = vunpack.c.l.bf16 %v201_v50  ;;  %v514_v60 = vld [vmem:[%s591_s19 + $0x38] sm:$0x7]  ;;  %v524_v32 = vld [vmem:[%s591_s19 + $0x44] sm:$0x3] }
  0x26   : > { %v275_v8 = vadd.f32 %v271_v47, %v252_v57  ;;  %v394_v9 = vmul.f32 %v635_v26, %v384_v49  ;;  %v227_v10 = vunpack.c.l.bf16 %v223_v55  ;;  %v262_v11 = vunpack.c.l.bf16 %v504_v56 }
  0x27   : > { %v419_v63 = vadd.f32 %v688_v45, %v408_v51  ;;  %v375_v13 = vadd.f32 %v371_v40, %v353_v4  ;;  %v215_v15 = vmul.f32 %v596_v1, %v205_v6  ;;  %v284_v16 = vunpack.c.l.bf16 %v509_v62  ;;  %v519_v1 = vld [vmem:[%s591_s19 + $0x40] sm:$0x3] }
  0x28   : > { %v297_v0 = vadd.f32 %v293_v53, %v275_v8  ;;  %v350_v17 = vmul.f32 %v646_v37, %v340_v59  ;;  %v237_v18 = vmul.f32 %v601_v2, %v227_v10  ;;  %v306_v19 = vunpack.c.l.bf16 %v514_v60 }
  0x29   : > { %v423_v12 = vmax.f32 %v419_v63, 0.0  ;;  %v409_v21 = vadd.f32 %v401_v41, %v375_v13  ;;  %v372_v22 = vmul.f32 %v652_v42, %v362_v61  ;;  %v219_v23 = vadd.f32 %v215_v15, %v197_v5 }
  0x2a   : > { %v331_v25 = vadd.f32 %v323_v58, %v297_v0  ;;  %v245_v27 = vrot.slane %v237_v18, 1  ;;  %v272_v28 = vmul.f32 %v606_v3, %v262_v11  ;;  %v316_v29 = vmul.f32 %v622_v14, %v306_v19 }
  0x2b   : > { %v427_v20 = vpack.c.bf16 %v423_v12, %v423_v12  ;;  %v420_v30 = vadd.f32 %v688_v45, %v409_v21  ;;  %v402_v31 = vrot.slane %v394_v9, 1  ;;  %v294_v2 = vmul.f32 %v614_v7, %v284_v16 }
  0x2c   : > { %v354_v33 = vadd.f32 %v350_v17, %v331_v25  ;;  %v253_v34 = vadd.f32 %v245_v27, %v219_v23  ;;  %v341_v35 = vunpack.c.l.bf16 %v519_v1  ;;  %v385_v36 = vunpack.c.l.bf16 %v529_v24 }
  0x2d   : > { %431 = vst [vmem:[%s706_s15] sm:$0x3] %v427_v20  ;;  %v424_v38 = vmax.f32 %v420_v30, 0.0  ;;  %v324_v41 = vrot.slane %v316_v29, 1  ;;  %v363_v3 = vunpack.c.l.bf16 %v524_v32 }
  0x2e   : > { %v376_v39 = vadd.f32 %v372_v22, %v354_v33  ;;  %v276_v40 = vadd.f32 %v272_v28, %v253_v34  ;;  %v351_v46 = vmul.f32 %v646_v37, %v341_v35  ;;  %v395_v7 = vmul.f32 %v635_v26, %v385_v36 }
  0x2f   : > { %v428_v43 = vpack.c.bf16 %v424_v38, %v424_v38  ;;  %v373_v49 = vmul.f32 %v652_v42, %v363_v3 }
  0x30   : > { %v410_v14 = vadd.f32 %v402_v31, %v376_v39  ;;  %v298_v44 = vadd.f32 %v294_v2, %v276_v40  ;;  %v403_v52 = vrot.slane %v395_v7, 1 }
  0x31   : > { %432 = vst [vmem:[%s706_s15 + $0x2] sm:$0x3] %v428_v43 }
  0x32   : > { %v421_v47 = vadd.f32 %v688_v45, %v410_v14  ;;  %v332_v48 = vadd.f32 %v324_v41, %v298_v44 }
  0x34   : > { %v425_v50 = vmax.f32 %v421_v47, 0.0  ;;  %v355_v51 = vadd.f32 %v351_v46, %v332_v48 }
  0x36   : > { %v429_v53 = vpack.c.bf16 %v425_v50, %v425_v50  ;;  %v377_v54 = vadd.f32 %v373_v49, %v355_v51 }
  0x38   : > { %433 = vst [vmem:[%s706_s15 + $0x4] sm:$0x3] %v429_v53  ;;  %v411_v55 = vadd.f32 %v403_v52, %v377_v54 }
  0x3a   : > { %v422_v56 = vadd.f32 %v688_v45, %v411_v55 }
  0x3c   : > { %v426_v57 = vmax.f32 %v422_v56, 0.0 }
  0x3e   : > { %v430_v37 = vpack.c.bf16 %v426_v57, %v426_v57 }
  0x40   : > { %434 = vst [vmem:[%s706_s15 + $0x6] sm:$0x3] %v430_v37 }
  0x41 PF: > { %s13_s12 = sadd.s32 1, %s550_s12  }
  0x42   : > { %p10_p4 = scmp.ge.s32.totalorder %s13_s12, 4  }
  0x44   :  { %12 = sbr.rel (!%p10_p4) target bundleno = 1 (0x1), region = 64 }

// kernel: _lambda_.22
= control target key start
LH: loop header
LB: loop body
LE: loop exit
PB: predicated region body
PF: predicated region fallthrough
CT: control target
= control target key end

     0   :  { %s668_s12 = smov 0   ;;  %s670_s13 = smov 0   ;;  %s735_s0 = inlined_call_operand.vmem [shape: bf16[2,16,128], index: 0, kind: input, shape index: {}]   ;;  %s736_s1 = inlined_call_operand.vmem [shape: bf16[128,128], index: 1, kind: input, shape index: {}]   ;;  %s737_s2 = inlined_call_operand.vmem [shape: f32[1,128], index: 2, kind: input, shape index: {}]   ;;  %s738_s3 = inlined_call_operand.vmem [shape: bf16[2,16,128], index: 3, kind: output, shape index: {}]  }
   0x1   :  { %s672_s14 = smov 0  }
   0x2 LB: > { %s32_s15 = sadd.s32 1, %s640_s13  ;;  %p530_p0 = scmp.ge.s32.totalorder %s644_s14, 1  ;;  %s644_s14 = sphi %s672_s14, %s13_s14   ;;  %s640_s13 = sphi %s670_s13, %s740_s13   ;;  %s636_s12 = sphi %s668_s12, %s739_s12  }
   0x3   : > { %p34_p1 = scmp.ge.s32.totalorder %s32_s15, 2  ;;  %p184_p2 = scmp.lt.s32.totalorder %s644_s14, 3 }
   0x5   : > { %s742_s15 = smov (%p34_p1, %s32_s15), 0  ;;  %p185_p3 = pnand %p530_p0, %p184_p2 }
   0x6   : > { %v613_v0 = vld [vmem:[%s736_s1] sm:$0xff] (!%p185_p3)   ;;  %v646_v1 = vmov (!%p185_p3), 0.0   ;;  %v614_v2 = vld [vmem:[%s736_s1 + $0x8] sm:$0xff] (!%p185_p3)   ;;  %vm647_vm0 = vmmov (!%p185_p3), 0   ;;  %p227_p4 = scmp.lt.s32.totalorder (!%p185_p3), %s636_s12, 1  ;;  %v615_v3 = vld [vmem:[%s736_s1 + $0x10] sm:$0xff] (!%p185_p3)  }
   0x7   : > { %188 = sbr.rel (%p185_p3) target bundleno = 268 (0x10c), region = 32  ;;  %567 = vmatprep.subr.bf16.mxu0 (!%p185_p3), %v646_v1  ;;  %583 = vmatprep.mubr.msk.bf16.mxu0 (!%p185_p3), %vm647_vm0, %v646_v1  ;;  %v616_v4 = vld [vmem:[%s736_s1 + $0x18] sm:$0xff] (!%p185_p3)   ;;  %v617_v5 = vld [vmem:[%s736_s1 + $0x20] sm:$0xff] (!%p185_p3)   ;;  %v618_v6 = vld [vmem:[%s736_s1 + $0x28] sm:$0xff] (!%p185_p3)  }
   0x8   : > { %568 = vmatpush3.bf16.msra.mxu0 (!%p185_p3), %v613_v0  ;;  %v619_v7 = vld [vmem:[%s736_s1 + $0x30] sm:$0xff] (!%p185_p3)   ;;  %v620_v8 = vld [vmem:[%s736_s1 + $0x38] sm:$0xff] (!%p185_p3)   ;;  %v535_v10 = vld [vmem:[%s737_s2] ss:$0 sm:$0xff] (!%p185_p3) }
   0x9   : > { %569 = vmatprep.subr.bf16.mxu0 (!%p185_p3), %v646_v1 }
   0xc   : > { %570 = vmatpush3.bf16.msra.mxu0 (!%p185_p3), %v614_v2 }
   0xd   : > { %571 = vmatprep.subr.bf16.mxu0 (!%p185_p3), %v646_v1 }
   0xe   : > { %s744_s12 = smov (!%p227_p4, %s636_s12), 1 }
   0xf   : > { %s549_s22 = sshll.u32 %s744_s12, 3 }
  0x10   : > { %s234_s25 = scalar_lea.vmem %s735_s0, %s549_s22  ;;  %572 = vmatpush3.bf16.msra.mxu0 %v615_v3  ;;  %s254_s17 = scalar_lea.vmem %s738_s3, %s549_s22 }
  0x11   : > { %573 = vmatprep.subr.bf16.mxu0 %v646_v1  ;;  %v621_v9 = vld [vmem:[%s234_s25] sm:$0xff]  }
  0x14   : > { %574 = vmatpush3.bf16.msra.mxu0 %v616_v4 }
  0x15   : > { %575 = vmatprep.subr.bf16.mxu0 %v646_v1 }
  0x18   : > { %576 = vmatpush3.bf16.msra.mxu0 %v617_v5 }
  0x19   : > { %577 = vmatprep.subr.bf16.mxu0 %v646_v1 }
  0x1c   : > { %578 = vmatpush3.bf16.msra.mxu0 %v618_v6 }
  0x1d   : > { %579 = vmatprep.subr.bf16.mxu0 %v646_v1 }
  0x20   : > { %580 = vmatpush3.bf16.msra.mxu0 %v619_v7 }
  0x21   : > { %581 = vmatprep.subr.bf16.mxu0 %v646_v1 }
  0x24   : > { %582 = vmatpush3.bf16.msra.mxu0 %v620_v8 }
  0x27   : > { %584 = vmatmul.mubr.bf16.vlgmr.msra.gmra.mrb[0].mxu0 %v621_v9 }
  0xfa   : > { %v370_v11 = vpop.f32.mrb[0].mxu0 }
  0xfb   : > { %v371_v12 = vadd.f32 %v535_v10, %v370_v11  ;;  %v585_v13 = vpop.f32.mrb[1].mxu0 }
  0xfc   : > { %v373_v14 = vpop.f32.mrb[2].mxu0 }
  0xfd   : > { %v377_v15 = vadd.f32 3.0, %v371_v12  ;;  %v374_v16 = vadd.f32 %v535_v10, %v373_v14  ;;  %v586_v17 = vpop.f32.mrb[3].mxu0 }
  0xff   : > { %v379_v18 = vmax.f32 %v377_v15, 0.0  ;;  %v378_v19 = vadd.f32 3.0, %v374_v16 }
 0x101   : > { %v381_v20 = vmin.f32 %v379_v18, 6.0  ;;  %v380_v21 = vmax.f32 %v378_v19, 0.0 }
 0x103   : > { %v383_v22 = vmul.f32 %v381_v20, %v371_v12  ;;  %v382_v23 = vmin.f32 %v380_v21, 6.0 }
 0x105   : > { %v384_v24 = vmul.f32 %v382_v23, %v374_v16  ;;  %v385_v25 = vmul.f32 0.16666667, %v383_v22 }
 0x107   : > { %v386_v26 = vmul.f32 0.16666667, %v384_v24 }
 0x109   : > { %v556_v27 = vpack.c.bf16 %v386_v26, %v385_v25 }
 0x10b   : > { %557 = vst [vmem:[%s254_s17] sm:$0xff] %v556_v27  }
 0x10c PF: > { %s13_s14 = sadd.s32 1, %s644_s14   ;;  %s739_s12 = smov %s640_s13 }
 0x10d   : > { %p10_p5 = scmp.ge.s32.totalorder %s13_s14, 4   ;;  %s740_s13 = smov %s742_s15 }
 0x10f   :  { %12 = sbr.rel (!%p10_p5) target bundleno = 2 (0x2), region = 68 }

// kernel: _lambda_.27
= control target key start
LH: loop header
LB: loop body
LE: loop exit
PB: predicated region body
PF: predicated region fallthrough
CT: control target
= control target key end

     0   :  { %s771_s15 = smov 0   ;;  %s773_s16 = smov 0   ;;  %s839_s0 = inlined_call_operand.vmem [shape: bf16[2,16,128], index: 0, kind: input, shape index: {}]   ;;  %s840_s1 = inlined_call_operand.vmem [shape: bf16[128,128], index: 1, kind: input, shape index: {}]   ;;  %s841_s2 = inlined_call_operand.vmem [shape: f32[1,128], index: 2, kind: input, shape index: {}]   ;;  %s842_s3 = inlined_call_operand.vmem [shape: bf16[2,16,128], index: 3, kind: input, shape index: {}]   ;;  %s843_s4 = inlined_call_operand.vmem [shape: bf16[2,16,128], index: 4, kind: output, shape index: {}]  }
   0x1   :  { %s775_s17 = smov 0  }
   0x2 LB: > { %s33_s18 = sadd.s32 1, %s738_s16  ;;  %p621_p0 = scmp.ge.s32.totalorder %s742_s17, 1  ;;  %s742_s17 = sphi %s775_s17, %s14_s17   ;;  %s738_s16 = sphi %s773_s16, %s845_s16   ;;  %s734_s15 = sphi %s771_s15, %s844_s15  }
   0x3   : > { %p35_p1 = scmp.ge.s32.totalorder %s33_s18, 2  ;;  %p231_p2 = scmp.lt.s32.totalorder %s742_s17, 3 }
   0x5   : > { %s847_s18 = smov (%p35_p1, %s33_s18), 0  ;;  %p232_p3 = pnand %p621_p0, %p231_p2 }
   0x6   : > { %v711_v0 = vld [vmem:[%s840_s1] sm:$0xff] (!%p232_p3)   ;;  %v744_v1 = vmov (!%p232_p3), 0.0   ;;  %v712_v2 = vld [vmem:[%s840_s1 + $0x8] sm:$0xff] (!%p232_p3)   ;;  %vm745_vm0 = vmmov (!%p232_p3), 0   ;;  %p288_p4 = scmp.lt.s32.totalorder (!%p232_p3), %s734_s15, 1  ;;  %v713_v3 = vld [vmem:[%s840_s1 + $0x10] sm:$0xff] (!%p232_p3)  }
   0x7   : > { %235 = sbr.rel (%p232_p3) target bundleno = 260 (0x104), region = 36  ;;  %665 = vmatprep.subr.bf16.mxu0 (!%p232_p3), %v744_v1  ;;  %681 = vmatprep.mubr.msk.bf16.mxu0 (!%p232_p3), %vm745_vm0, %v744_v1  ;;  %v714_v4 = vld [vmem:[%s840_s1 + $0x18] sm:$0xff] (!%p232_p3)   ;;  %v715_v5 = vld [vmem:[%s840_s1 + $0x20] sm:$0xff] (!%p232_p3)   ;;  %v716_v6 = vld [vmem:[%s840_s1 + $0x28] sm:$0xff] (!%p232_p3)  }
   0x8   : > { %666 = vmatpush3.bf16.msra.mxu0 (!%p232_p3), %v711_v0  ;;  %v717_v7 = vld [vmem:[%s840_s1 + $0x30] sm:$0xff] (!%p232_p3)   ;;  %v718_v8 = vld [vmem:[%s840_s1 + $0x38] sm:$0xff] (!%p232_p3)   ;;  %v628_v10 = vld [vmem:[%s841_s2] ss:$0 sm:$0xff] (!%p232_p3) }
   0x9   : > { %667 = vmatprep.subr.bf16.mxu0 (!%p232_p3), %v744_v1 }
   0xc   : > { %668 = vmatpush3.bf16.msra.mxu0 (!%p232_p3), %v712_v2 }
   0xd   : > { %669 = vmatprep.subr.bf16.mxu0 (!%p232_p3), %v744_v1 }
   0xe   : > { %s849_s15 = smov (!%p288_p4, %s734_s15), 1 }
   0xf   : > { %s798_s25 = sshll.u32 %s849_s15, 3 }
  0x10   : > { %s295_s28 = scalar_lea.vmem %s839_s0, %s798_s25  ;;  %670 = vmatpush3.bf16.msra.mxu0 %v713_v3  ;;  %s315_s15 = scalar_lea.vmem %s842_s3, %s798_s25 }
  0x11   : > { %671 = vmatprep.subr.bf16.mxu0 %v744_v1  ;;  %v719_v9 = vld [vmem:[%s295_s28] sm:$0xff]   ;;  %s328_s23 = scalar_lea.vmem %s843_s4, %s798_s25 }
  0x12   : > { %v648_v11 = vld [vmem:[%s315_s15] sm:$0xff]  }
  0x13   : > { %v649_v14 = vunpack.c.l.bf16 %v648_v11  ;;  %v650_v16 = vunpack.c.h.bf16 %v648_v11 }
  0x14   : > { %672 = vmatpush3.bf16.msra.mxu0 %v714_v4 }
  0x15   : > { %673 = vmatprep.subr.bf16.mxu0 %v744_v1 }
  0x18   : > { %674 = vmatpush3.bf16.msra.mxu0 %v715_v5 }
  0x19   : > { %675 = vmatprep.subr.bf16.mxu0 %v744_v1 }
  0x1c   : > { %676 = vmatpush3.bf16.msra.mxu0 %v716_v6 }
  0x1d   : > { %677 = vmatprep.subr.bf16.mxu0 %v744_v1 }
  0x20   : > { %678 = vmatpush3.bf16.msra.mxu0 %v717_v7 }
  0x21   : > { %679 = vmatprep.subr.bf16.mxu0 %v744_v1 }
  0x24   : > { %680 = vmatpush3.bf16.msra.mxu0 %v718_v8 }
  0x27   : > { %682 = vmatmul.mubr.bf16.vlgmr.msra.gmra.mrb[0].mxu0 %v719_v9 }
  0xfa   : > { %v444_v12 = vpop.f32.mrb[0].mxu0 }
  0xfb   : > { %v445_v13 = vadd.f32 %v628_v10, %v444_v12  ;;  %v683_v15 = vpop.f32.mrb[1].mxu0 }
  0xfc   : > { %v447_v17 = vpop.f32.mrb[2].mxu0 }
  0xfd   : > { %v448_v18 = vadd.f32 %v628_v10, %v447_v17  ;;  %v684_v19 = vpop.f32.mrb[3].mxu0  ;;  %v455_v20 = vadd.f32 %v649_v14, %v445_v13 }
  0xff   : > { %v456_v21 = vadd.f32 %v650_v16, %v448_v18 }
 0x101   : > { %v654_v22 = vpack.c.bf16 %v456_v21, %v455_v20 }
 0x103   : > { %655 = vst [vmem:[%s328_s23] sm:$0xff] %v654_v22  }
 0x104 PF: > { %s14_s17 = sadd.s32 1, %s742_s17   ;;  %s844_s15 = smov %s738_s16 }
 0x105   : > { %p11_p5 = scmp.ge.s32.totalorder %s14_s17, 4   ;;  %s845_s16 = smov %s847_s18 }
 0x107   :  { %13 = sbr.rel (!%p11_p5) target bundleno = 2 (0x2), region = 75 }

// kernel: _lambda_.28
= control target key start
LH: loop header
LB: loop body
LE: loop exit
PB: predicated region body
PF: predicated region fallthrough
CT: control target
= control target key end

     0   :  { %s732_s12 = smov 0   ;;  %s734_s13 = smov 0   ;;  %s820_s0 = inlined_call_operand.vmem [shape: bf16[2,16,128], index: 0, kind: input, shape index: {}]   ;;  %s821_s1 = inlined_call_operand.vmem [shape: bf16[128,256], index: 1, kind: input, shape index: {}]   ;;  %s822_s2 = inlined_call_operand.vmem [shape: f32[1,256], index: 2, kind: input, shape index: {}]   ;;  %s823_s3 = inlined_call_operand.vmem [shape: bf16[2,16,256], index: 3, kind: output, shape index: {}]  }
   0x1   :  { %s736_s14 = smov 0  }
   0x2 LB: > { %s32_s15 = sadd.s32 1, %s705_s13  ;;  %p607_p0 = scmp.ge.s32.totalorder %s709_s14, 1  ;;  %s709_s14 = sphi %s736_s14, %s13_s14   ;;  %s705_s13 = sphi %s734_s13, %s825_s13   ;;  %s701_s12 = sphi %s732_s12, %s824_s12  }
   0x3   : > { %p34_p1 = scmp.ge.s32.totalorder %s32_s15, 2  ;;  %p188_p2 = scmp.lt.s32.totalorder %s709_s14, 3 }
   0x5   : > { %s827_s15 = smov (%p34_p1, %s32_s15), 0  ;;  %p189_p3 = pnand %p607_p0, %p188_p2 }
   0x6   : > { %v662_v0 = vld [vmem:[%s821_s1 + $0x4] ss:$8 sps:$4 sm:$0xff] (!%p189_p3)   ;;  %p235_p4 = scmp.lt.s32.totalorder (!%p189_p3), %s701_s12, 1  ;;  %v664_v1 = vld [vmem:[%s821_s1] ss:$8 sps:$4 sm:$0xff] (!%p189_p3)   ;;  %v711_v2 = vmov (!%p189_p3), 0   ;;  %v292_v18 = vlaneseq (!%p189_p3) }
   0x7   : > { %192 = sbr.rel (%p189_p3) target bundleno = 269 (0x10d), region = 32  ;;  %420 = vmatprep.mubr.bf16.mxu0 (!%p189_p3), %v711_v2  ;;  %388 = vmatprep.subr.bf16.mxu0 (!%p189_p3), %v662_v0  ;;  %v665_v3 = vld [vmem:[%s821_s1 + $0x14] ss:$8 sps:$4 sm:$0xff] (!%p189_p3)   ;;  %v667_v4 = vld [vmem:[%s821_s1 + $0x10] ss:$8 sps:$4 sm:$0xff] (!%p189_p3)  }
   0x8   : > { %389 = vmatpush1.bf16.msra.mxu0 (!%p189_p3), %v664_v1  ;;  %v668_v5 = vld [vmem:[%s821_s1 + $0x24] ss:$8 sps:$4 sm:$0xff] (!%p189_p3)   ;;  %v670_v6 = vld [vmem:[%s821_s1 + $0x20] ss:$8 sps:$4 sm:$0xff] (!%p189_p3)   ;;  %v671_v7 = vld [vmem:[%s821_s1 + $0x34] ss:$8 sps:$4 sm:$0xff] (!%p189_p3)  }
   0x9   : > { %390 = vmatprep.subr.bf16.mxu0 (!%p189_p3), %v665_v3  ;;  %v673_v8 = vld [vmem:[%s821_s1 + $0x30] ss:$8 sps:$4 sm:$0xff] (!%p189_p3)   ;;  %v674_v9 = vld [vmem:[%s821_s1 + $0x44] ss:$8 sps:$4 sm:$0xff] (!%p189_p3)   ;;  %v676_v10 = vld [vmem:[%s821_s1 + $0x40] ss:$8 sps:$4 sm:$0xff] (!%p189_p3)  }
   0xa   : > { %v677_v11 = vld [vmem:[%s821_s1 + $0x54] ss:$8 sps:$4 sm:$0xff] (!%p189_p3)   ;;  %v679_v12 = vld [vmem:[%s821_s1 + $0x50] ss:$8 sps:$4 sm:$0xff] (!%p189_p3)   ;;  %v680_v13 = vld [vmem:[%s821_s1 + $0x64] ss:$8 sps:$4 sm:$0xff] (!%p189_p3)  }
   0xb   : > { %v682_v14 = vld [vmem:[%s821_s1 + $0x60] ss:$8 sps:$4 sm:$0xff] (!%p189_p3)   ;;  %v683_v15 = vld [vmem:[%s821_s1 + $0x74] ss:$8 sps:$4 sm:$0xff] (!%p189_p3)   ;;  %v685_v16 = vld [vmem:[%s821_s1 + $0x70] ss:$8 sps:$4 sm:$0xff] (!%p189_p3)  }
   0xc   : > { %391 = vmatpush1.bf16.msra.mxu0 (!%p189_p3), %v667_v4  ;;  %v293_v19 = vshrl.u32 (!%p189_p3), %v292_v18, 7  ;;  %v290_v21 = vld [vmem:[%s822_s2] sm:$0x3] (!%p189_p3) }
   0xd   : > { %392 = vmatprep.subr.bf16.mxu0 (!%p189_p3), %v668_v5 }
   0xe   : > { %s829_s12 = smov (!%p235_p4, %s701_s12), 1  ;;  %v294_v20 = vsub.s32 0, %v293_v19  ;;  %v298_v22 = vsub.s32 1, %v293_v19 }
   0xf   : > { %s633_s26 = sshll.u32 %s829_s12, 3  ;;  %s634_s4 = sshll.u32 %s829_s12, 4 }
  0x10   : > { %s242_s6 = scalar_lea.vmem %s820_s0, %s633_s26  ;;  %393 = vmatpush1.bf16.msra.mxu0 %v670_v6  ;;  %v295_v23 = vrot.slane %v290_v21, %v294_v20  ;;  %v299_v24 = vrot.slane %v290_v21, %v298_v22  ;;  %s268_s7 = scalar_lea.vmem %s823_s3, %s634_s4 }
  0x11   : > { %394 = vmatprep.subr.bf16.mxu0 %v671_v7  ;;  %v686_v17 = vld [vmem:[%s242_s6] sm:$0xff]  }
  0x14   : > { %395 = vmatpush1.bf16.msra.mxu0 %v673_v8 }
  0x15   : > { %396 = vmatprep.subr.bf16.mxu0 %v674_v9 }
  0x18   : > { %397 = vmatpush1.bf16.msra.mxu0 %v676_v10 }
  0x19   : > { %398 = vmatprep.subr.bf16.mxu0 %v677_v11 }
  0x1c   : > { %399 = vmatpush1.bf16.msra.mxu0 %v679_v12 }
  0x1d   : > { %400 = vmatprep.subr.bf16.mxu0 %v680_v13 }
  0x20   : > { %401 = vmatpush1.bf16.msra.mxu0 %v682_v14 }
  0x21   : > { %402 = vmatprep.subr.bf16.mxu0 %v683_v15 }
  0x24   : > { %403 = vmatpush1.bf16.msra.mxu0 %v685_v16 }
  0x27   : > { %421 = vmatmul.mubr.bf16.vlgmr.msra.gmra.mrb[0].mxu0 %v686_v17 }
  0xfa   : > { %v422_v25 = vpop.f32.mrb[0].mxu0 }
  0xfb   : > { %v423_v26 = vadd.f32 %v422_v25, %v295_v23  ;;  %v424_v27 = vpop.f32.mrb[1].mxu0 }
  0xfc   : > { %v425_v28 = vadd.f32 %v424_v27, %v299_v24  ;;  %v426_v29 = vpop.f32.mrb[2].mxu0 }
  0xfd   : > { %v431_v30 = vadd.f32 3.0, %v423_v26  ;;  %v427_v31 = vadd.f32 %v426_v29, %v295_v23  ;;  %v428_v32 = vpop.f32.mrb[3].mxu0 }
  0xfe   : > { %v432_v33 = vadd.f32 3.0, %v425_v28  ;;  %v429_v34 = vadd.f32 %v428_v32, %v299_v24 }
  0xff   : > { %v435_v35 = vmax.f32 %v431_v30, 0.0  ;;  %v433_v36 = vadd.f32 3.0, %v427_v31 }
 0x100   : > { %v436_v37 = vmax.f32 %v432_v33, 0.0  ;;  %v434_v38 = vadd.f32 3.0, %v429_v34 }
 0x101   : > { %v439_v39 = vmin.f32 %v435_v35, 6.0  ;;  %v437_v40 = vmax.f32 %v433_v36, 0.0 }
 0x102   : > { %v440_v41 = vmin.f32 %v436_v37, 6.0  ;;  %v438_v42 = vmax.f32 %v434_v38, 0.0 }
 0x103   : > { %v443_v43 = vmul.f32 %v439_v39, %v423_v26  ;;  %v441_v44 = vmin.f32 %v437_v40, 6.0 }
 0x104   : > { %v444_v45 = vmul.f32 %v440_v41, %v425_v28  ;;  %v442_v46 = vmin.f32 %v438_v42, 6.0 }
 0x105   : > { %v447_v47 = vmul.f32 0.16666667, %v443_v43  ;;  %v445_v48 = vmul.f32 %v441_v44, %v427_v31 }
 0x106   : > { %v448_v49 = vmul.f32 0.16666667, %v444_v45  ;;  %v446_v50 = vmul.f32 %v442_v46, %v429_v34 }
 0x107   : > { %v449_v51 = vmul.f32 0.16666667, %v445_v48 }
 0x108   : > { %v635_v52 = vpack.c.bf16 %v448_v49, %v447_v47  ;;  %v450_v53 = vmul.f32 0.16666667, %v446_v50 }
 0x10a   : > { %463 = vst [vmem:[%s268_s7] sm:$0xff] %v635_v52  ;;  %v636_v54 = vpack.c.bf16 %v450_v53, %v449_v51 }
 0x10c   : > { %464 = vst [vmem:[%s268_s7 + $0x8] sm:$0xff] %v636_v54 }
 0x10d PF: > { %s13_s14 = sadd.s32 1, %s709_s14   ;;  %s824_s12 = smov %s705_s13 }
 0x10e   : > { %p10_p5 = scmp.ge.s32.totalorder %s13_s14, 4   ;;  %s825_s13 = smov %s827_s15 }
 0x110   :  { %12 = sbr.rel (!%p10_p5) target bundleno = 2 (0x2), region = 68 }

// kernel: _lambda_.29
= control target key start
LH: loop header
LB: loop body
LE: loop exit
PB: predicated region body
PF: predicated region fallthrough
CT: control target
= control target key end

     0   :  { %v65_v26 = vlaneseq  ;;  %v154_v29 = vmov 1966171168   ;;  %v155_v37 = vmov 1935823168   ;;  %vm124_vm0 = vcmask 1041409   ;;  %s181_s0 = inlined_call_operand.vmem [shape: bf16[2,16,256], index: 0, kind: input, shape index: {}]   ;;  %s182_s1 = inlined_call_operand.vmem [shape: bf16[1,2,256], index: 1, kind: output, shape index: {}]  }
   0x1   :  { %v8_v0 = vld [vmem:[%s181_s0] sm:$0xff]  ;;  %v9_v1 = vld [vmem:[%s181_s0 + $0x8] sm:$0xff]  ;;  %v10_v2 = vld [vmem:[%s181_s0 + $0x10] sm:$0xff]  ;;  %v63_v30 = vunpack.c.l.s4 %v154_v29  ;;  %v92_v38 = vunpack.c.l.s4 %v155_v37 }
   0x2   :  { %v11_v3 = vld [vmem:[%s181_s0 + $0x18] sm:$0xff]  ;;  %v12_v4 = vunpack.c.l.bf16 %v8_v0  ;;  %v13_v5 = vunpack.c.h.bf16 %v8_v0  ;;  %v14_v6 = vunpack.c.l.bf16 %v9_v1  ;;  %v15_v7 = vunpack.c.h.bf16 %v9_v1 }
   0x3   :  { %v16_v8 = vunpack.c.l.bf16 %v10_v2  ;;  %v17_v9 = vunpack.c.h.bf16 %v10_v2  ;;  %v18_v10 = vunpack.c.l.bf16 %v11_v3  ;;  %v19_v11 = vunpack.c.h.bf16 %v11_v3 }
   0x4   :  { %v20_v12 = vadd.f32 %v14_v6, %v12_v4  ;;  %v27_v13 = vadd.f32 %v15_v7, %v13_v5  ;;  %v64_v41 = vunpack.c.0.s8 %v63_v30  ;;  %v66_v42 = vshrl.u32 %v65_v26, 7 }
   0x5   :  { %v34_v14 = vadd.f32 %v18_v10, %v16_v8  ;;  %v41_v15 = vadd.f32 %v19_v11, %v17_v9  ;;  %v93_v52 = vunpack.c.0.s8 %v92_v38 }
   0x6   :  { %v21_v16 = vrot.slane %v20_v12, 4  ;;  %v28_v17 = vrot.slane %v27_v13, 4  ;;  %v67_v51 = vsub.s32 %v64_v41, %v66_v42 }
   0x7   :  { %v35_v18 = vrot.slane %v34_v14, 4  ;;  %v42_v19 = vrot.slane %v41_v15, 4  ;;  %v96_v57 = vsub.s32 %v93_v52, %v66_v42 }
   0x8   :  { %v22_v20 = vadd.f32 %v21_v16, %v20_v12  ;;  %v29_v21 = vadd.f32 %v28_v17, %v27_v13 }
   0x9   :  { %v36_v22 = vadd.f32 %v35_v18, %v34_v14  ;;  %v43_v23 = vadd.f32 %v42_v19, %v41_v15 }
   0xa   :  { %v23_v24 = vrot.slane %v22_v20, 2  ;;  %v30_v25 = vrot.slane %v29_v21, 2 }
   0xb   :  { %v37_v27 = vrot.slane %v36_v22, 2  ;;  %v44_v28 = vrot.slane %v43_v23, 2 }
   0xc   :  { %v24_v31 = vadd.f32 %v23_v24, %v22_v20  ;;  %v31_v32 = vadd.f32 %v30_v25, %v29_v21 }
   0xd   :  { %v38_v33 = vadd.f32 %v37_v27, %v36_v22  ;;  %v45_v34 = vadd.f32 %v44_v28, %v43_v23 }
   0xe   :  { %v25_v35 = vrot.slane %v24_v31, 1  ;;  %v32_v36 = vrot.slane %v31_v32, 1 }
   0xf   :  { %v39_v39 = vrot.slane %v38_v33, 1  ;;  %v46_v40 = vrot.slane %v45_v34, 1 }
  0x10   :  { %v26_v43 = vadd.f32 %v25_v35, %v24_v31  ;;  %v33_v44 = vadd.f32 %v32_v36, %v31_v32 }
  0x11   :  { %v40_v45 = vadd.f32 %v39_v39, %v38_v33  ;;  %v47_v46 = vadd.f32 %v46_v40, %v45_v34 }
  0x12   :  { %v49_v47 = vmul.f32 0.0625, %v26_v43  ;;  %v50_v48 = vmul.f32 0.0625, %v33_v44 }
  0x13   :  { %v51_v49 = vmul.f32 0.0625, %v40_v45  ;;  %v52_v50 = vmul.f32 0.0625, %v47_v46 }
  0x14   :  { %v149_v53 = vpack.c.bf16 %v50_v48, %v49_v47 }
  0x15   :  { %v150_v54 = vpack.c.bf16 %v52_v50, %v51_v49 }
  0x16   :  { %v68_v55 = vrot.slane %v149_v53, %v67_v51 }
  0x17   :  { %v83_v56 = vrot.slane %v150_v54, %v67_v51 }
  0x18   :  { %v75_v58 = vrot.slane %v68_v55, %v67_v51 }
  0x19   :  { %v90_v59 = vrot.slane %v83_v56, %v67_v51 }
  0x1a   :  { %v97_v60 = vrot.slane %v75_v58, %v96_v57 }
  0x1b   :  { %v111_v61 = vrot.slane %v90_v59, %v96_v57 }
  0x1c   :  { %v104_v62 = vrot.slane %v97_v60, %v96_v57 }
  0x1d   :  { %v118_v63 = vrot.slane %v111_v61, %v96_v57 }
  0x1e   :  { %v119_v0 = vunpack.c.l.b16 %v104_v62  ;;  %v120_v1 = vunpack.c.h.b16 %v104_v62 }
  0x1f   :  { %v121_v2 = vunpack.c.l.b16 %v118_v63  ;;  %v122_v3 = vunpack.c.h.b16 %v118_v63 }
  0x21   :  { %v123_v4 = vrot.slane %v121_v2, 7  ;;  %v126_v5 = vrot.slane %v122_v3, 7 }
  0x23   :  { %v125_v6 = vsel %vm124_vm0, %v123_v4, %v119_v0  ;;  %v127_v7 = vsel %vm124_vm0, %v126_v5, %v120_v1 }
  0x24   :  { %v128_v8 = vpack.c.b16 %v127_v7, %v125_v6 }
  0x26   :  { %v135_v9 = vrot.slane %v128_v8, %v67_v51 }
  0x28   :  { %151 = vst.sshfl [vmem:[%s182_s1] sm:$0x5 pattern:$0x73625140] %v135_v9 }

// kernel: _lambda_.23
= control target key start
LH: loop header
LB: loop body
LE: loop exit
PB: predicated region body
PF: predicated region fallthrough
CT: control target
= control target key end

     0   :  { %s1701_s24 = smov 0   ;;  %s1974_s0 = inlined_call_operand.vmem [shape: bf16[2,8,1,8,128], index: 0, kind: input, shape index: {}]   ;;  %s1975_s1 = inlined_call_operand.vmem [shape: f32[25,1,128], index: 1, kind: input, shape index: {}]   ;;  %s1976_s2 = inlined_call_operand.vmem [shape: f32[1,128], index: 2, kind: input, shape index: {}, may-alias: {2,4,6}]   ;;  %s1977_s3 = inlined_call_operand.vmem [shape: bf16[128,128], index: 3, kind: input, shape index: {}]   ;;  %s1978_s4 = inlined_call_operand.vmem [shape: f32[1,128], index: 4, kind: input, shape index: {}, may-alias: {2,4,6}]   ;;  %s1979_s5 = inlined_call_operand.vmem [shape: bf16[128,128], index: 5, kind: input, shape index: {}]   ;;  %s1980_s6 = inlined_call_operand.vmem [shape: f32[1,128], index: 6, kind: input, shape index: {}, may-alias: {2,4,6}]   ;;  %s1981_s7 = inlined_call_operand.vmem [shape: bf16[2,4,4,128], index: 7, kind: output, shape index: {}]  }
   0x1 LB: > { %s1432_s25 = sadd.s32 4294967295, %s1657_s24   ;;  %p1436_p0 = scmp.ge.s32.totalorder %s1657_s24, 1  ;;  %s1657_s24 = sphi %s1701_s24, %s17_s24  }
   0x2   : > { %p237_p1 = scmp.lt.s32.totalorder %s1657_s24, 3 }
   0x4   : > { %p238_p2 = pnand %p1436_p0, %p237_p1 }
   0x5   : > { %v1635_v0 = vld [vmem:[%s1977_s3] sm:$0xff] (!%p238_p2)   ;;  %v1659_v1 = vmov (!%p238_p2), 0.0   ;;  %v1636_v2 = vld [vmem:[%s1977_s3 + $0x8] sm:$0xff] (!%p238_p2)   ;;  %vm1660_vm0 = vmmov (!%p238_p2), 0   ;;  %p269_p3 = scmp.lt.s32.totalorder (!%p238_p2), %s1432_s25, 1  ;;  %v1637_v3 = vld [vmem:[%s1977_s3 + $0x10] sm:$0xff] (!%p238_p2)  }
   0x6   : > { %241 = sbr.rel (%p238_p2) target bundleno = 599 (0x257), region = 48  ;;  %1585 = vmatprep.subr.bf16.mxu0 (!%p238_p2), %v1659_v1  ;;  %1605 = vmatprep.subr.bf16.mxu1 (!%p238_p2), %v1659_v1  ;;  %v1638_v4 = vld [vmem:[%s1977_s3 + $0x18] sm:$0xff] (!%p238_p2)   ;;  %v1639_v5 = vld [vmem:[%s1977_s3 + $0x20] sm:$0xff] (!%p238_p2)   ;;  %v1640_v7 = vld [vmem:[%s1977_s3 + $0x28] sm:$0xff] (!%p238_p2)   ;;  %vm1126_vm1 = vcmask (!%p238_p2), 1043456  }
   0x7   : > { %1586 = vmatpush3.bf16.msra.mxu0 (!%p238_p2), %v1635_v0  ;;  %1601 = vmatprep.mubr.msk.bf16.mxu0 (!%p238_p2), %vm1660_vm0, %v1659_v1  ;;  %v1441_v6 = vld [vmem:[%s1975_s1] ss:$0 sm:$0xff] (!%p238_p2)  ;;  %v1442_v8 = vld [vmem:[%s1975_s1 + $0x1] ss:$0 sm:$0xff] (!%p238_p2)  ;;  %v1443_v29 = vld [vmem:[%s1975_s1 + $0x2] ss:$0 sm:$0xff] (!%p238_p2) }
   0x8   : > { %1587 = vmatprep.subr.bf16.mxu0 (!%p238_p2), %v1659_v1  ;;  %1621 = vmatprep.mubr.msk.bf16.mxu1 (!%p238_p2), %vm1660_vm0, %v1659_v1  ;;  %v1641_v39 = vld [vmem:[%s1977_s3 + $0x30] sm:$0xff] (!%p238_p2)   ;;  %v1642_v49 = vld [vmem:[%s1977_s3 + $0x38] sm:$0xff] (!%p238_p2)   ;;  %v1643_v56 = vld [vmem:[%s1979_s5] sm:$0xff] (!%p238_p2)  }
   0x9   : > { %v1444_v57 = vld [vmem:[%s1975_s1 + $0x3] ss:$0 sm:$0xff] (!%p238_p2)  ;;  %1606 = vmatpush3.bf16.msra.mxu1 (!%p238_p2), %v1643_v56  ;;  %v1455_v56 = vld [vmem:[%s1975_s1 + $0x6] ss:$0 sm:$0xff] (!%p238_p2) }
   0xa   : > { %1607 = vmatprep.subr.bf16.mxu1 (!%p238_p2), %v1659_v1 }
   0xb   : > { %1588 = vmatpush3.bf16.msra.mxu0 (!%p238_p2), %v1636_v2 }
   0xc   : > { %1589 = vmatprep.subr.bf16.mxu0 (!%p238_p2), %v1659_v1 }
   0xd   : > { %s1983_s25 = smov (!%p269_p3, %s1432_s25), 1 }
   0xe   : > { %s1565_s11 = sshll.u32 %s1983_s25, 5  ;;  %s1566_s13 = sshll.u32 %s1983_s25, 3 }
   0xf   : > { %1590 = vmatpush3.bf16.msra.mxu0 %v1637_v3  ;;  %s1737_s16 = scalar_lea.vmem %s1974_s0, %s1565_s11  ;;  %s278_s17 = scalar_lea.vmem %s1981_s7, %s1566_s13 }
  0x10   : > { %1591 = vmatprep.subr.bf16.mxu0 %v1659_v1  ;;  %v305_v9 = vld [vmem:[%s1737_s16] sm:$0x3]  ;;  %v306_v10 = vld [vmem:[%s1737_s16 + $0x4] sm:$0x3]  ;;  %v307_v11 = vld [vmem:[%s1737_s16 + $0x8] sm:$0x3] }
  0x11   : > { %v308_v12 = vld [vmem:[%s1737_s16 + $0xc] sm:$0x3]  ;;  %v309_v13 = vunpack.c.l.bf16 %v305_v9  ;;  %v310_v14 = vunpack.c.l.bf16 %v306_v10  ;;  %v323_v15 = vld [vmem:[%s1737_s16] sm:$0x7]  ;;  %v311_v16 = vunpack.c.l.bf16 %v307_v11  ;;  %v324_v18 = vld [vmem:[%s1737_s16 + $0x4] sm:$0x7] }
  0x12   : > { %v312_v17 = vunpack.c.l.bf16 %v308_v12  ;;  %v325_v19 = vld [vmem:[%s1737_s16 + $0x8] sm:$0x7]  ;;  %v326_v20 = vld [vmem:[%s1737_s16 + $0xc] sm:$0x7]  ;;  %v327_v21 = vunpack.c.l.bf16 %v323_v15  ;;  %v328_v24 = vunpack.c.l.bf16 %v324_v18  ;;  %v357_v26 = vld [vmem:[%s1737_s16] sm:$0x6] }
  0x13   : > { %1592 = vmatpush3.bf16.msra.mxu0 %v1638_v4  ;;  %v319_v22 = vmul.f32 %v1441_v6, %v309_v13  ;;  %v320_v23 = vmul.f32 %v1441_v6, %v310_v14  ;;  %v329_v25 = vunpack.c.l.bf16 %v325_v19  ;;  %v358_v27 = vld [vmem:[%s1737_s16 + $0x4] sm:$0x6]  ;;  %v359_v28 = vld [vmem:[%s1737_s16 + $0x8] sm:$0x6]  ;;  %v321_v30 = vmul.f32 %v1441_v6, %v311_v16  ;;  %v360_v34 = vld [vmem:[%s1737_s16 + $0xc] sm:$0x6] }
  0x14   : > { %1593 = vmatprep.subr.bf16.mxu0 %v1659_v1  ;;  %v322_v31 = vmul.f32 %v1441_v6, %v312_v17  ;;  %v330_v32 = vunpack.c.l.bf16 %v326_v20  ;;  %v337_v33 = vmul.f32 %v1442_v8, %v327_v21  ;;  %v338_v35 = vmul.f32 %v1442_v8, %v328_v24  ;;  %v391_v48 = vld [vmem:[%s1737_s16] sm:$0xe]  ;;  %v392_v54 = vld [vmem:[%s1737_s16 + $0x4] sm:$0xe]  ;;  %v393_v55 = vld [vmem:[%s1737_s16 + $0x8] sm:$0xe] }
  0x15   : > { %v339_v36 = vmul.f32 %v1442_v8, %v329_v25  ;;  %v361_v37 = vunpack.c.l.bf16 %v357_v26  ;;  %v362_v38 = vunpack.c.l.bf16 %v358_v27  ;;  %v363_v42 = vunpack.c.l.bf16 %v359_v28  ;;  %v394_v62 = vld [vmem:[%s1737_s16 + $0xc] sm:$0xe]  ;;  %v425_v4 = vld [vmem:[%s1737_s16] sm:$0xc]  ;;  %v427_v10 = vld [vmem:[%s1737_s16 + $0x8] sm:$0xc] }
  0x16   : > { %v340_v40 = vmul.f32 %v1442_v8, %v330_v32  ;;  %v345_v41 = vrot.slane %v337_v33, 1  ;;  %v364_v43 = vunpack.c.l.bf16 %v360_v34  ;;  %v346_v44 = vrot.slane %v338_v35, 1  ;;  %v428_v11 = vld [vmem:[%s1737_s16 + $0xc] sm:$0xc]  ;;  %v1445_v12 = vld [vmem:[%s1975_s1 + $0x4] ss:$0 sm:$0xff] }
  0x17   : > { %1594 = vmatpush3.bf16.msra.mxu0 %v1639_v5  ;;  %v347_v45 = vrot.slane %v339_v36, 1  ;;  %v371_v46 = vmul.f32 %v1443_v29, %v361_v37  ;;  %v372_v47 = vmul.f32 %v1443_v29, %v362_v38  ;;  %v373_v52 = vmul.f32 %v1443_v29, %v363_v42  ;;  %v426_v5 = vld [vmem:[%s1737_s16 + $0x4] sm:$0xc]  ;;  %v1644_v25 = vld [vmem:[%s1979_s5 + $0x8] sm:$0xff]   ;;  %v1645_v37 = vld [vmem:[%s1979_s5 + $0x10] sm:$0xff]  }
  0x18   : > { %1595 = vmatprep.subr.bf16.mxu0 %v1659_v1  ;;  %v348_v50 = vrot.slane %v340_v40, 1  ;;  %v353_v51 = vadd.f32 %v345_v41, %v319_v22  ;;  %v374_v53 = vmul.f32 %v1443_v29, %v364_v43  ;;  %v354_v58 = vadd.f32 %v346_v44, %v320_v23  ;;  %v1447_v35 = vld [vmem:[%s1737_s16 + $0x8] sm:$0x3]  ;;  %v1448_v36 = vld [vmem:[%s1737_s16 + $0xc] sm:$0x3]  ;;  %1608 = vmatpush3.bf16.msra.mxu1 %v1644_v25 }
  0x19   : > { %v355_v59 = vadd.f32 %v347_v45, %v321_v30  ;;  %v379_v60 = vrot.slane %v371_v46, 2  ;;  %v380_v61 = vrot.slane %v372_v47, 2  ;;  %v381_v0 = vrot.slane %v373_v52, 2  ;;  %v1446_v30 = vld [vmem:[%s1737_s16 + $0x4] sm:$0x3]  ;;  %1609 = vmatprep.subr.bf16.mxu1 %v1659_v1 }
  0x1a   : > { %v356_v63 = vadd.f32 %v348_v50, %v322_v31  ;;  %v382_v2 = vrot.slane %v374_v53, 2  ;;  %v395_v3 = vunpack.c.l.bf16 %v391_v48  ;;  %v396_v8 = vunpack.c.l.bf16 %v392_v54  ;;  %v1450_v38 = vld [vmem:[%s1975_s1 + $0x5] ss:$0 sm:$0xff]  ;;  %v1449_v43 = vld [vmem:[%s1737_s16 + $0x10] sm:$0x3] }
  0x1b   : > { %1596 = vmatpush3.bf16.msra.mxu0 %v1640_v7  ;;  %v387_v6 = vadd.f32 %v379_v60, %v353_v51  ;;  %v388_v7 = vadd.f32 %v380_v61, %v354_v58  ;;  %v397_v9 = vunpack.c.l.bf16 %v393_v55  ;;  %v389_v13 = vadd.f32 %v381_v0, %v355_v59  ;;  %v1451_v48 = vld [vmem:[%s1737_s16 + $0x4] sm:$0x7]  ;;  %v1453_v54 = vld [vmem:[%s1737_s16 + $0xc] sm:$0x7]  ;;  %v1454_v55 = vld [vmem:[%s1737_s16 + $0x10] sm:$0x7] }
  0x1c   : > { %1597 = vmatprep.subr.bf16.mxu0 %v1659_v1  ;;  %v390_v14 = vadd.f32 %v382_v2, %v356_v63  ;;  %v398_v15 = vunpack.c.l.bf16 %v394_v62  ;;  %v405_v16 = vmul.f32 %v1444_v57, %v395_v3  ;;  %v406_v17 = vmul.f32 %v1444_v57, %v396_v8  ;;  %1610 = vmatpush3.bf16.msra.mxu1 %v1645_v37  ;;  %v1456_v2 = vld [vmem:[%s1737_s16 + $0x4] sm:$0x6]  ;;  %v1458_v8 = vld [vmem:[%s1737_s16 + $0xc] sm:$0x6] }
  0x1d   : > { %v407_v18 = vmul.f32 %v1444_v57, %v397_v9  ;;  %v429_v19 = vunpack.c.l.bf16 %v425_v4  ;;  %v430_v20 = vunpack.c.l.bf16 %v426_v5  ;;  %v431_v23 = vunpack.c.l.bf16 %v427_v10  ;;  %1611 = vmatprep.subr.bf16.mxu1 %v1659_v1  ;;  %v1460_v9 = vld [vmem:[%s1975_s1 + $0x7] ss:$0 sm:$0xff] }
  0x1e   : > { %v408_v21 = vmul.f32 %v1444_v57, %v398_v15  ;;  %v413_v22 = vrot.slane %v405_v16, 3  ;;  %v432_v24 = vunpack.c.l.bf16 %v428_v11  ;;  %v414_v26 = vrot.slane %v406_v17, 3 }
  0x1f   : > { %1598 = vmatpush3.bf16.msra.mxu0 %v1641_v39  ;;  %v415_v27 = vrot.slane %v407_v18, 3  ;;  %v439_v28 = vmul.f32 %v1445_v12, %v429_v19  ;;  %v440_v29 = vmul.f32 %v1445_v12, %v430_v20  ;;  %v441_v33 = vmul.f32 %v1445_v12, %v431_v23 }
  0x20   : > { %1599 = vmatprep.subr.bf16.mxu0 %v1659_v1  ;;  %v416_v31 = vrot.slane %v408_v21, 3  ;;  %v421_v32 = vadd.f32 %v413_v22, %v387_v6  ;;  %v442_v34 = vmul.f32 %v1445_v12, %v432_v24  ;;  %v422_v39 = vadd.f32 %v414_v26, %v388_v7  ;;  %v1457_v7 = vld [vmem:[%s1737_s16 + $0x8] sm:$0x6] }
  0x21   : > { %v423_v40 = vadd.f32 %v415_v27, %v389_v13  ;;  %v447_v41 = vrot.slane %v439_v28, 4  ;;  %v448_v42 = vrot.slane %v440_v29, 4  ;;  %v449_v45 = vrot.slane %v441_v33, 4  ;;  %v1461_v27 = vld [vmem:[%s1737_s16 + $0x4] sm:$0xe] }
  0x22   : > { %v424_v44 = vadd.f32 %v416_v31, %v390_v14  ;;  %v450_v46 = vrot.slane %v442_v34, 4  ;;  %v464_v47 = vunpack.c.l.bf16 %v1446_v30  ;;  %v465_v52 = vunpack.c.l.bf16 %v1447_v35  ;;  %v1459_v14 = vld [vmem:[%s1737_s16 + $0x10] sm:$0x6]  ;;  %v1462_v28 = vld [vmem:[%s1737_s16 + $0x8] sm:$0xe] }
  0x23   : > { %1600 = vmatpush3.bf16.msra.mxu0 %v1642_v49  ;;  %v1452_v49 = vld [vmem:[%s1737_s16 + $0x8] sm:$0x7]  ;;  %v455_v50 = vadd.f32 %v447_v41, %v421_v32  ;;  %v456_v51 = vadd.f32 %v448_v42, %v422_v39  ;;  %v466_v53 = vunpack.c.l.bf16 %v1448_v36  ;;  %v457_v57 = vadd.f32 %v449_v45, %v423_v40  ;;  %v1463_v33 = vld [vmem:[%s1737_s16 + $0xc] sm:$0xe]  ;;  %v1464_v34 = vld [vmem:[%s1737_s16 + $0x10] sm:$0xe] }
  0x24   : > { %v458_v58 = vadd.f32 %v450_v46, %v424_v44  ;;  %v467_v59 = vunpack.c.l.bf16 %v1449_v43  ;;  %v474_v60 = vmul.f32 %v1450_v38, %v464_v47  ;;  %v475_v61 = vmul.f32 %v1450_v38, %v465_v52  ;;  %v1465_v35 = vld [vmem:[%s1975_s1 + $0x8] ss:$0 sm:$0xff]  ;;  %v1646_v40 = vld [vmem:[%s1979_s5 + $0x18] sm:$0xff]   ;;  %v1466_v45 = vld [vmem:[%s1737_s16 + $0x4] sm:$0xc] }
  0x25   : > { %v476_v62 = vmul.f32 %v1450_v38, %v466_v53  ;;  %v486_v63 = vunpack.c.l.bf16 %v1451_v48  ;;  %v487_v0 = vunpack.c.l.bf16 %v1452_v49  ;;  %v488_v5 = vunpack.c.l.bf16 %v1453_v54  ;;  %1612 = vmatpush3.bf16.msra.mxu1 %v1646_v40  ;;  %v1647_v52 = vld [vmem:[%s1979_s5 + $0x20] sm:$0xff]   ;;  %v1470_v53 = vld [vmem:[%s1975_s1 + $0x9] ss:$0 sm:$0xff]  ;;  %v1482_v40 = vld [vmem:[%s1737_s16 + $0xc] sm:$0x6] }
  0x26   : > { %v477_v3 = vmul.f32 %v1450_v38, %v467_v59  ;;  %v478_v4 = vadd.f32 %v474_v60, %v455_v50  ;;  %v489_v6 = vunpack.c.l.bf16 %v1454_v55  ;;  %v479_v10 = vadd.f32 %v475_v61, %v456_v51  ;;  %v1467_v50 = vld [vmem:[%s1737_s16 + $0x8] sm:$0xc]  ;;  %v1468_v51 = vld [vmem:[%s1737_s16 + $0xc] sm:$0xc]  ;;  %1613 = vmatprep.subr.bf16.mxu1 %v1659_v1 }
  0x27   : > { %v480_v11 = vadd.f32 %v476_v62, %v457_v57  ;;  %v496_v12 = vmul.f32 %v1455_v56, %v486_v63  ;;  %v497_v13 = vmul.f32 %v1455_v56, %v487_v0  ;;  %v498_v16 = vmul.f32 %v1455_v56, %v488_v5 }
  0x28   : > { %v481_v15 = vadd.f32 %v477_v3, %v458_v58  ;;  %v499_v17 = vmul.f32 %v1455_v56, %v489_v6  ;;  %v520_v18 = vunpack.c.l.bf16 %v1456_v2  ;;  %v521_v21 = vunpack.c.l.bf16 %v1457_v7  ;;  %v1469_v58 = vld [vmem:[%s1737_s16 + $0x10] sm:$0xc] }
  0x29   : > { %v504_v19 = vrot.slane %v496_v12, 1  ;;  %v505_v20 = vrot.slane %v497_v13, 1  ;;  %v522_v22 = vunpack.c.l.bf16 %v1458_v8  ;;  %v506_v23 = vrot.slane %v498_v16, 1  ;;  %v1471_v8 = vld [vmem:[%s1737_s16 + $0x8] sm:$0x3]  ;;  %1614 = vmatpush3.bf16.msra.mxu1 %v1647_v52 }
  0x2a   : > { %v507_v24 = vrot.slane %v499_v17, 1  ;;  %v523_v25 = vunpack.c.l.bf16 %v1459_v14  ;;  %v530_v26 = vmul.f32 %v1460_v9, %v520_v18  ;;  %v531_v31 = vmul.f32 %v1460_v9, %v521_v21  ;;  %v1473_v14 = vld [vmem:[%s1737_s16 + $0x10] sm:$0x3]  ;;  %1615 = vmatprep.subr.bf16.mxu1 %v1659_v1  ;;  %v1475_v16 = vld [vmem:[%s1975_s1 + $0xa] ss:$0 sm:$0xff] }
  0x2b   : > { %v512_v29 = vadd.f32 %v504_v19, %v478_v4  ;;  %v513_v30 = vadd.f32 %v505_v20, %v479_v10  ;;  %v532_v32 = vmul.f32 %v1460_v9, %v522_v22  ;;  %v514_v36 = vadd.f32 %v506_v23, %v480_v11  ;;  %v1648_v21 = vld [vmem:[%s1979_s5 + $0x28] sm:$0xff]  }
  0x2c   : > { %v515_v37 = vadd.f32 %v507_v24, %v481_v15  ;;  %v533_v38 = vmul.f32 %v1460_v9, %v523_v25  ;;  %v538_v39 = vrot.slane %v530_v26, 2  ;;  %v539_v41 = vrot.slane %v531_v31, 2  ;;  %v1472_v9 = vld [vmem:[%s1737_s16 + $0xc] sm:$0x3]  ;;  %v1474_v15 = vld [vmem:[%s1737_s16 + $0x14] sm:$0x3] }
  0x2d   : > { %v540_v42 = vrot.slane %v532_v32, 2  ;;  %v554_v43 = vunpack.c.l.bf16 %v1461_v27  ;;  %v555_v44 = vunpack.c.l.bf16 %v1462_v28  ;;  %v556_v48 = vunpack.c.l.bf16 %v1463_v33  ;;  %v1480_v22 = vld [vmem:[%s1975_s1 + $0xb] ss:$0 sm:$0xff]  ;;  %v1476_v27 = vld [vmem:[%s1737_s16 + $0x8] sm:$0x7]  ;;  %1616 = vmatpush3.bf16.msra.mxu1 %v1648_v21 }
  0x2e   : > { %v541_v46 = vrot.slane %v533_v38, 2  ;;  %v546_v47 = vadd.f32 %v538_v39, %v512_v29  ;;  %v557_v49 = vunpack.c.l.bf16 %v1464_v34  ;;  %v547_v54 = vadd.f32 %v539_v41, %v513_v30  ;;  %v1477_v32 = vld [vmem:[%s1737_s16 + $0xc] sm:$0x7]  ;;  %v1478_v33 = vld [vmem:[%s1737_s16 + $0x10] sm:$0x7]  ;;  %1617 = vmatprep.subr.bf16.mxu1 %v1659_v1 }
  0x2f   : > { %v548_v55 = vadd.f32 %v540_v42, %v514_v36  ;;  %v564_v56 = vmul.f32 %v1465_v35, %v554_v43  ;;  %v565_v57 = vmul.f32 %v1465_v35, %v555_v44  ;;  %v566_v60 = vmul.f32 %v1465_v35, %v556_v48  ;;  %v1479_v38 = vld [vmem:[%s1737_s16 + $0x14] sm:$0x7]  ;;  %v1481_v39 = vld [vmem:[%s1737_s16 + $0x8] sm:$0x6]  ;;  %v1485_v41 = vld [vmem:[%s1975_s1 + $0xc] ss:$0 sm:$0xff] }
  0x30   : > { %v549_v59 = vadd.f32 %v541_v46, %v515_v37  ;;  %v567_v61 = vmul.f32 %v1465_v35, %v557_v49  ;;  %v588_v62 = vunpack.c.l.bf16 %v1466_v45  ;;  %v589_v2 = vunpack.c.l.bf16 %v1467_v50  ;;  %v1483_v46 = vld [vmem:[%s1737_s16 + $0x10] sm:$0x6] }
  0x31   : > { %v572_v63 = vrot.slane %v564_v56, 3  ;;  %v573_v0 = vrot.slane %v565_v57, 3  ;;  %v590_v3 = vunpack.c.l.bf16 %v1468_v51  ;;  %v574_v4 = vrot.slane %v566_v60, 3  ;;  %v1486_v60 = vld [vmem:[%s1737_s16 + $0x8] sm:$0xe] }
  0x32   : > { %v575_v5 = vrot.slane %v567_v61, 3  ;;  %v591_v6 = vunpack.c.l.bf16 %v1469_v58  ;;  %v598_v7 = vmul.f32 %v1470_v53, %v588_v62  ;;  %v599_v12 = vmul.f32 %v1470_v53, %v589_v2  ;;  %v1487_v2 = vld [vmem:[%s1737_s16 + $0xc] sm:$0xe] }
  0x33   : > { %v580_v10 = vadd.f32 %v572_v63, %v546_v47  ;;  %v581_v11 = vadd.f32 %v573_v0, %v547_v54  ;;  %v600_v13 = vmul.f32 %v1470_v53, %v590_v3  ;;  %v582_v17 = vadd.f32 %v574_v4, %v548_v55  ;;  %v1484_v47 = vld [vmem:[%s1737_s16 + $0x14] sm:$0x6]  ;;  %v1490_v3 = vld [vmem:[%s1975_s1 + $0xd] ss:$0 sm:$0xff] }
  0x34   : > { %v583_v18 = vadd.f32 %v575_v5, %v549_v59  ;;  %v601_v19 = vmul.f32 %v1470_v53, %v591_v6  ;;  %v606_v20 = vrot.slane %v598_v7, 4  ;;  %v607_v23 = vrot.slane %v599_v12, 4 }
  0x35   : > { %v608_v24 = vrot.slane %v600_v13, 4  ;;  %v623_v25 = vunpack.c.l.bf16 %v1471_v8  ;;  %v624_v26 = vunpack.c.l.bf16 %v1472_v9  ;;  %v625_v30 = vunpack.c.l.bf16 %v1473_v14  ;;  %v1488_v8 = vld [vmem:[%s1737_s16 + $0x10] sm:$0xe] }
  0x36   : > { %v609_v28 = vrot.slane %v601_v19, 4  ;;  %v614_v29 = vadd.f32 %v606_v20, %v580_v10  ;;  %v626_v31 = vunpack.c.l.bf16 %v1474_v15  ;;  %v615_v34 = vadd.f32 %v607_v23, %v581_v11  ;;  %v1492_v23 = vld [vmem:[%s1737_s16 + $0xc] sm:$0xc] }
  0x37   : > { %v616_v35 = vadd.f32 %v608_v24, %v582_v17  ;;  %v633_v36 = vmul.f32 %v1475_v16, %v623_v25  ;;  %v634_v37 = vmul.f32 %v1475_v16, %v624_v26  ;;  %v635_v43 = vmul.f32 %v1475_v16, %v625_v30  ;;  %v1489_v17 = vld [vmem:[%s1737_s16 + $0x14] sm:$0xe]  ;;  %v1495_v30 = vld [vmem:[%s1975_s1 + $0xe] ss:$0 sm:$0xff] }
  0x38   : > { %v617_v42 = vadd.f32 %v609_v28, %v583_v18  ;;  %v636_v44 = vmul.f32 %v1475_v16, %v626_v31  ;;  %v645_v45 = vunpack.c.l.bf16 %v1476_v27  ;;  %v646_v50 = vunpack.c.l.bf16 %v1477_v32  ;;  %v1493_v28 = vld [vmem:[%s1737_s16 + $0x10] sm:$0xc] }
  0x39   : > { %v637_v48 = vadd.f32 %v633_v36, %v614_v29  ;;  %v638_v49 = vadd.f32 %v634_v37, %v615_v34  ;;  %v647_v51 = vunpack.c.l.bf16 %v1478_v33  ;;  %v639_v52 = vadd.f32 %v635_v43, %v616_v35  ;;  %v1494_v29 = vld [vmem:[%s1737_s16 + $0x14] sm:$0xc] }
  0x3a   : > { %v640_v53 = vadd.f32 %v636_v44, %v617_v42  ;;  %v648_v54 = vunpack.c.l.bf16 %v1479_v38  ;;  %v655_v55 = vmul.f32 %v1480_v22, %v645_v45  ;;  %v656_v56 = vmul.f32 %v1480_v22, %v646_v50 }
  0x3b   : > { %v657_v57 = vmul.f32 %v1480_v22, %v647_v51  ;;  %v679_v58 = vunpack.c.l.bf16 %v1481_v39  ;;  %v680_v59 = vunpack.c.l.bf16 %v1482_v40  ;;  %v681_v63 = vunpack.c.l.bf16 %v1483_v46 }
  0x3c   : > { %v658_v61 = vmul.f32 %v1480_v22, %v648_v54  ;;  %v663_v62 = vrot.slane %v655_v55, 1  ;;  %v682_v0 = vunpack.c.l.bf16 %v1484_v47  ;;  %v664_v4 = vrot.slane %v656_v56, 1  ;;  %v1491_v22 = vld [vmem:[%s1737_s16 + $0x8] sm:$0xc]  ;;  %v1496_v47 = vld [vmem:[%s1737_s16 + $0xc] sm:$0x3] }
  0x3d   : > { %v665_v5 = vrot.slane %v657_v57, 1  ;;  %v689_v6 = vmul.f32 %v1485_v41, %v679_v58  ;;  %v690_v7 = vmul.f32 %v1485_v41, %v680_v59  ;;  %v691_v11 = vmul.f32 %v1485_v41, %v681_v63  ;;  %v1500_v54 = vld [vmem:[%s1975_s1 + $0xf] ss:$0 sm:$0xff]  ;;  %v1499_v59 = vld [vmem:[%s1737_s16 + $0x18] sm:$0x3] }
  0x3e   : > { %v666_v9 = vrot.slane %v658_v61, 1  ;;  %v671_v10 = vadd.f32 %v663_v62, %v637_v48  ;;  %v692_v12 = vmul.f32 %v1485_v41, %v682_v0  ;;  %v672_v13 = vadd.f32 %v664_v4, %v638_v49  ;;  %v1501_v0 = vld [vmem:[%s1737_s16 + $0xc] sm:$0x7] }
  0x3f   : > { %v673_v14 = vadd.f32 %v665_v5, %v639_v52  ;;  %v697_v15 = vrot.slane %v689_v6, 2  ;;  %v698_v16 = vrot.slane %v690_v7, 2  ;;  %v699_v19 = vrot.slane %v691_v11, 2  ;;  %v1497_v52 = vld [vmem:[%s1737_s16 + $0x10] sm:$0x3] }
  0x40   : > { %v674_v18 = vadd.f32 %v666_v9, %v640_v53  ;;  %v700_v20 = vrot.slane %v692_v12, 2  ;;  %v713_v21 = vunpack.c.l.bf16 %v1486_v60  ;;  %v714_v26 = vunpack.c.l.bf16 %v1487_v2  ;;  %v1498_v53 = vld [vmem:[%s1737_s16 + $0x14] sm:$0x3]  ;;  %v1502_v2 = vld [vmem:[%s1737_s16 + $0x10] sm:$0x7] }
  0x41   : > { %v705_v24 = vadd.f32 %v697_v15, %v671_v10  ;;  %v706_v25 = vadd.f32 %v698_v16, %v672_v13  ;;  %v715_v27 = vunpack.c.l.bf16 %v1488_v8  ;;  %v707_v31 = vadd.f32 %v699_v19, %v673_v14  ;;  %v1503_v7 = vld [vmem:[%s1737_s16 + $0x14] sm:$0x7]  ;;  %v1504_v8 = vld [vmem:[%s1737_s16 + $0x18] sm:$0x7]  ;;  %v1505_v9 = vld [vmem:[%s1975_s1 + $0x10] ss:$0 sm:$0xff] }
  0x42   : > { %v708_v32 = vadd.f32 %v700_v20, %v674_v18  ;;  %v716_v33 = vunpack.c.l.bf16 %v1489_v17  ;;  %v723_v34 = vmul.f32 %v1490_v3, %v713_v21  ;;  %v724_v35 = vmul.f32 %v1490_v3, %v714_v26  ;;  %v1506_v18 = vld [vmem:[%s1737_s16 + $0xc] sm:$0x6] }
  0x43   : > { %v725_v36 = vmul.f32 %v1490_v3, %v715_v27  ;;  %v747_v37 = vunpack.c.l.bf16 %v1491_v22  ;;  %v748_v38 = vunpack.c.l.bf16 %v1492_v23  ;;  %v749_v41 = vunpack.c.l.bf16 %v1493_v28  ;;  %v1507_v23 = vld [vmem:[%s1737_s16 + $0x10] sm:$0x6] }
  0x44   : > { %v726_v39 = vmul.f32 %v1490_v3, %v716_v33  ;;  %v731_v40 = vrot.slane %v723_v34, 3  ;;  %v750_v42 = vunpack.c.l.bf16 %v1494_v29  ;;  %v732_v43 = vrot.slane %v724_v35, 3 }
  0x45   : > { %v733_v44 = vrot.slane %v725_v36, 3  ;;  %v757_v45 = vmul.f32 %v1495_v30, %v747_v37  ;;  %v758_v46 = vmul.f32 %v1495_v30, %v748_v38  ;;  %v759_v50 = vmul.f32 %v1495_v30, %v749_v41 }
  0x46   : > { %v734_v48 = vrot.slane %v726_v39, 3  ;;  %v739_v49 = vadd.f32 %v731_v40, %v705_v24  ;;  %v760_v51 = vmul.f32 %v1495_v30, %v750_v42  ;;  %v740_v55 = vadd.f32 %v732_v43, %v706_v25  ;;  %v1508_v24 = vld [vmem:[%s1737_s16 + $0x14] sm:$0x6]  ;;  %v1510_v25 = vld [vmem:[%s1975_s1 + $0x11] ss:$0 sm:$0xff] }
  0x47   : > { %v741_v56 = vadd.f32 %v733_v44, %v707_v31  ;;  %v765_v57 = vrot.slane %v757_v45, 4  ;;  %v766_v58 = vrot.slane %v758_v46, 4  ;;  %v767_v61 = vrot.slane %v759_v50, 4  ;;  %v1509_v30 = vld [vmem:[%s1737_s16 + $0x18] sm:$0x6] }
  0x48   : > { %v742_v60 = vadd.f32 %v734_v48, %v708_v32  ;;  %v768_v62 = vrot.slane %v760_v51, 4  ;;  %v782_v63 = vunpack.c.l.bf16 %v1496_v47  ;;  %v783_v5 = vunpack.c.l.bf16 %v1497_v52  ;;  %v1511_v43 = vld [vmem:[%s1737_s16 + $0xc] sm:$0xe]  ;;  %v1512_v44 = vld [vmem:[%s1737_s16 + $0x10] sm:$0xe] }
  0x49   : > { %v773_v3 = vadd.f32 %v765_v57, %v739_v49  ;;  %v774_v4 = vadd.f32 %v766_v58, %v740_v55  ;;  %v784_v6 = vunpack.c.l.bf16 %v1498_v53  ;;  %v775_v10 = vadd.f32 %v767_v61, %v741_v56  ;;  %v1513_v49 = vld [vmem:[%s1737_s16 + $0x14] sm:$0xe]  ;;  %v1514_v50 = vld [vmem:[%s1737_s16 + $0x18] sm:$0xe]  ;;  %v1515_v51 = vld [vmem:[%s1975_s1 + $0x12] ss:$0 sm:$0xff] }
  0x4a   : > { %v776_v11 = vadd.f32 %v768_v62, %v742_v60  ;;  %v785_v12 = vunpack.c.l.bf16 %v1499_v59  ;;  %v792_v13 = vmul.f32 %v1500_v54, %v782_v63  ;;  %v793_v14 = vmul.f32 %v1500_v54, %v783_v5  ;;  %v1516_v60 = vld [vmem:[%s1737_s16 + $0xc] sm:$0xc] }
  0x4b   : > { %v794_v15 = vmul.f32 %v1500_v54, %v784_v6  ;;  %v804_v16 = vunpack.c.l.bf16 %v1501_v0  ;;  %v805_v17 = vunpack.c.l.bf16 %v1502_v2  ;;  %v806_v21 = vunpack.c.l.bf16 %v1503_v7  ;;  %v1517_v2 = vld [vmem:[%s1737_s16 + $0x10] sm:$0xc] }
  0x4c   : > { %v795_v19 = vmul.f32 %v1500_v54, %v785_v12  ;;  %v796_v20 = vadd.f32 %v792_v13, %v773_v3  ;;  %v807_v22 = vunpack.c.l.bf16 %v1504_v8  ;;  %v797_v26 = vadd.f32 %v793_v14, %v774_v4  ;;  %v1518_v3 = vld [vmem:[%s1737_s16 + $0x14] sm:$0xc]  ;;  %v1520_v4 = vld [vmem:[%s1975_s1 + $0x13] ss:$0 sm:$0xff] }
  0x4d   : > { %v798_v27 = vadd.f32 %v794_v15, %v775_v10  ;;  %v814_v28 = vmul.f32 %v1505_v9, %v804_v16  ;;  %v815_v29 = vmul.f32 %v1505_v9, %v805_v17  ;;  %v816_v32 = vmul.f32 %v1505_v9, %v806_v21 }
  0x4e   : > { %v799_v31 = vadd.f32 %v795_v19, %v776_v11  ;;  %v817_v33 = vmul.f32 %v1505_v9, %v807_v22  ;;  %v838_v34 = vunpack.c.l.bf16 %v1506_v18  ;;  %v839_v37 = vunpack.c.l.bf16 %v1507_v23  ;;  %v1519_v9 = vld [vmem:[%s1737_s16 + $0x18] sm:$0xc]  ;;  %v1521_v22 = vld [vmem:[%s1737_s16 + $0x10] sm:$0x3]  ;;  %v1522_v23 = vld [vmem:[%s1737_s16 + $0x14] sm:$0x3] }
  0x4f   : > { %v822_v35 = vrot.slane %v814_v28, 1  ;;  %v823_v36 = vrot.slane %v815_v29, 1  ;;  %v840_v38 = vunpack.c.l.bf16 %v1508_v24  ;;  %v824_v39 = vrot.slane %v816_v32, 1  ;;  %v1523_v28 = vld [vmem:[%s1737_s16 + $0x18] sm:$0x3] }
  0x50   : > { %v825_v40 = vrot.slane %v817_v33, 1  ;;  %v841_v41 = vunpack.c.l.bf16 %v1509_v30  ;;  %v848_v42 = vmul.f32 %v1510_v25, %v838_v34  ;;  %v849_v47 = vmul.f32 %v1510_v25, %v839_v37  ;;  %v1524_v29 = vld [vmem:[%s1737_s16 + $0x1c] sm:$0x3]  ;;  %v1525_v30 = vld [vmem:[%s1975_s1 + $0x14] ss:$0 sm:$0xff] }
  0x51   : > { %v830_v45 = vadd.f32 %v822_v35, %v796_v20  ;;  %v831_v46 = vadd.f32 %v823_v36, %v797_v26  ;;  %v850_v48 = vmul.f32 %v1510_v25, %v840_v38  ;;  %v832_v52 = vadd.f32 %v824_v39, %v798_v27  ;;  %v1526_v39 = vld [vmem:[%s1737_s16 + $0x10] sm:$0x7] }
  0x52   : > { %v833_v53 = vadd.f32 %v825_v40, %v799_v31  ;;  %v851_v54 = vmul.f32 %v1510_v25, %v841_v41  ;;  %v856_v55 = vrot.slane %v848_v42, 2  ;;  %v857_v56 = vrot.slane %v849_v47, 2 }
  0x53   : > { %v858_v57 = vrot.slane %v850_v48, 2  ;;  %v872_v58 = vunpack.c.l.bf16 %v1511_v43  ;;  %v873_v59 = vunpack.c.l.bf16 %v1512_v44  ;;  %v874_v63 = vunpack.c.l.bf16 %v1513_v49  ;;  %v1527_v44 = vld [vmem:[%s1737_s16 + $0x14] sm:$0x7] }
  0x54   : > { %v859_v61 = vrot.slane %v851_v54, 2  ;;  %v864_v62 = vadd.f32 %v856_v55, %v830_v45  ;;  %v875_v0 = vunpack.c.l.bf16 %v1514_v50  ;;  %v865_v5 = vadd.f32 %v857_v56, %v831_v46  ;;  %v1528_v45 = vld [vmem:[%s1737_s16 + $0x18] sm:$0x7]  ;;  %v1530_v46 = vld [vmem:[%s1975_s1 + $0x15] ss:$0 sm:$0xff] }
  0x55   : > { %v866_v6 = vadd.f32 %v858_v57, %v832_v52  ;;  %v882_v7 = vmul.f32 %v1515_v51, %v872_v58  ;;  %v883_v8 = vmul.f32 %v1515_v51, %v873_v59  ;;  %v884_v11 = vmul.f32 %v1515_v51, %v874_v63  ;;  %v1531_v56 = vld [vmem:[%s1737_s16 + $0x10] sm:$0x6]  ;;  %v1532_v57 = vld [vmem:[%s1737_s16 + $0x14] sm:$0x6]  ;;  %v1534_v63 = vld [vmem:[%s1737_s16 + $0x1c] sm:$0x6] }
  0x56   : > { %v867_v10 = vadd.f32 %v859_v61, %v833_v53  ;;  %v885_v12 = vmul.f32 %v1515_v51, %v875_v0  ;;  %v906_v13 = vunpack.c.l.bf16 %v1516_v60  ;;  %v907_v16 = vunpack.c.l.bf16 %v1517_v2  ;;  %v1529_v51 = vld [vmem:[%s1737_s16 + $0x1c] sm:$0x7]  ;;  %v1535_v0 = vld [vmem:[%s1975_s1 + $0x16] ss:$0 sm:$0xff] }
  0x57   : > { %v890_v14 = vrot.slane %v882_v7, 3  ;;  %v891_v15 = vrot.slane %v883_v8, 3  ;;  %v908_v17 = vunpack.c.l.bf16 %v1518_v3  ;;  %v892_v18 = vrot.slane %v884_v11, 3 }
  0x58   : > { %v893_v19 = vrot.slane %v885_v12, 3  ;;  %v909_v20 = vunpack.c.l.bf16 %v1519_v9  ;;  %v916_v21 = vmul.f32 %v1520_v4, %v906_v13  ;;  %v917_v26 = vmul.f32 %v1520_v4, %v907_v16 }
  0x59   : > { %v898_v24 = vadd.f32 %v890_v14, %v864_v62  ;;  %v899_v25 = vadd.f32 %v891_v15, %v865_v5  ;;  %v918_v27 = vmul.f32 %v1520_v4, %v908_v17  ;;  %v900_v31 = vadd.f32 %v892_v18, %v866_v6  ;;  %v1533_v62 = vld [vmem:[%s1737_s16 + $0x18] sm:$0x6]  ;;  %v1536_v18 = vld [vmem:[%s1737_s16 + $0x10] sm:$0xe] }
  0x5a   : > { %v901_v32 = vadd.f32 %v893_v19, %v867_v10  ;;  %v919_v33 = vmul.f32 %v1520_v4, %v909_v20  ;;  %v924_v34 = vrot.slane %v916_v21, 4  ;;  %v925_v35 = vrot.slane %v917_v26, 4 }
  0x5b   : > { %v926_v36 = vrot.slane %v918_v27, 4  ;;  %v941_v37 = vunpack.c.l.bf16 %v1521_v22  ;;  %v942_v38 = vunpack.c.l.bf16 %v1522_v23  ;;  %v943_v42 = vunpack.c.l.bf16 %v1523_v28  ;;  %v1537_v23 = vld [vmem:[%s1737_s16 + $0x14] sm:$0xe] }
  0x5c   : > { %v927_v40 = vrot.slane %v919_v33, 4  ;;  %v932_v41 = vadd.f32 %v924_v34, %v898_v24  ;;  %v944_v43 = vunpack.c.l.bf16 %v1524_v29  ;;  %v933_v47 = vadd.f32 %v925_v35, %v899_v25  ;;  %v1538_v24 = vld [vmem:[%s1737_s16 + $0x18] sm:$0xe]  ;;  %v1540_v25 = vld [vmem:[%s1975_s1 + $0x17] ss:$0 sm:$0xff] }
  0x5d   : > { %v934_v48 = vadd.f32 %v926_v36, %v900_v31  ;;  %v951_v49 = vmul.f32 %v1525_v30, %v941_v37  ;;  %v952_v50 = vmul.f32 %v1525_v30, %v942_v38  ;;  %v953_v53 = vmul.f32 %v1525_v30, %v943_v42  ;;  %v1541_v35 = vld [vmem:[%s1737_s16 + $0x10] sm:$0xc]  ;;  %v1542_v36 = vld [vmem:[%s1737_s16 + $0x14] sm:$0xc]  ;;  %v1544_v42 = vld [vmem:[%s1737_s16 + $0x1c] sm:$0xc] }
  0x5e   : > { %v935_v52 = vadd.f32 %v927_v40, %v901_v32  ;;  %v954_v54 = vmul.f32 %v1525_v30, %v944_v43  ;;  %v963_v55 = vunpack.c.l.bf16 %v1526_v39  ;;  %v964_v60 = vunpack.c.l.bf16 %v1527_v44  ;;  %v1539_v30 = vld [vmem:[%s1737_s16 + $0x1c] sm:$0xe]  ;;  %v1545_v43 = vld [vmem:[%s1975_s1 + $0x18] ss:$0 sm:$0xff] }
  0x5f   : > { %v955_v58 = vadd.f32 %v951_v49, %v932_v41  ;;  %v956_v59 = vadd.f32 %v952_v50, %v933_v47  ;;  %v965_v61 = vunpack.c.l.bf16 %v1528_v45  ;;  %v957_v2 = vadd.f32 %v953_v53, %v934_v48  ;;  %v1543_v41 = vld [vmem:[%s1737_s16 + $0x18] sm:$0xc] }
  0x60   : > { %v958_v3 = vadd.f32 %v954_v54, %v935_v52  ;;  %v966_v4 = vunpack.c.l.bf16 %v1529_v51  ;;  %v973_v5 = vmul.f32 %v1530_v46, %v963_v55  ;;  %v974_v6 = vmul.f32 %v1530_v46, %v964_v60 }
  0x61   : > { %v975_v7 = vmul.f32 %v1530_v46, %v965_v61  ;;  %v997_v8 = vunpack.c.l.bf16 %v1531_v56  ;;  %v998_v9 = vunpack.c.l.bf16 %v1532_v57  ;;  %v999_v12 = vunpack.c.l.bf16 %v1533_v62 }
  0x62   : > { %v976_v10 = vmul.f32 %v1530_v46, %v966_v4  ;;  %v981_v11 = vrot.slane %v973_v5, 1  ;;  %v1000_v13 = vunpack.c.l.bf16 %v1534_v63  ;;  %v982_v14 = vrot.slane %v974_v6, 1 }
  0x63   : > { %v983_v15 = vrot.slane %v975_v7, 1  ;;  %v1007_v16 = vmul.f32 %v1535_v0, %v997_v8  ;;  %v1008_v17 = vmul.f32 %v1535_v0, %v998_v9  ;;  %v1009_v21 = vmul.f32 %v1535_v0, %v999_v12  ;;  %v1546_v8 = vld [vmem:[%s1976_s2] ss:$0 sm:$0xff] }
  0x64   : > { %v984_v19 = vrot.slane %v976_v10, 1  ;;  %v989_v20 = vadd.f32 %v981_v11, %v955_v58  ;;  %v1010_v22 = vmul.f32 %v1535_v0, %v1000_v13  ;;  %v990_v26 = vadd.f32 %v982_v14, %v956_v59 }
  0x65   : > { %v991_v27 = vadd.f32 %v983_v15, %v957_v2  ;;  %v1015_v28 = vrot.slane %v1007_v16, 2  ;;  %v1016_v29 = vrot.slane %v1008_v17, 2  ;;  %v1017_v32 = vrot.slane %v1009_v21, 2 }
  0x66   : > { %v992_v31 = vadd.f32 %v984_v19, %v958_v3  ;;  %v1018_v33 = vrot.slane %v1010_v22, 2  ;;  %v1031_v34 = vunpack.c.l.bf16 %v1536_v18  ;;  %v1032_v39 = vunpack.c.l.bf16 %v1537_v23 }
  0x67   : > { %v1023_v37 = vadd.f32 %v1015_v28, %v989_v20  ;;  %v1024_v38 = vadd.f32 %v1016_v29, %v990_v26  ;;  %v1033_v40 = vunpack.c.l.bf16 %v1538_v24  ;;  %v1025_v44 = vadd.f32 %v1017_v32, %v991_v27 }
  0x68   : > { %v1026_v45 = vadd.f32 %v1018_v33, %v992_v31  ;;  %v1034_v46 = vunpack.c.l.bf16 %v1539_v30  ;;  %v1041_v47 = vmul.f32 %v1540_v25, %v1031_v34  ;;  %v1042_v48 = vmul.f32 %v1540_v25, %v1032_v39 }
  0x69   : > { %v1043_v49 = vmul.f32 %v1540_v25, %v1033_v40  ;;  %v1065_v50 = vunpack.c.l.bf16 %v1541_v35  ;;  %v1066_v51 = vunpack.c.l.bf16 %v1542_v36  ;;  %v1067_v54 = vunpack.c.l.bf16 %v1543_v41 }
  0x6a   : > { %v1044_v52 = vmul.f32 %v1540_v25, %v1034_v46  ;;  %v1049_v53 = vrot.slane %v1041_v47, 3  ;;  %v1068_v55 = vunpack.c.l.bf16 %v1544_v42  ;;  %v1050_v56 = vrot.slane %v1042_v48, 3 }
  0x6b   : > { %v1051_v57 = vrot.slane %v1043_v49, 3  ;;  %v1075_v58 = vmul.f32 %v1545_v43, %v1065_v50  ;;  %v1076_v59 = vmul.f32 %v1545_v43, %v1066_v51  ;;  %v1077_v62 = vmul.f32 %v1545_v43, %v1067_v54  ;;  %v1649_v54 = vld [vmem:[%s1979_s5 + $0x30] sm:$0xff]  }
  0x6c   : > { %v1052_v60 = vrot.slane %v1044_v52, 3  ;;  %v1057_v61 = vadd.f32 %v1049_v53, %v1023_v37  ;;  %v1078_v63 = vmul.f32 %v1545_v43, %v1068_v55  ;;  %v1058_v0 = vadd.f32 %v1050_v56, %v1024_v38  ;;  %1618 = vmatpush3.bf16.msra.mxu1 %v1649_v54  ;;  %v1650_v55 = vld [vmem:[%s1979_s5 + $0x38] sm:$0xff]   ;;  %v1161_v56 = vld [vmem:[%s1978_s4] sm:$0x1] }
  0x6d   : > { %v1059_v2 = vadd.f32 %v1051_v57, %v1025_v44  ;;  %v1083_v3 = vrot.slane %v1075_v58, 4  ;;  %v1084_v4 = vrot.slane %v1076_v59, 4  ;;  %v1085_v6 = vrot.slane %v1077_v62, 4  ;;  %1619 = vmatprep.subr.bf16.mxu1 %v1659_v1  ;;  %v1268_v1 = vld [vmem:[%s1980_s6] sm:$0x1] }
  0x6e   : > { %v1060_v5 = vadd.f32 %v1052_v60, %v1026_v45  ;;  %v1086_v7 = vrot.slane %v1078_v63, 4 }
  0x6f   : > { %v1091_v9 = vadd.f32 %v1083_v3, %v1057_v61  ;;  %v1092_v10 = vadd.f32 %v1084_v4, %v1058_v0  ;;  %v1093_v11 = vadd.f32 %v1085_v6, %v1059_v2  ;;  %v1361_v0 = vlaneseq }
  0x70   : > { %v1094_v12 = vadd.f32 %v1086_v7, %v1060_v5  ;;  %1620 = vmatpush3.bf16.msra.mxu1 %v1650_v55 }
  0x71   : > { %v1102_v13 = vadd.f32 %v1546_v8, %v1091_v9  ;;  %v1103_v14 = vadd.f32 %v1546_v8, %v1092_v10  ;;  %v1104_v15 = vadd.f32 %v1546_v8, %v1093_v11  ;;  %v1362_v7 = vshrl.u32 %v1361_v0, 7 }
  0x72   : > { %v1105_v16 = vadd.f32 %v1546_v8, %v1094_v12 }
  0x73   : > { %v1106_v17 = vadd.f32 3.0, %v1102_v13  ;;  %v1107_v18 = vadd.f32 3.0, %v1103_v14  ;;  %v1108_v19 = vadd.f32 3.0, %v1104_v15  ;;  %v1363_v11 = vsub.s32 0, %v1362_v7 }
  0x74   : > { %v1109_v20 = vadd.f32 3.0, %v1105_v16 }
  0x75   : > { %v1110_v21 = vmax.f32 %v1106_v17, 0.0  ;;  %v1111_v22 = vmax.f32 %v1107_v18, 0.0  ;;  %v1112_v23 = vmax.f32 %v1108_v19, 0.0 }
  0x76   : > { %v1113_v24 = vmax.f32 %v1109_v20, 0.0 }
  0x77   : > { %v1114_v25 = vmin.f32 %v1110_v21, 6.0  ;;  %v1115_v26 = vmin.f32 %v1111_v22, 6.0  ;;  %v1116_v27 = vmin.f32 %v1112_v23, 6.0 }
  0x78   : > { %v1117_v28 = vmin.f32 %v1113_v24, 6.0 }
  0x79   : > { %v1118_v29 = vmul.f32 %v1114_v25, %v1102_v13  ;;  %v1119_v30 = vmul.f32 %v1115_v26, %v1103_v14  ;;  %v1120_v31 = vmul.f32 %v1116_v27, %v1104_v15 }
  0x7a   : > { %v1121_v32 = vmul.f32 %v1117_v28, %v1105_v16 }
  0x7b   : > { %v1122_v33 = vmul.f32 0.16666667, %v1118_v29  ;;  %v1123_v34 = vmul.f32 0.16666667, %v1119_v30  ;;  %v1124_v35 = vmul.f32 0.16666667, %v1120_v31 }
  0x7c   : > { %v1125_v36 = vmul.f32 0.16666667, %v1121_v32 }
  0x7d   : > { %v1127_v37 = vsel %vm1126_vm1, %v1122_v33, 0.0  ;;  %v1128_v38 = vsel %vm1126_vm1, %v1123_v34, 0.0  ;;  %v1130_v40 = vsel %vm1126_vm1, %v1124_v35, 0.0 }
  0x7e   : > { %v1129_v39 = vadd.f32 %v1128_v38, %v1127_v37  ;;  %v1132_v41 = vsel %vm1126_vm1, %v1125_v36, 0.0 }
  0x80   : > { %v1131_v42 = vadd.f32 %v1130_v40, %v1129_v39 }
  0x82   : > { %v1133_v43 = vadd.f32 %v1132_v41, %v1131_v42 }
  0x84   : > { %v1135_v44 = vmul.f32 0.25, %v1133_v43 }
  0x86   : > { %v1136_v45 = vsel %vm1126_vm1, %v1135_v44, 0.0 }
  0x87   : > { %v1137_v46 = vrot.slane %v1136_v45, 4 }
  0x89   : > { %v1138_v47 = vadd.f32 %v1137_v46, %v1136_v45 }
  0x8b   : > { %v1139_v48 = vrot.slane %v1138_v47, 2 }
  0x8d   : > { %v1140_v49 = vadd.f32 %v1139_v48, %v1138_v47 }
  0x8f   : > { %v1141_v50 = vrot.slane %v1140_v49, 1 }
  0x91   : > { %v1142_v51 = vadd.f32 %v1141_v50, %v1140_v49 }
  0x93   : > { %v1143_v52 = vmul.f32 0.25, %v1142_v51 }
  0x95   : > { %v1144_v53 = vpack.c.bf16 %v1143_v52, %v1143_v52 }
  0x97   : > { %1602 = vmatmul.mubr.bf16.vlgmr.msra.gmra.mrb[0].mxu0 %v1144_v53 }
 0x16a   : > { %v1244_v57 = vpop.f32.mrb[0].mxu0 }
 0x16b   : > { %v1245_v58 = vadd.f32 %v1244_v57, %v1161_v56  ;;  %v1603_v59 = vpop.f32.mrb[1].mxu0 }
 0x16c   : > { %v1247_v60 = vpop.f32.mrb[2].mxu0 }
 0x16d   : > { %v1250_v61 = vmax.f32 %v1245_v58, 0.0  ;;  %v1604_v62 = vpop.f32.mrb[3].mxu0 }
 0x16f   : > { %v1251_v63 = vpack.c.bf16 %v1250_v61, %v1250_v61 }
 0x171   : > { %1622 = vmatmul.mubr.bf16.vlgmr.msra.gmra.mrb[0].mxu1 %v1251_v63 }
 0x244   : > { %v1351_v2 = vpop.f32.mrb[0].mxu1 }
 0x245   : > { %v1352_v3 = vadd.f32 %v1351_v2, %v1268_v1  ;;  %v1623_v4 = vpop.f32.mrb[1].mxu1 }
 0x246   : > { %v1354_v5 = vpop.f32.mrb[2].mxu1 }
 0x247   : > { %v1357_v6 = vadd.f32 3.0, %v1352_v3  ;;  %v1624_v8 = vpop.f32.mrb[3].mxu1 }
 0x249   : > { %v1358_v9 = vmax.f32 %v1357_v6, 0.0 }
 0x24b   : > { %v1359_v10 = vmin.f32 %v1358_v9, 6.0 }
 0x24d   : > { %v1360_v12 = vmul.f32 0.16666667, %v1359_v10 }
 0x24f   : > { %v1364_v13 = vrot.slane %v1360_v12, %v1363_v11 }
 0x251   : > { %v1365_v14 = vmul.f32 %v1364_v13, %v1122_v33  ;;  %v1366_v15 = vmul.f32 %v1364_v13, %v1123_v34  ;;  %v1367_v16 = vmul.f32 %v1364_v13, %v1124_v35  ;;  %v1368_v17 = vmul.f32 %v1364_v13, %v1125_v36 }
 0x253   : > { %v1369_v18 = vpack.c.bf16 %v1365_v14, %v1365_v14  ;;  %v1370_v19 = vpack.c.bf16 %v1366_v15, %v1366_v15  ;;  %v1371_v20 = vpack.c.bf16 %v1367_v16, %v1367_v16  ;;  %v1372_v21 = vpack.c.bf16 %v1368_v17, %v1368_v17 }
 0x255   : > { %1373 = vst [vmem:[%s278_s17] sm:$0x3] %v1369_v18  ;;  %1374 = vst [vmem:[%s278_s17 + $0x2] sm:$0x3] %v1370_v19 }
 0x256   : > { %1375 = vst [vmem:[%s278_s17 + $0x4] sm:$0x3] %v1371_v20  ;;  %1376 = vst [vmem:[%s278_s17 + $0x6] sm:$0x3] %v1372_v21 }
 0x257 PF: > { %s17_s24 = sadd.s32 1, %s1657_s24  }
 0x258   : > { %p14_p4 = scmp.ge.s32.totalorder %s17_s24, 4  }
 0x25a   :  { %16 = sbr.rel (!%p14_p4) target bundleno = 1 (0x1), region = 82 }

// kernel: _lambda_.30
= control target key start
LH: loop header
LB: loop body
LE: loop exit
PB: predicated region body
PF: predicated region fallthrough
CT: control target
= control target key end

     0   :  { %v284_v6 = vmov 1966171168   ;;  %v67_v8 = vlaneseq  ;;  %s362_s1 = inlined_call_operand.vmem [shape: bf16[256,128], index: 1, kind: input, shape index: {}]   ;;  %s363_s0 = inlined_call_operand.vmem [shape: bf16[1,2,256], index: 0, kind: input, shape index: {}]   ;;  %s364_s2 = inlined_call_operand.vmem [shape: f32[1,128], index: 2, kind: input, shape index: {}]   ;;  %s365_s3 = inlined_call_operand.vmem [shape: bf16[1,2,128], index: 3, kind: output, shape index: {}]  }
   0x1   :  { %v268_v0 = vld [vmem:[%s362_s1 + $0x40] sm:$0xff]   ;;  %v270_v2 = vld [vmem:[%s362_s1 + $0x48] sm:$0xff]   ;;  %v272_v4 = vld [vmem:[%s362_s1 + $0x50] sm:$0xff]   ;;  %v65_v7 = vunpack.c.l.s4 %v284_v6 }
   0x2   :  { %v269_v1 = vld [vmem:[%s362_s1] sm:$0xff]   ;;  %245 = vmatprep.subr.bf16.mxu0 %v268_v0  ;;  %v271_v3 = vld [vmem:[%s362_s1 + $0x8] sm:$0xff]   ;;  %v273_v5 = vld [vmem:[%s362_s1 + $0x10] sm:$0xff]   ;;  %v68_v12 = vshrl.u32 %v67_v8, 7 }
   0x3   :  { %246 = vmatpush3.bf16.msra.mxu0 %v269_v1  ;;  %v274_v9 = vld [vmem:[%s362_s1 + $0x58] sm:$0xff]   ;;  %v66_v11 = vunpack.c.0.s8 %v65_v7  ;;  %v276_v13 = vld [vmem:[%s362_s1 + $0x60] sm:$0xff]   ;;  %v278_v16 = vld [vmem:[%s362_s1 + $0x68] sm:$0xff]  }
   0x4   :  { %247 = vmatprep.subr.bf16.mxu0 %v270_v2  ;;  %v275_v10 = vld [vmem:[%s362_s1 + $0x18] sm:$0xff]   ;;  %v277_v14 = vld [vmem:[%s362_s1 + $0x20] sm:$0xff]   ;;  %v279_v19 = vld [vmem:[%s362_s1 + $0x28] sm:$0xff]  }
   0x5   :  { %v69_v15 = vsub.s32 %v66_v11, %v68_v12  ;;  %v228_v17 = vld.sshfl [vmem:[%s363_s0] sm:$0x11 pattern:$0x75316420]  ;;  %v280_v21 = vld [vmem:[%s362_s1 + $0x70] sm:$0xff]   ;;  %v282_v23 = vld [vmem:[%s362_s1 + $0x78] sm:$0xff]  }
   0x6   :  { %v63_v18 = vcombine.high %v228_v17, %v228_v17  ;;  %v281_v22 = vld [vmem:[%s362_s1 + $0x30] sm:$0xff]   ;;  %v283_v24 = vld [vmem:[%s362_s1 + $0x38] sm:$0xff]   ;;  %v227_v27 = vld [vmem:[%s364_s2] ss:$0 sm:$0xff] }
   0x7   :  { %248 = vmatpush3.bf16.msra.mxu0 %v271_v3  ;;  %v70_v25 = vrot.slane %v228_v17, %v69_v15 }
   0x8   :  { %249 = vmatprep.subr.bf16.mxu0 %v272_v4  ;;  %v77_v20 = vrot.slane %v63_v18, %v69_v15 }
   0xa   :  { %208 = vmatprep.mubr.bf16.mxu0 %v77_v20 }
   0xb   :  { %250 = vmatpush3.bf16.msra.mxu0 %v273_v5 }
   0xc   :  { %251 = vmatprep.subr.bf16.mxu0 %v274_v9 }
   0xf   :  { %252 = vmatpush3.bf16.msra.mxu0 %v275_v10 }
  0x10   :  { %253 = vmatprep.subr.bf16.mxu0 %v276_v13 }
  0x13   :  { %254 = vmatpush3.bf16.msra.mxu0 %v277_v14 }
  0x14   :  { %255 = vmatprep.subr.bf16.mxu0 %v278_v16 }
  0x17   :  { %256 = vmatpush3.bf16.msra.mxu0 %v279_v19 }
  0x18   :  { %257 = vmatprep.subr.bf16.mxu0 %v280_v21 }
  0x1b   :  { %258 = vmatpush3.bf16.msra.mxu0 %v281_v22 }
  0x1c   :  { %259 = vmatprep.subr.bf16.mxu0 %v282_v23 }
  0x1f   :  { %260 = vmatpush3.bf16.msra.mxu0 %v283_v24 }
  0x22   :  { %209 = vmatmul.mubr.bf16.vlgmr.msra.gmra.mrb[0].mxu0 %v70_v25 }
  0xf5   :  { %v261_v26 = vpop.f32.mrb[0].mxu0 }
  0xf6   :  { %v262_v28 = vpop.f32.mrb[1].mxu0 }
  0xf7   :  { %v263_v29 = vadd.f32 %v262_v28, %v261_v26  ;;  %v264_v30 = vpop.f32.mrb[2].mxu0 }
  0xf8   :  { %v265_v31 = vpop.f32.mrb[3].mxu0 }
  0xf9   :  { %v211_v32 = vadd.f32 %v263_v29, %v227_v27 }
  0xfb   :  { %v216_v33 = vadd.f32 3.0, %v211_v32 }
  0xfd   :  { %v217_v34 = vmax.f32 %v216_v33, 0.0 }
  0xff   :  { %v218_v35 = vmin.f32 %v217_v34, 6.0 }
 0x101   :  { %v219_v36 = vmul.f32 %v218_v35, %v211_v32 }
 0x103   :  { %v220_v37 = vmul.f32 0.16666667, %v219_v36 }
 0x105   :  { %v221_v38 = vpack.c.bf16 %v220_v37, %v220_v37 }
 0x107   :  { %222 = vst [vmem:[%s365_s3] sm:$0x1] %v221_v38 }

// kernel: _lambda_.31
= control target key start
LH: loop header
LB: loop body
LE: loop exit
PB: predicated region body
PF: predicated region fallthrough
CT: control target
= control target key end

     0   :  { %v180_v0 = vmov 0.0   ;;  %vm181_vm0 = vmmov 0   ;;  %s235_s1 = inlined_call_operand.vmem [shape: bf16[128,128], index: 1, kind: input, shape index: {}]   ;;  %s236_s0 = inlined_call_operand.vmem [shape: bf16[1,2,128], index: 0, kind: input, shape index: {}]   ;;  %s237_s2 = inlined_call_operand.vmem [shape: f32[1,128], index: 2, kind: input, shape index: {}]   ;;  %s238_s3 = inlined_call_operand.vmem [shape: f32[1,2,128], index: 3, kind: output, shape index: {}]  }
   0x1   :  { %150 = vmatprep.subr.bf16.mxu0 %v180_v0  ;;  %v172_v1 = vld [vmem:[%s235_s1] sm:$0xff]   ;;  %166 = vmatprep.mubr.msk.bf16.mxu0 %vm181_vm0, %v180_v0  ;;  %v173_v2 = vld [vmem:[%s235_s1 + $0x8] sm:$0xff]   ;;  %v174_v3 = vld [vmem:[%s235_s1 + $0x10] sm:$0xff]  }
   0x2   :  { %151 = vmatpush3.bf16.msra.mxu0 %v172_v1  ;;  %v175_v4 = vld [vmem:[%s235_s1 + $0x18] sm:$0xff]   ;;  %v176_v5 = vld [vmem:[%s235_s1 + $0x20] sm:$0xff]   ;;  %v177_v6 = vld [vmem:[%s235_s1 + $0x28] sm:$0xff]  }
   0x3   :  { %152 = vmatprep.subr.bf16.mxu0 %v180_v0  ;;  %v178_v7 = vld [vmem:[%s235_s1 + $0x30] sm:$0xff]   ;;  %v179_v8 = vld [vmem:[%s235_s1 + $0x38] sm:$0xff]   ;;  %v15_v9 = vld [vmem:[%s236_s0] sm:$0x1] }
   0x4   :  { %v132_v10 = vld [vmem:[%s237_s2] ss:$0 sm:$0xff] }
   0x6   :  { %153 = vmatpush3.bf16.msra.mxu0 %v173_v2 }
   0x7   :  { %154 = vmatprep.subr.bf16.mxu0 %v180_v0 }
   0xa   :  { %155 = vmatpush3.bf16.msra.mxu0 %v174_v3 }
   0xb   :  { %156 = vmatprep.subr.bf16.mxu0 %v180_v0 }
   0xe   :  { %157 = vmatpush3.bf16.msra.mxu0 %v175_v4 }
   0xf   :  { %158 = vmatprep.subr.bf16.mxu0 %v180_v0 }
  0x12   :  { %159 = vmatpush3.bf16.msra.mxu0 %v176_v5 }
  0x13   :  { %160 = vmatprep.subr.bf16.mxu0 %v180_v0 }
  0x16   :  { %161 = vmatpush3.bf16.msra.mxu0 %v177_v6 }
  0x17   :  { %162 = vmatprep.subr.bf16.mxu0 %v180_v0 }
  0x1a   :  { %163 = vmatpush3.bf16.msra.mxu0 %v178_v7 }
  0x1b   :  { %164 = vmatprep.subr.bf16.mxu0 %v180_v0 }
  0x1e   :  { %165 = vmatpush3.bf16.msra.mxu0 %v179_v8 }
  0x21   :  { %167 = vmatmul.mubr.bf16.vlgmr.msra.gmra.mrb[0].mxu0 %v15_v9 }
  0xf4   :  { %v121_v11 = vpop.f32.mrb[0].mxu0 }
  0xf5   :  { %v122_v12 = vadd.f32 %v132_v10, %v121_v11  ;;  %v168_v13 = vpop.f32.mrb[1].mxu0 }
  0xf6   :  { %v124_v14 = vpop.f32.mrb[2].mxu0 }
  0xf7   :  { %127 = vst [vmem:[%s238_s3] sm:$0x3] %v122_v12  ;;  %v169_v15 = vpop.f32.mrb[3].mxu0 }

</bundles_post_ra>
